<compile_context>
chip_gen: v7x
topology: tpu7x:2x2x1
jax: 0.10.0
libtpu: 0.0.40
codegen_flags: <defaults>
</compile_context>

<pallas_src>
import functools

import jax
import jax.numpy as jnp
from jax.experimental import pallas as pl
from jax.experimental.pallas import tpu as pltpu


def lstm_kernel(x_ref, wih_ref, b_ref, whh_hbm, wfc_hbm, bfc_hbm, out_ref,
                xp_ref, whh_ref, wfc_ref, bfc_ref, dma_sem,
                *, seq_len, batch, hidden_size):
    T, B, H = seq_len, batch, hidden_size

    # ---- Kick off weight DMAs (HBM -> VMEM) so they overlap Phase 1 / Phase 2 compute ----
    whh_cp = pltpu.make_async_copy(whh_hbm, whh_ref, dma_sem.at[0])
    wfc_cp = pltpu.make_async_copy(wfc_hbm, wfc_ref, dma_sem.at[1])
    bfc_cp = pltpu.make_async_copy(bfc_hbm, bfc_ref, dma_sem.at[2])
    whh_cp.start()
    wfc_cp.start()
    bfc_cp.start()

    # ---- Phase 1: batched input projection for ALL timesteps (time-independent) ----
    # x_ref: (T*B, D) bf16, time-major (rows t*B:(t+1)*B belong to timestep t).
    xp_ref[...] = (jnp.dot(x_ref[...], wih_ref[...],
                           preferred_element_type=jnp.float32)
                   + b_ref[...])                       # bias (b_ih + b_hh) added once

    # W_hh is only needed from here on — its DMA has been hidden behind the matmul above.
    whh_cp.wait()

    def sigmoid(z):
        # One EUP op (tanh) instead of exp+add+divide; muls/adds co-issue on the VPU slot.
        return 0.5 * jnp.tanh(0.5 * z) + 0.5

    # ---- Phase 2: recurrence (fully unrolled; T is small and static) ----
    h = jnp.zeros((B, H), jnp.float32)
    c = jnp.zeros((B, H), jnp.float32)
    for t in range(T):                                 # static unroll
        xp_t = xp_ref[t * B:(t + 1) * B, :]            # per-step load from VMEM scratch
        gates = xp_t + jnp.dot(h.astype(whh_ref.dtype), whh_ref[...],
                               preferred_element_type=jnp.float32)   # (B, 4H) f32
        sig = sigmoid(gates[:, :3 * H])                # contiguous [i | f | o]
        g_g = jnp.tanh(gates[:, 3 * H:])               # [g]
        i_g = sig[:, 0 * H:1 * H]
        f_g = sig[:, 1 * H:2 * H]
        o_g = sig[:, 2 * H:3 * H]
        c = f_g * c + i_g * g_g
        h = o_g * jnp.tanh(c)

    # ---- Phase 3: FC head on the last hidden state (lane-padded output) ----
    wfc_cp.wait()
    bfc_cp.wait()
    fc = jnp.dot(h.astype(wfc_ref.dtype), wfc_ref[...],
                 preferred_element_type=jnp.float32) + bfc_ref[...]
    out_ref[...] = fc.astype(out_ref.dtype)


def pack_lstm_params(params):
    """One-time host-side weight repack (call once, reuse across forward calls)."""
    w_ih, w_hh, b_ih, b_hh, w_fc, b_fc = params
    H = w_hh.shape[1]            # w_hh: (4H, H)
    D = w_ih.shape[1]            # w_ih: (4H, D)
    C = w_fc.shape[0]            # w_fc: (C, H)

    # Lane-alignment assumptions (gate slices at multiples of 128).
    assert H % 128 == 0, "hidden_size must be a multiple of 128 for lane-aligned gate slices"
    assert D % 128 == 0, "input_size must be a multiple of 128"
    C_PAD = ((C + 127) // 128) * 128

    # Gate reorder [i,f,g,o] -> [i,f,o,g] via concat of contiguous row-block slices (no gather).
    def reorder_rows(w):
        return jnp.concatenate([w[:2 * H], w[3 * H:4 * H], w[2 * H:3 * H]], axis=0)

    wih_t = jnp.transpose(reorder_rows(w_ih)).astype(jnp.bfloat16)           # (D, 4H)
    whh_t = jnp.transpose(reorder_rows(w_hh)).astype(jnp.bfloat16)           # (H, 4H)
    b_sum = b_ih + b_hh
    b = jnp.concatenate([b_sum[:2 * H], b_sum[3 * H:4 * H], b_sum[2 * H:3 * H]]
                        ).reshape(1, 4 * H).astype(jnp.float32)              # (1, 4H)

    wfc_t = jnp.zeros((H, C_PAD), jnp.bfloat16).at[:, :C].set(
        jnp.transpose(w_fc).astype(jnp.bfloat16))                            # (H, C_PAD)
    bfc = jnp.zeros((1, C_PAD), jnp.float32).at[:, :C].set(b_fc.astype(jnp.float32))

    return (wih_t, b, whh_t, wfc_t, bfc)


def lstm_model_forward(x, packed, *, num_classes):
    """x: (B, T, input_size), packed = pack_lstm_params(params)  ->  (B, num_classes)."""
    wih_t, b, whh_t, wfc_t, bfc = packed
    B, T, D = x.shape
    H = whh_t.shape[0]
    C_PAD = wfc_t.shape[1]

    # Time-major, flattened over (T, B) so the input projection is one big matmul.
    x2d = jnp.transpose(x, (1, 0, 2)).reshape(T * B, D).astype(jnp.bfloat16)   # (T*B, D)

    kernel = functools.partial(lstm_kernel, seq_len=T, batch=B, hidden_size=H)

    out = pl.pallas_call(
        kernel,
        out_shape=jax.ShapeDtypeStruct((B, C_PAD), jnp.float32),
        in_specs=[
            pl.BlockSpec(memory_space=pltpu.MemorySpace.VMEM),   # x2d
            pl.BlockSpec(memory_space=pltpu.MemorySpace.VMEM),   # W_ih^T
            pl.BlockSpec(memory_space=pltpu.MemorySpace.VMEM),   # bias
            pl.BlockSpec(memory_space=pl.ANY),                   # W_hh^T  (stays in HBM)
            pl.BlockSpec(memory_space=pl.ANY),                   # W_fc^T  (stays in HBM)
            pl.BlockSpec(memory_space=pl.ANY),                   # b_fc    (stays in HBM)
        ],
        out_specs=pl.BlockSpec(memory_space=pltpu.MemorySpace.VMEM),
        scratch_shapes=[
            pltpu.VMEM((T * B, 4 * H), jnp.float32),   # xp (input projection, all timesteps)
            pltpu.VMEM((H, 4 * H), jnp.bfloat16),      # W_hh^T landing buffer
            pltpu.VMEM((H, C_PAD), jnp.bfloat16),      # W_fc^T landing buffer
            pltpu.VMEM((1, C_PAD), jnp.float32),       # b_fc landing buffer
            pltpu.SemaphoreType.DMA((3,)),             # one sem per weight DMA
        ],
    )(x2d, wih_t, b, whh_t, wfc_t, bfc)
    return out[:, :num_classes]


def lstm_model_reference(x, params):
    """Pure-JAX f32 reference matching PyTorch nn.LSTM + Linear semantics."""
    w_ih, w_hh, b_ih, b_hh, w_fc, b_fc = params
    B, T, D = x.shape
    H = w_hh.shape[1]

    def step(carry, x_t):
        h, c = carry
        gates = x_t @ w_ih.T + b_ih + h @ w_hh.T + b_hh
        i = jax.nn.sigmoid(gates[:, 0 * H:1 * H])
        f = jax.nn.sigmoid(gates[:, 1 * H:2 * H])
        g = jnp.tanh(gates[:, 2 * H:3 * H])
        o = jax.nn.sigmoid(gates[:, 3 * H:4 * H])
        c = f * c + i * g
        h = o * jnp.tanh(c)
        return (h, c), h

    init = (jnp.zeros((B, H), jnp.float32), jnp.zeros((B, H), jnp.float32))
    (h_last, _), _ = jax.lax.scan(step, init, jnp.transpose(x, (1, 0, 2)))
    return h_last @ w_fc.T + b_fc


def init_params(key, input_size=512, hidden_size=256, num_classes=7):
    # Deterministic init (PyTorch-style uniform(-1/sqrt(H), 1/sqrt(H))).
    k = 1.0 / jnp.sqrt(jnp.float32(hidden_size))
    keys = jax.random.split(key, 6)
    w_ih = jax.random.uniform(keys[0], (4 * hidden_size, input_size), jnp.float32, -k, k)
    w_hh = jax.random.uniform(keys[1], (4 * hidden_size, hidden_size), jnp.float32, -k, k)
    b_ih = jax.random.uniform(keys[2], (4 * hidden_size,), jnp.float32, -k, k)
    b_hh = jax.random.uniform(keys[3], (4 * hidden_size,), jnp.float32, -k, k)
    w_fc = jax.random.uniform(keys[4], (num_classes, hidden_size), jnp.float32, -k, k)
    b_fc = jax.random.uniform(keys[5], (num_classes,), jnp.float32, -k, k)
    return (w_ih, w_hh, b_ih, b_hh, w_fc, b_fc)


if __name__ == "__main__":
    B, T, INPUT, HIDDEN, CLASSES = 2, 8, 512, 256, 7

    key = jax.random.PRNGKey(0)
    k_x, k_p = jax.random.split(key)
    x = jax.random.normal(k_x, (B, T, INPUT), jnp.float32)
    params = init_params(k_p, INPUT, HIDDEN, CLASSES)

    # Weight repacking done ONCE (out of the per-call path), then reused across calls.
    packed = jax.tree_util.tree_map(jax.block_until_ready, pack_lstm_params(params))

    forward = jax.jit(functools.partial(lstm_model_forward, num_classes=CLASSES))
    out = forward(x, packed)
    out = jax.block_until_ready(out)

    ref = lstm_model_reference(x, params)
    assert out.shape == (B, CLASSES)
    # bf16 matmul operands with f32 accumulation -> relaxed tolerance vs the f32 reference.
    err = jnp.max(jnp.abs(out - ref))
    assert jnp.allclose(out, ref, atol=5e-2, rtol=5e-2), f"mismatch vs reference (max err {err})"

    print("KERNEL_OK")
</pallas_src>

<mosaic_0001>
module attributes {stable_mosaic.version = 11 : i64} {
  func.func @lstm_kernel(%arg0: memref<16x512xbf16, #tpu.memory_space<vmem>>, %arg1: memref<512x1024xbf16, #tpu.memory_space<vmem>>, %arg2: memref<1x1024xf32, #tpu.memory_space<vmem>>, %arg3: memref<256x1024xbf16, #tpu.memory_space<any>>, %arg4: memref<256x128xbf16, #tpu.memory_space<any>>, %arg5: memref<1x128xf32, #tpu.memory_space<any>>, %arg6: memref<2x128xf32, #tpu.memory_space<vmem>>, %arg7: memref<16x1024xf32, #tpu.memory_space<vmem>>, %arg8: memref<256x1024xbf16, #tpu.memory_space<vmem>>, %arg9: memref<256x128xbf16, #tpu.memory_space<vmem>>, %arg10: memref<1x128xf32, #tpu.memory_space<vmem>>, %arg11: memref<3x!tpu.dma_semaphore, #tpu.memory_space<semaphore_mem>>) attributes {dimension_semantics = [], scalar_prefetch = 0 : i64, scratch_operands = 5 : i64, tpu.core_type = #tpu.core_type<tc>} {
    %c0_i32 = arith.constant 0 : i32
    %0 = tpu.memref_slice %arg11[%c0_i32] : memref<3x!tpu.dma_semaphore, #tpu.memory_space<semaphore_mem>> -> memref<1x!tpu.dma_semaphore, #tpu.memory_space<semaphore_mem>>
    %1 = tpu.memref_squeeze %0 : memref<1x!tpu.dma_semaphore, #tpu.memory_space<semaphore_mem>> -> memref<!tpu.dma_semaphore, #tpu.memory_space<semaphore_mem>>
    tpu.enqueue_dma source(%arg3 : memref<256x1024xbf16, #tpu.memory_space<any>>) target(%arg8 : memref<256x1024xbf16, #tpu.memory_space<vmem>>) target_semaphore(%1 : memref<!tpu.dma_semaphore, #tpu.memory_space<semaphore_mem>>)
    %c1_i32 = arith.constant 1 : i32
    %2 = tpu.memref_slice %arg11[%c1_i32] : memref<3x!tpu.dma_semaphore, #tpu.memory_space<semaphore_mem>> -> memref<1x!tpu.dma_semaphore, #tpu.memory_space<semaphore_mem>>
    %3 = tpu.memref_squeeze %2 : memref<1x!tpu.dma_semaphore, #tpu.memory_space<semaphore_mem>> -> memref<!tpu.dma_semaphore, #tpu.memory_space<semaphore_mem>>
    tpu.enqueue_dma source(%arg4 : memref<256x128xbf16, #tpu.memory_space<any>>) target(%arg9 : memref<256x128xbf16, #tpu.memory_space<vmem>>) target_semaphore(%3 : memref<!tpu.dma_semaphore, #tpu.memory_space<semaphore_mem>>)
    %c2_i32 = arith.constant 2 : i32
    %4 = tpu.memref_slice %arg11[%c2_i32] : memref<3x!tpu.dma_semaphore, #tpu.memory_space<semaphore_mem>> -> memref<1x!tpu.dma_semaphore, #tpu.memory_space<semaphore_mem>>
    %5 = tpu.memref_squeeze %4 : memref<1x!tpu.dma_semaphore, #tpu.memory_space<semaphore_mem>> -> memref<!tpu.dma_semaphore, #tpu.memory_space<semaphore_mem>>
    tpu.enqueue_dma source(%arg5 : memref<1x128xf32, #tpu.memory_space<any>>) target(%arg10 : memref<1x128xf32, #tpu.memory_space<vmem>>) target_semaphore(%5 : memref<!tpu.dma_semaphore, #tpu.memory_space<semaphore_mem>>)
    %c0 = arith.constant 0 : index
    %c0_0 = arith.constant 0 : index
    %6 = vector.load %arg0[%c0, %c0_0] : memref<16x512xbf16, #tpu.memory_space<vmem>>, vector<16x512xbf16>
    %c0_1 = arith.constant 0 : index
    %c0_2 = arith.constant 0 : index
    %7 = vector.load %arg1[%c0_1, %c0_2] : memref<512x1024xbf16, #tpu.memory_space<vmem>>, vector<512x1024xbf16>
    %cst = arith.constant dense<0.000000e+00> : vector<16x1024xf32>
    %8 = tpu.matmul %6, %7, %cst {dimension_numbers = #tpu.dot_dimension_numbers<[1], [0], [0], [1], [0, 0, 1, 1], [], []>} : vector<16x512xbf16>, vector<512x1024xbf16>, vector<16x1024xf32> -> vector<16x1024xf32>
    %c0_3 = arith.constant 0 : index
    %c0_4 = arith.constant 0 : index
    %9 = vector.load %arg2[%c0_3, %c0_4] : memref<1x1024xf32, #tpu.memory_space<vmem>>, vector<1x1024xf32>
    %10 = vector.broadcast %9 : vector<1x1024xf32> to vector<16x1024xf32>
    %11 = arith.addf %8, %10 : vector<16x1024xf32>
    %c0_5 = arith.constant 0 : index
    %c0_6 = arith.constant 0 : index
    %12 = vector.load %arg7[%c0_5, %c0_6] : memref<16x1024xf32, #tpu.memory_space<vmem>>, vector<16x1024xf32>
    tpu.vector_store %arg7[%c0_5, %c0_6], %11 {strides = array<i32>} : memref<16x1024xf32, #tpu.memory_space<vmem>>, vector<16x1024xf32>,
    %c0_i32_7 = arith.constant 0 : i32
    %13 = tpu.memref_slice %arg11[%c0_i32_7] : memref<3x!tpu.dma_semaphore, #tpu.memory_space<semaphore_mem>> -> memref<1x!tpu.dma_semaphore, #tpu.memory_space<semaphore_mem>>
    %14 = tpu.memref_squeeze %13 : memref<1x!tpu.dma_semaphore, #tpu.memory_space<semaphore_mem>> -> memref<!tpu.dma_semaphore, #tpu.memory_space<semaphore_mem>>
    tpu.wait_dma2 semaphore(%14 : memref<!tpu.dma_semaphore, #tpu.memory_space<semaphore_mem>>) src(%arg3 : memref<256x1024xbf16, #tpu.memory_space<any>>) dst(%arg8 : memref<256x1024xbf16, #tpu.memory_space<vmem>>)
    %cst_8 = arith.constant 0.000000e+00 : f32
    %15 = vector.broadcast %cst_8 : f32 to vector<2x256xf32>
    %cst_9 = arith.constant 0.000000e+00 : f32
    %16 = vector.broadcast %cst_9 : f32 to vector<2x256xf32>
    %c0_10 = arith.constant 0 : index
    %c0_11 = arith.constant 0 : index
    %17 = vector.load %arg7[%c0_10, %c0_11] : memref<16x1024xf32, #tpu.memory_space<vmem>>, vector<2x1024xf32>
    %18 = arith.truncf %15 : vector<2x256xf32> to vector<2x256xbf16>
    %c0_12 = arith.constant 0 : index
    %c0_13 = arith.constant 0 : index
    %19 = vector.load %arg8[%c0_12, %c0_13] : memref<256x1024xbf16, #tpu.memory_space<vmem>>, vector<256x1024xbf16>
    %cst_14 = arith.constant dense<0.000000e+00> : vector<2x1024xf32>
    %20 = tpu.matmul %18, %19, %cst_14 {dimension_numbers = #tpu.dot_dimension_numbers<[1], [0], [0], [1], [0, 0, 1, 1], [], []>} : vector<2x256xbf16>, vector<256x1024xbf16>, vector<2x1024xf32> -> vector<2x1024xf32>
    %21 = arith.addf %17, %20 : vector<2x1024xf32>
    %22 = vector.extract_strided_slice %21 {offsets = [0, 0], sizes = [2, 768], strides = [1, 1]} : vector<2x1024xf32> to vector<2x768xf32>
    %cst_15 = arith.constant 5.000000e-01 : f32
    %23 = vector.broadcast %cst_15 : f32 to vector<2x768xf32>
    %24 = arith.mulf %23, %22 : vector<2x768xf32>
    %25 = math.tanh %24 : vector<2x768xf32>
    %cst_16 = arith.constant 5.000000e-01 : f32
    %26 = vector.broadcast %cst_16 : f32 to vector<2x768xf32>
    %27 = arith.mulf %26, %25 : vector<2x768xf32>
    %cst_17 = arith.constant 5.000000e-01 : f32
    %28 = vector.broadcast %cst_17 : f32 to vector<2x768xf32>
    %29 = arith.addf %27, %28 : vector<2x768xf32>
    %30 = vector.extract_strided_slice %21 {offsets = [0, 768], sizes = [2, 256], strides = [1, 1]} : vector<2x1024xf32> to vector<2x256xf32>
    %31 = math.tanh %30 : vector<2x256xf32>
    %32 = vector.extract_strided_slice %29 {offsets = [0, 0], sizes = [2, 256], strides = [1, 1]} : vector<2x768xf32> to vector<2x256xf32>
    %33 = vector.extract_strided_slice %29 {offsets = [0, 256], sizes = [2, 256], strides = [1, 1]} : vector<2x768xf32> to vector<2x256xf32>
    %34 = vector.extract_strided_slice %29 {offsets = [0, 512], sizes = [2, 256], strides = [1, 1]} : vector<2x768xf32> to vector<2x256xf32>
    %35 = arith.mulf %33, %16 : vector<2x256xf32>
    %36 = arith.mulf %32, %31 : vector<2x256xf32>
    %37 = arith.addf %35, %36 : vector<2x256xf32>
    %38 = math.tanh %37 : vector<2x256xf32>
    %39 = arith.mulf %34, %38 : vector<2x256xf32>
    %c2 = arith.constant 2 : index
    %c0_18 = arith.constant 0 : index
    %40 = vector.load %arg7[%c2, %c0_18] : memref<16x1024xf32, #tpu.memory_space<vmem>>, vector<2x1024xf32>
    %41 = arith.truncf %39 : vector<2x256xf32> to vector<2x256xbf16>
    %c0_19 = arith.constant 0 : index
    %c0_20 = arith.constant 0 : index
    %42 = vector.load %arg8[%c0_19, %c0_20] : memref<256x1024xbf16, #tpu.memory_space<vmem>>, vector<256x1024xbf16>
    %cst_21 = arith.constant dense<0.000000e+00> : vector<2x1024xf32>
    %43 = tpu.matmul %41, %42, %cst_21 {dimension_numbers = #tpu.dot_dimension_numbers<[1], [0], [0], [1], [0, 0, 1, 1], [], []>} : vector<2x256xbf16>, vector<256x1024xbf16>, vector<2x1024xf32> -> vector<2x1024xf32>
    %44 = arith.addf %40, %43 : vector<2x1024xf32>
    %45 = vector.extract_strided_slice %44 {offsets = [0, 0], sizes = [2, 768], strides = [1, 1]} : vector<2x1024xf32> to vector<2x768xf32>
    %cst_22 = arith.constant 5.000000e-01 : f32
    %46 = vector.broadcast %cst_22 : f32 to vector<2x768xf32>
    %47 = arith.mulf %46, %45 : vector<2x768xf32>
    %48 = math.tanh %47 : vector<2x768xf32>
    %cst_23 = arith.constant 5.000000e-01 : f32
    %49 = vector.broadcast %cst_23 : f32 to vector<2x768xf32>
    %50 = arith.mulf %49, %48 : vector<2x768xf32>
    %cst_24 = arith.constant 5.000000e-01 : f32
    %51 = vector.broadcast %cst_24 : f32 to vector<2x768xf32>
    %52 = arith.addf %50, %51 : vector<2x768xf32>
    %53 = vector.extract_strided_slice %44 {offsets = [0, 768], sizes = [2, 256], strides = [1, 1]} : vector<2x1024xf32> to vector<2x256xf32>
    %54 = math.tanh %53 : vector<2x256xf32>
    %55 = vector.extract_strided_slice %52 {offsets = [0, 0], sizes = [2, 256], strides = [1, 1]} : vector<2x768xf32> to vector<2x256xf32>
    %56 = vector.extract_strided_slice %52 {offsets = [0, 256], sizes = [2, 256], strides = [1, 1]} : vector<2x768xf32> to vector<2x256xf32>
    %57 = vector.extract_strided_slice %52 {offsets = [0, 512], sizes = [2, 256], strides = [1, 1]} : vector<2x768xf32> to vector<2x256xf32>
    %58 = arith.mulf %56, %37 : vector<2x256xf32>
    %59 = arith.mulf %55, %54 : vector<2x256xf32>
    %60 = arith.addf %58, %59 : vector<2x256xf32>
    %61 = math.tanh %60 : vector<2x256xf32>
    %62 = arith.mulf %57, %61 : vector<2x256xf32>
    %c4 = arith.constant 4 : index
    %c0_25 = arith.constant 0 : index
    %63 = vector.load %arg7[%c4, %c0_25] : memref<16x1024xf32, #tpu.memory_space<vmem>>, vector<2x1024xf32>
    %64 = arith.truncf %62 : vector<2x256xf32> to vector<2x256xbf16>
    %c0_26 = arith.constant 0 : index
    %c0_27 = arith.constant 0 : index
    %65 = vector.load %arg8[%c0_26, %c0_27] : memref<256x1024xbf16, #tpu.memory_space<vmem>>, vector<256x1024xbf16>
    %cst_28 = arith.constant dense<0.000000e+00> : vector<2x1024xf32>
    %66 = tpu.matmul %64, %65, %cst_28 {dimension_numbers = #tpu.dot_dimension_numbers<[1], [0], [0], [1], [0, 0, 1, 1], [], []>} : vector<2x256xbf16>, vector<256x1024xbf16>, vector<2x1024xf32> -> vector<2x1024xf32>
    %67 = arith.addf %63, %66 : vector<2x1024xf32>
    %68 = vector.extract_strided_slice %67 {offsets = [0, 0], sizes = [2, 768], strides = [1, 1]} : vector<2x1024xf32> to vector<2x768xf32>
    %cst_29 = arith.constant 5.000000e-01 : f32
    %69 = vector.broadcast %cst_29 : f32 to vector<2x768xf32>
    %70 = arith.mulf %69, %68 : vector<2x768xf32>
    %71 = math.tanh %70 : vector<2x768xf32>
    %cst_30 = arith.constant 5.000000e-01 : f32
    %72 = vector.broadcast %cst_30 : f32 to vector<2x768xf32>
    %73 = arith.mulf %72, %71 : vector<2x768xf32>
    %cst_31 = arith.constant 5.000000e-01 : f32
    %74 = vector.broadcast %cst_31 : f32 to vector<2x768xf32>
    %75 = arith.addf %73, %74 : vector<2x768xf32>
    %76 = vector.extract_strided_slice %67 {offsets = [0, 768], sizes = [2, 256], strides = [1, 1]} : vector<2x1024xf32> to vector<2x256xf32>
    %77 = math.tanh %76 : vector<2x256xf32>
    %78 = vector.extract_strided_slice %75 {offsets = [0, 0], sizes = [2, 256], strides = [1, 1]} : vector<2x768xf32> to vector<2x256xf32>
    %79 = vector.extract_strided_slice %75 {offsets = [0, 256], sizes = [2, 256], strides = [1, 1]} : vector<2x768xf32> to vector<2x256xf32>
    %80 = vector.extract_strided_slice %75 {offsets = [0, 512], sizes = [2, 256], strides = [1, 1]} : vector<2x768xf32> to vector<2x256xf32>
    %81 = arith.mulf %79, %60 : vector<2x256xf32>
    %82 = arith.mulf %78, %77 : vector<2x256xf32>
    %83 = arith.addf %81, %82 : vector<2x256xf32>
    %84 = math.tanh %83 : vector<2x256xf32>
    %85 = arith.mulf %80, %84 : vector<2x256xf32>
    %c6 = arith.constant 6 : index
    %c0_32 = arith.constant 0 : index
    %86 = vector.load %arg7[%c6, %c0_32] : memref<16x1024xf32, #tpu.memory_space<vmem>>, vector<2x1024xf32>
    %87 = arith.truncf %85 : vector<2x256xf32> to vector<2x256xbf16>
    %c0_33 = arith.constant 0 : index
    %c0_34 = arith.constant 0 : index
    %88 = vector.load %arg8[%c0_33, %c0_34] : memref<256x1024xbf16, #tpu.memory_space<vmem>>, vector<256x1024xbf16>
    %cst_35 = arith.constant dense<0.000000e+00> : vector<2x1024xf32>
    %89 = tpu.matmul %87, %88, %cst_35 {dimension_numbers = #tpu.dot_dimension_numbers<[1], [0], [0], [1], [0, 0, 1, 1], [], []>} : vector<2x256xbf16>, vector<256x1024xbf16>, vector<2x1024xf32> -> vector<2x1024xf32>
    %90 = arith.addf %86, %89 : vector<2x1024xf32>
    %91 = vector.extract_strided_slice %90 {offsets = [0, 0], sizes = [2, 768], strides = [1, 1]} : vector<2x1024xf32> to vector<2x768xf32>
    %cst_36 = arith.constant 5.000000e-01 : f32
    %92 = vector.broadcast %cst_36 : f32 to vector<2x768xf32>
    %93 = arith.mulf %92, %91 : vector<2x768xf32>
    %94 = math.tanh %93 : vector<2x768xf32>
    %cst_37 = arith.constant 5.000000e-01 : f32
    %95 = vector.broadcast %cst_37 : f32 to vector<2x768xf32>
    %96 = arith.mulf %95, %94 : vector<2x768xf32>
    %cst_38 = arith.constant 5.000000e-01 : f32
    %97 = vector.broadcast %cst_38 : f32 to vector<2x768xf32>
    %98 = arith.addf %96, %97 : vector<2x768xf32>
    %99 = vector.extract_strided_slice %90 {offsets = [0, 768], sizes = [2, 256], strides = [1, 1]} : vector<2x1024xf32> to vector<2x256xf32>
    %100 = math.tanh %99 : vector<2x256xf32>
    %101 = vector.extract_strided_slice %98 {offsets = [0, 0], sizes = [2, 256], strides = [1, 1]} : vector<2x768xf32> to vector<2x256xf32>
    %102 = vector.extract_strided_slice %98 {offsets = [0, 256], sizes = [2, 256], strides = [1, 1]} : vector<2x768xf32> to vector<2x256xf32>
    %103 = vector.extract_strided_slice %98 {offsets = [0, 512], sizes = [2, 256], strides = [1, 1]} : vector<2x768xf32> to vector<2x256xf32>
    %104 = arith.mulf %102, %83 : vector<2x256xf32>
    %105 = arith.mulf %101, %100 : vector<2x256xf32>
    %106 = arith.addf %104, %105 : vector<2x256xf32>
    %107 = math.tanh %106 : vector<2x256xf32>
    %108 = arith.mulf %103, %107 : vector<2x256xf32>
    %c8 = arith.constant 8 : index
    %c0_39 = arith.constant 0 : index
    %109 = vector.load %arg7[%c8, %c0_39] : memref<16x1024xf32, #tpu.memory_space<vmem>>, vector<2x1024xf32>
    %110 = arith.truncf %108 : vector<2x256xf32> to vector<2x256xbf16>
    %c0_40 = arith.constant 0 : index
    %c0_41 = arith.constant 0 : index
    %111 = vector.load %arg8[%c0_40, %c0_41] : memref<256x1024xbf16, #tpu.memory_space<vmem>>, vector<256x1024xbf16>
    %cst_42 = arith.constant dense<0.000000e+00> : vector<2x1024xf32>
    %112 = tpu.matmul %110, %111, %cst_42 {dimension_numbers = #tpu.dot_dimension_numbers<[1], [0], [0], [1], [0, 0, 1, 1], [], []>} : vector<2x256xbf16>, vector<256x1024xbf16>, vector<2x1024xf32> -> vector<2x1024xf32>
    %113 = arith.addf %109, %112 : vector<2x1024xf32>
    %114 = vector.extract_strided_slice %113 {offsets = [0, 0], sizes = [2, 768], strides = [1, 1]} : vector<2x1024xf32> to vector<2x768xf32>
    %cst_43 = arith.constant 5.000000e-01 : f32
    %115 = vector.broadcast %cst_43 : f32 to vector<2x768xf32>
    %116 = arith.mulf %115, %114 : vector<2x768xf32>
    %117 = math.tanh %116 : vector<2x768xf32>
    %cst_44 = arith.constant 5.000000e-01 : f32
    %118 = vector.broadcast %cst_44 : f32 to vector<2x768xf32>
    %119 = arith.mulf %118, %117 : vector<2x768xf32>
    %cst_45 = arith.constant 5.000000e-01 : f32
    %120 = vector.broadcast %cst_45 : f32 to vector<2x768xf32>
    %121 = arith.addf %119, %120 : vector<2x768xf32>
    %122 = vector.extract_strided_slice %113 {offsets = [0, 768], sizes = [2, 256], strides = [1, 1]} : vector<2x1024xf32> to vector<2x256xf32>
    %123 = math.tanh %122 : vector<2x256xf32>
    %124 = vector.extract_strided_slice %121 {offsets = [0, 0], sizes = [2, 256], strides = [1, 1]} : vector<2x768xf32> to vector<2x256xf32>
    %125 = vector.extract_strided_slice %121 {offsets = [0, 256], sizes = [2, 256], strides = [1, 1]} : vector<2x768xf32> to vector<2x256xf32>
    %126 = vector.extract_strided_slice %121 {offsets = [0, 512], sizes = [2, 256], strides = [1, 1]} : vector<2x768xf32> to vector<2x256xf32>
    %127 = arith.mulf %125, %106 : vector<2x256xf32>
    %128 = arith.mulf %124, %123 : vector<2x256xf32>
    %129 = arith.addf %127, %128 : vector<2x256xf32>
    %130 = math.tanh %129 : vector<2x256xf32>
    %131 = arith.mulf %126, %130 : vector<2x256xf32>
    %c10 = arith.constant 10 : index
    %c0_46 = arith.constant 0 : index
    %132 = vector.load %arg7[%c10, %c0_46] : memref<16x1024xf32, #tpu.memory_space<vmem>>, vector<2x1024xf32>
    %133 = arith.truncf %131 : vector<2x256xf32> to vector<2x256xbf16>
    %c0_47 = arith.constant 0 : index
    %c0_48 = arith.constant 0 : index
    %134 = vector.load %arg8[%c0_47, %c0_48] : memref<256x1024xbf16, #tpu.memory_space<vmem>>, vector<256x1024xbf16>
    %cst_49 = arith.constant dense<0.000000e+00> : vector<2x1024xf32>
    %135 = tpu.matmul %133, %134, %cst_49 {dimension_numbers = #tpu.dot_dimension_numbers<[1], [0], [0], [1], [0, 0, 1, 1], [], []>} : vector<2x256xbf16>, vector<256x1024xbf16>, vector<2x1024xf32> -> vector<2x1024xf32>
    %136 = arith.addf %132, %135 : vector<2x1024xf32>
    %137 = vector.extract_strided_slice %136 {offsets = [0, 0], sizes = [2, 768], strides = [1, 1]} : vector<2x1024xf32> to vector<2x768xf32>
    %cst_50 = arith.constant 5.000000e-01 : f32
    %138 = vector.broadcast %cst_50 : f32 to vector<2x768xf32>
    %139 = arith.mulf %138, %137 : vector<2x768xf32>
    %140 = math.tanh %139 : vector<2x768xf32>
    %cst_51 = arith.constant 5.000000e-01 : f32
    %141 = vector.broadcast %cst_51 : f32 to vector<2x768xf32>
    %142 = arith.mulf %141, %140 : vector<2x768xf32>
    %cst_52 = arith.constant 5.000000e-01 : f32
    %143 = vector.broadcast %cst_52 : f32 to vector<2x768xf32>
    %144 = arith.addf %142, %143 : vector<2x768xf32>
    %145 = vector.extract_strided_slice %136 {offsets = [0, 768], sizes = [2, 256], strides = [1, 1]} : vector<2x1024xf32> to vector<2x256xf32>
    %146 = math.tanh %145 : vector<2x256xf32>
    %147 = vector.extract_strided_slice %144 {offsets = [0, 0], sizes = [2, 256], strides = [1, 1]} : vector<2x768xf32> to vector<2x256xf32>
    %148 = vector.extract_strided_slice %144 {offsets = [0, 256], sizes = [2, 256], strides = [1, 1]} : vector<2x768xf32> to vector<2x256xf32>
    %149 = vector.extract_strided_slice %144 {offsets = [0, 512], sizes = [2, 256], strides = [1, 1]} : vector<2x768xf32> to vector<2x256xf32>
    %150 = arith.mulf %148, %129 : vector<2x256xf32>
    %151 = arith.mulf %147, %146 : vector<2x256xf32>
    %152 = arith.addf %150, %151 : vector<2x256xf32>
    %153 = math.tanh %152 : vector<2x256xf32>
    %154 = arith.mulf %149, %153 : vector<2x256xf32>
    %c12 = arith.constant 12 : index
    %c0_53 = arith.constant 0 : index
    %155 = vector.load %arg7[%c12, %c0_53] : memref<16x1024xf32, #tpu.memory_space<vmem>>, vector<2x1024xf32>
    %156 = arith.truncf %154 : vector<2x256xf32> to vector<2x256xbf16>
    %c0_54 = arith.constant 0 : index
    %c0_55 = arith.constant 0 : index
    %157 = vector.load %arg8[%c0_54, %c0_55] : memref<256x1024xbf16, #tpu.memory_space<vmem>>, vector<256x1024xbf16>
    %cst_56 = arith.constant dense<0.000000e+00> : vector<2x1024xf32>
    %158 = tpu.matmul %156, %157, %cst_56 {dimension_numbers = #tpu.dot_dimension_numbers<[1], [0], [0], [1], [0, 0, 1, 1], [], []>} : vector<2x256xbf16>, vector<256x1024xbf16>, vector<2x1024xf32> -> vector<2x1024xf32>
    %159 = arith.addf %155, %158 : vector<2x1024xf32>
    %160 = vector.extract_strided_slice %159 {offsets = [0, 0], sizes = [2, 768], strides = [1, 1]} : vector<2x1024xf32> to vector<2x768xf32>
    %cst_57 = arith.constant 5.000000e-01 : f32
    %161 = vector.broadcast %cst_57 : f32 to vector<2x768xf32>
    %162 = arith.mulf %161, %160 : vector<2x768xf32>
    %163 = math.tanh %162 : vector<2x768xf32>
    %cst_58 = arith.constant 5.000000e-01 : f32
    %164 = vector.broadcast %cst_58 : f32 to vector<2x768xf32>
    %165 = arith.mulf %164, %163 : vector<2x768xf32>
    %cst_59 = arith.constant 5.000000e-01 : f32
    %166 = vector.broadcast %cst_59 : f32 to vector<2x768xf32>
    %167 = arith.addf %165, %166 : vector<2x768xf32>
    %168 = vector.extract_strided_slice %159 {offsets = [0, 768], sizes = [2, 256], strides = [1, 1]} : vector<2x1024xf32> to vector<2x256xf32>
    %169 = math.tanh %168 : vector<2x256xf32>
    %170 = vector.extract_strided_slice %167 {offsets = [0, 0], sizes = [2, 256], strides = [1, 1]} : vector<2x768xf32> to vector<2x256xf32>
    %171 = vector.extract_strided_slice %167 {offsets = [0, 256], sizes = [2, 256], strides = [1, 1]} : vector<2x768xf32> to vector<2x256xf32>
    %172 = vector.extract_strided_slice %167 {offsets = [0, 512], sizes = [2, 256], strides = [1, 1]} : vector<2x768xf32> to vector<2x256xf32>
    %173 = arith.mulf %171, %152 : vector<2x256xf32>
    %174 = arith.mulf %170, %169 : vector<2x256xf32>
    %175 = arith.addf %173, %174 : vector<2x256xf32>
    %176 = math.tanh %175 : vector<2x256xf32>
    %177 = arith.mulf %172, %176 : vector<2x256xf32>
    %c14 = arith.constant 14 : index
    %c0_60 = arith.constant 0 : index
    %178 = vector.load %arg7[%c14, %c0_60] : memref<16x1024xf32, #tpu.memory_space<vmem>>, vector<2x1024xf32>
    %179 = arith.truncf %177 : vector<2x256xf32> to vector<2x256xbf16>
    %c0_61 = arith.constant 0 : index
    %c0_62 = arith.constant 0 : index
    %180 = vector.load %arg8[%c0_61, %c0_62] : memref<256x1024xbf16, #tpu.memory_space<vmem>>, vector<256x1024xbf16>
    %cst_63 = arith.constant dense<0.000000e+00> : vector<2x1024xf32>
    %181 = tpu.matmul %179, %180, %cst_63 {dimension_numbers = #tpu.dot_dimension_numbers<[1], [0], [0], [1], [0, 0, 1, 1], [], []>} : vector<2x256xbf16>, vector<256x1024xbf16>, vector<2x1024xf32> -> vector<2x1024xf32>
    %182 = arith.addf %178, %181 : vector<2x1024xf32>
    %183 = vector.extract_strided_slice %182 {offsets = [0, 0], sizes = [2, 768], strides = [1, 1]} : vector<2x1024xf32> to vector<2x768xf32>
    %cst_64 = arith.constant 5.000000e-01 : f32
    %184 = vector.broadcast %cst_64 : f32 to vector<2x768xf32>
    %185 = arith.mulf %184, %183 : vector<2x768xf32>
    %186 = math.tanh %185 : vector<2x768xf32>
    %cst_65 = arith.constant 5.000000e-01 : f32
    %187 = vector.broadcast %cst_65 : f32 to vector<2x768xf32>
    %188 = arith.mulf %187, %186 : vector<2x768xf32>
    %cst_66 = arith.constant 5.000000e-01 : f32
    %189 = vector.broadcast %cst_66 : f32 to vector<2x768xf32>
    %190 = arith.addf %188, %189 : vector<2x768xf32>
    %191 = vector.extract_strided_slice %182 {offsets = [0, 768], sizes = [2, 256], strides = [1, 1]} : vector<2x1024xf32> to vector<2x256xf32>
    %192 = math.tanh %191 : vector<2x256xf32>
    %193 = vector.extract_strided_slice %190 {offsets = [0, 0], sizes = [2, 256], strides = [1, 1]} : vector<2x768xf32> to vector<2x256xf32>
    %194 = vector.extract_strided_slice %190 {offsets = [0, 256], sizes = [2, 256], strides = [1, 1]} : vector<2x768xf32> to vector<2x256xf32>
    %195 = vector.extract_strided_slice %190 {offsets = [0, 512], sizes = [2, 256], strides = [1, 1]} : vector<2x768xf32> to vector<2x256xf32>
    %196 = arith.mulf %194, %175 : vector<2x256xf32>
    %197 = arith.mulf %193, %192 : vector<2x256xf32>
    %198 = arith.addf %196, %197 : vector<2x256xf32>
    %199 = math.tanh %198 : vector<2x256xf32>
    %200 = arith.mulf %195, %199 : vector<2x256xf32>
    %c1_i32_67 = arith.constant 1 : i32
    %201 = tpu.memref_slice %arg11[%c1_i32_67] : memref<3x!tpu.dma_semaphore, #tpu.memory_space<semaphore_mem>> -> memref<1x!tpu.dma_semaphore, #tpu.memory_space<semaphore_mem>>
    %202 = tpu.memref_squeeze %201 : memref<1x!tpu.dma_semaphore, #tpu.memory_space<semaphore_mem>> -> memref<!tpu.dma_semaphore, #tpu.memory_space<semaphore_mem>>
    tpu.wait_dma2 semaphore(%202 : memref<!tpu.dma_semaphore, #tpu.memory_space<semaphore_mem>>) src(%arg4 : memref<256x128xbf16, #tpu.memory_space<any>>) dst(%arg9 : memref<256x128xbf16, #tpu.memory_space<vmem>>)
    %c2_i32_68 = arith.constant 2 : i32
    %203 = tpu.memref_slice %arg11[%c2_i32_68] : memref<3x!tpu.dma_semaphore, #tpu.memory_space<semaphore_mem>> -> memref<1x!tpu.dma_semaphore, #tpu.memory_space<semaphore_mem>>
    %204 = tpu.memref_squeeze %203 : memref<1x!tpu.dma_semaphore, #tpu.memory_space<semaphore_mem>> -> memref<!tpu.dma_semaphore, #tpu.memory_space<semaphore_mem>>
    tpu.wait_dma2 semaphore(%204 : memref<!tpu.dma_semaphore, #tpu.memory_space<semaphore_mem>>) src(%arg5 : memref<1x128xf32, #tpu.memory_space<any>>) dst(%arg10 : memref<1x128xf32, #tpu.memory_space<vmem>>)
    %205 = arith.truncf %200 : vector<2x256xf32> to vector<2x256xbf16>
    %c0_69 = arith.constant 0 : index
    %c0_70 = arith.constant 0 : index
    %206 = vector.load %arg9[%c0_69, %c0_70] : memref<256x128xbf16, #tpu.memory_space<vmem>>, vector<256x128xbf16>
    %cst_71 = arith.constant dense<0.000000e+00> : vector<2x128xf32>
    %207 = tpu.matmul %205, %206, %cst_71 {dimension_numbers = #tpu.dot_dimension_numbers<[1], [0], [0], [1], [0, 0, 1, 1], [], []>} : vector<2x256xbf16>, vector<256x128xbf16>, vector<2x128xf32> -> vector<2x128xf32>
    %c0_72 = arith.constant 0 : index
    %c0_73 = arith.constant 0 : index
    %208 = vector.load %arg10[%c0_72, %c0_73] : memref<1x128xf32, #tpu.memory_space<vmem>>, vector<1x128xf32>
    %209 = vector.broadcast %208 : vector<1x128xf32> to vector<2x128xf32>
    %210 = arith.addf %207, %209 : vector<2x128xf32>
    %c0_74 = arith.constant 0 : index
    %c0_75 = arith.constant 0 : index
    %211 = vector.load %arg6[%c0_74, %c0_75] : memref<2x128xf32, #tpu.memory_space<vmem>>, vector<2x128xf32>
    tpu.vector_store %arg6[%c0_74, %c0_75], %210 {strides = array<i32>} : memref<2x128xf32, #tpu.memory_space<vmem>>, vector<2x128xf32>,
    return
  }
}

</mosaic_0001>

<bundles_post_ra>
// kernel: lstm_model_forward.1
= control target key start
LH: loop header
LB: loop body
LE: loop exit
PB: predicated region body
PF: predicated region fallthrough
CT: control target
= control target key end

     0   :  { %11 = vsyncpa [#allocation8], 0  ;;  %s7291_s0 = inlined_call_operand.vmem [shape: bf16[16,512], index: 0, kind: input, shape index: {}]   ;;  %s7292_s1 = inlined_call_operand.hbm [shape: bf16[512,1024], index: 1, kind: input, shape index: {}]   ;;  %s7293_s2 = inlined_call_operand.vmem [shape: f32[1,1024], index: 2, kind: input, shape index: {}]   ;;  %s7294_s3 = inlined_call_operand.hbm [shape: bf16[256,1024], index: 3, kind: input, shape index: {}]   ;;  %s7295_s4 = inlined_call_operand.vmem [shape: bf16[256,128], index: 4, kind: input, shape index: {}]   ;;  %s7296_s5 = inlined_call_operand.vmem [shape: f32[1,128], index: 5, kind: input, shape index: {}]   ;;  %s7297_s6 = inlined_call_operand.hbm [shape: f32[2,128], index: 6, kind: output, shape index: {}]  }
   0x1   :  { %12 = vsyncpa [#allocation9], 0  ;;  %s5179_s21 = smov [#allocation7]   ;;  %s5125_s25 = scalar_lea.hbm %s7292_s1, 32768 }
   0x2   :  { %s20_s22 = sshll.u32 %s5179_s21, 4  ;;  %p5126_p0 = scmp.ne.s32.totalorder %s7292_s1, %s5125_s25  ;;  %s21_s22 = int_to_ptr.vmem [resolvable:$true] %s20_s22 }
   0x3   :  { %p5129_p1 = scmp.lt.u32.totalorder %s5125_s25, %s7292_s1 }
   0x5   :  { %p5131_p2 = pnand %p5129_p1, %p5126_p0 }
   0x7   :  { %5134 = shalt.err (!%p5131_p2)
}
   0x8   :  { %s5135_s30 = scalar_lea.vmem %s21_s22, 32768  ;;  %p5140_p4 = scmp.lt.s32.totalorder %s21_s22, %s21_s22 }
   0x9   :  { %p5136_p3 = scmp.ne.s32.totalorder %s21_s22, %s5135_s30  ;;  %p5141_p5 = scmp.lt.s32.totalorder %s5135_s30, %s5135_s30 }
   0xb   :  { %p5142_p6 = por %p5141_p5, %p5140_p4 }
   0xd   :  { %p5143_p7 = pnand %p5142_p6, %p5136_p3 }
   0xf   :  { %5146 = shalt.err (!%p5143_p7)
}
  0x10   :  { %s5180_s7 = smov 512   ;;  %s5181_s8 = smov 32  }
  0x11   :  { %26 = dma.hbm_to_vmem [thread:$0]  %s7292_s1, 32768, %s21_s22, [#allocation8], %s5180_s7, %s5180_s7, %s5181_s8  }
  0x12   :  { %5169 = dma.done.wait [#allocation8], 32768  }
  0x13   :  { %5170 = vsyncadd [#allocation8], 4294934528  ;;  %s37_s11 = sld [smem:[#allocation0]]   ;;  %s5182_s12 = smov 1024  }
  0x14   :  { %49 = sst [smem:[#allocation12]] %s5182_s12  ;;  %s5183_s13 = smov 8  }
  0x15   :  { %51 = sst [smem:[#allocation12 + $0x1]] %s5182_s12  ;;  %s5184_s14 = smov 64  }
  0x16   :  { %53 = sst [smem:[#allocation12 + $0x2]] %s5183_s13  ;;  %s5185_s15 = smov 128  }
  0x17   :  { %55 = sst [smem:[#allocation12 + $0x3]] %s5184_s14  ;;  %s5186_s16 = smov 2  }
  0x18   :  { %57 = sst [smem:[#allocation12 + $0x4]] %s5185_s15  ;;  %s5187_s19 = smov 4  }
  0x19   :  { %59 = sst [smem:[#allocation12 + $0x5]] %s5186_s16  ;;  %s4369_s17 = sshll.u32 %s37_s11, 26 }
  0x1a   :  { %61 = sst [smem:[#allocation12 + $0x6]] %s5180_s7  ;;  %s4370_s18 = sadd.s32 134217728, %s4369_s17 }
  0x1b   :  { %63 = sst [smem:[#allocation12 + $0x7]] %s5184_s14  ;;  %s5188_s1 = smov [#allocation3]  }
  0x1c   :  { %65 = sst [smem:[#allocation12 + $0x8]] %s5187_s19  ;;  %s45_s20 = sshll.u32 %s5188_s1, 4  ;;  %s46_s20 = int_to_ptr.vmem [resolvable:$true] %s45_s20 }
  0x1d   :  { %s5189_s21 = smov [#allocation6]   ;;  %s5190_s22 = smov [#allocation11]  }
  0x1e   :  { %67 = dma.general %s7294_s3, 16384, %s46_s20, %s5189_s21, %s5190_s22, [#allocation12], %s4370_s18, 0  }
  0x1f   :  { %v5246_v0 = vld [vmem:[%s7295_s4] sm:$0xff]  ;;  %v5251_v1 = vld [vmem:[%s7295_s4 + $0x8] sm:$0xff]  ;;  %v5256_v2 = vld [vmem:[%s7295_s4 + $0x10] sm:$0xff] }
  0x20   :  { %7681 = vst [vmem:[#allocation20_spill] sm:$0xff] %v5246_v0  ;;  %7682 = vst [vmem:[#allocation21_spill] sm:$0xff] %v5251_v1  ;;  %v5261_v3 = vld [vmem:[%s7295_s4 + $0x18] sm:$0xff]  ;;  %v5266_v4 = vld [vmem:[%s7295_s4 + $0x20] sm:$0xff] }
  0x21   :  { %7683 = vst [vmem:[#allocation22_spill] sm:$0xff] %v5256_v2  ;;  %7684 = vst [vmem:[#allocation23_spill] sm:$0xff] %v5261_v3  ;;  %v5271_v5 = vld [vmem:[%s7295_s4 + $0x28] sm:$0xff]  ;;  %v5276_v6 = vld [vmem:[%s7295_s4 + $0x30] sm:$0xff] }
  0x22   :  { %7685 = vst [vmem:[#allocation24_spill] sm:$0xff] %v5266_v4  ;;  %7686 = vst [vmem:[#allocation25_spill] sm:$0xff] %v5271_v5  ;;  %v5281_v7 = vld [vmem:[%s7295_s4 + $0x38] sm:$0xff]  ;;  %v5286_v8 = vld [vmem:[%s7295_s4 + $0x40] sm:$0xff] }
  0x23   :  { %7687 = vst [vmem:[#allocation26_spill] sm:$0xff] %v5276_v6  ;;  %7688 = vst [vmem:[#allocation27_spill] sm:$0xff] %v5281_v7  ;;  %v5291_v9 = vld [vmem:[%s7295_s4 + $0x48] sm:$0xff]  ;;  %v5296_v10 = vld [vmem:[%s7295_s4 + $0x50] sm:$0xff] }
  0x24   :  { %7689 = vst [vmem:[#allocation28_spill] sm:$0xff] %v5286_v8  ;;  %7690 = vst [vmem:[#allocation29_spill] sm:$0xff] %v5291_v9  ;;  %v5301_v11 = vld [vmem:[%s7295_s4 + $0x58] sm:$0xff]  ;;  %v5306_v12 = vld [vmem:[%s7295_s4 + $0x60] sm:$0xff] }
  0x25   :  { %7691 = vst [vmem:[#allocation30_spill] sm:$0xff] %v5296_v10  ;;  %7692 = vst [vmem:[#allocation31_spill] sm:$0xff] %v5301_v11  ;;  %v5311_v13 = vld [vmem:[%s7295_s4 + $0x68] sm:$0xff]  ;;  %v5316_v14 = vld [vmem:[%s7295_s4 + $0x70] sm:$0xff] }
  0x26   :  { %7693 = vst [vmem:[#allocation32_spill] sm:$0xff] %v5306_v12  ;;  %7694 = vst [vmem:[#allocation33_spill] sm:$0xff] %v5311_v13  ;;  %v5321_v15 = vld [vmem:[%s7295_s4 + $0x78] sm:$0xff] }
  0x27   :  { %7695 = vst [vmem:[#allocation34_spill] sm:$0xff] %v5316_v14  ;;  %7696 = vst [vmem:[#allocation35_spill] sm:$0xff] %v5321_v15 }
  0x28   :  { %140 = vsyncadd [#allocation6 + $0x1], 2048  ;;  %v159_v16 = vld [vmem:[%s7296_s5] sm:$0x1] }
  0x29   :  { %160 = vst [vmem:[#allocation5] sm:$0x1] %v159_v16 }
  0x2a   :  { %185 = vsyncadd [#allocation6 + $0x2], 16  ;;  %v190_v17 = vld [vmem:[#allocation7] sm:$0xff]  ;;  %v191_v20 = vld [vmem:[#allocation7 + $0x8] sm:$0xff] }
  0x2b   :  { %v194_v18 = vld [vmem:[#allocation7 + $0x20] sm:$0xff]  ;;  %v195_v21 = vld [vmem:[#allocation7 + $0x28] sm:$0xff] }
  0x2c   :  { %v4376_v19 = vcombine.high %v190_v17, %v194_v18  ;;  %v4375_v22 = vcombine.low %v190_v17, %v194_v18  ;;  %v198_v23 = vld [vmem:[#allocation7 + $0x40] sm:$0xff]  ;;  %v4378_v24 = vcombine.high %v191_v20, %v195_v21  ;;  %v4377_v25 = vcombine.low %v191_v20, %v195_v21  ;;  %v199_v27 = vld [vmem:[#allocation7 + $0x48] sm:$0xff] }
  0x2d   :  { %v202_v26 = vld [vmem:[#allocation7 + $0x60] sm:$0xff]  ;;  %v203_v28 = vld [vmem:[#allocation7 + $0x68] sm:$0xff] }
  0x2e   :  { %1788 = vmatprep.subr.bf16.mxu0 %v4376_v19  ;;  %v4384_v29 = vcombine.high %v198_v23, %v202_v26  ;;  %v4386_v30 = vcombine.high %v199_v27, %v203_v28  ;;  %v206_v31 = vld [vmem:[#allocation7 + $0x80] sm:$0xff]  ;;  %v207_v33 = vld [vmem:[#allocation7 + $0x88] sm:$0xff]  ;;  %1874 = vmatprep.subr.bf16.mxu1 %v4378_v24  ;;  %v4383_v34 = vcombine.low %v198_v23, %v202_v26 }
  0x2f   :  { %v210_v32 = vld [vmem:[#allocation7 + $0xa0] sm:$0xff]  ;;  %1789 = vmatpush1.bf16.msra.mxu0 %v4375_v22  ;;  %v211_v35 = vld [vmem:[#allocation7 + $0xa8] sm:$0xff]  ;;  %1875 = vmatpush1.bf16.msra.mxu1 %v4377_v25  ;;  %v4385_v36 = vcombine.low %v199_v27, %v203_v28 }
  0x30   :  { %1790 = vmatprep.subr.bf16.mxu0 %v4384_v29  ;;  %v4392_v37 = vcombine.high %v206_v31, %v210_v32  ;;  %1876 = vmatprep.subr.bf16.mxu1 %v4386_v30  ;;  %v4394_v38 = vcombine.high %v207_v33, %v211_v35  ;;  %v214_v39 = vld [vmem:[#allocation7 + $0xc0] sm:$0xff]  ;;  %v215_v41 = vld [vmem:[#allocation7 + $0xc8] sm:$0xff]  ;;  %v4391_v43 = vcombine.low %v206_v31, %v210_v32 }
  0x31   :  { %v218_v40 = vld [vmem:[#allocation7 + $0xe0] sm:$0xff]  ;;  %v219_v42 = vld [vmem:[#allocation7 + $0xe8] sm:$0xff]  ;;  %v4393_v44 = vcombine.low %v207_v33, %v211_v35 }
  0x32   :  { %v4400_v45 = vcombine.high %v214_v39, %v218_v40  ;;  %v4402_v46 = vcombine.high %v215_v41, %v219_v42  ;;  %v222_v47 = vld [vmem:[#allocation7 + $0x100] sm:$0xff]  ;;  %v223_v49 = vld [vmem:[#allocation7 + $0x108] sm:$0xff]  ;;  %v4399_v51 = vcombine.low %v214_v39, %v218_v40  ;;  %v4401_v52 = vcombine.low %v215_v41, %v219_v42 }
  0x33   :  { %1791 = vmatpush1.bf16.msra.mxu0 %v4383_v34  ;;  %1877 = vmatpush1.bf16.msra.mxu1 %v4385_v36  ;;  %v226_v48 = vld [vmem:[#allocation7 + $0x120] sm:$0xff]  ;;  %v227_v50 = vld [vmem:[#allocation7 + $0x128] sm:$0xff] }
  0x34   :  { %1792 = vmatprep.subr.bf16.mxu0 %v4392_v37  ;;  %1878 = vmatprep.subr.bf16.mxu1 %v4394_v38  ;;  %v4408_v53 = vcombine.high %v222_v47, %v226_v48  ;;  %v4410_v54 = vcombine.high %v223_v49, %v227_v50  ;;  %v230_v55 = vld [vmem:[#allocation7 + $0x140] sm:$0xff]  ;;  %v231_v57 = vld [vmem:[#allocation7 + $0x148] sm:$0xff]  ;;  %v4407_v59 = vcombine.low %v222_v47, %v226_v48 }
  0x35   :  { %v234_v56 = vld [vmem:[#allocation7 + $0x160] sm:$0xff]  ;;  %v235_v58 = vld [vmem:[#allocation7 + $0x168] sm:$0xff]  ;;  %v4409_v60 = vcombine.low %v223_v49, %v227_v50 }
  0x36   :  { %v4416_v61 = vcombine.high %v230_v55, %v234_v56  ;;  %v4418_v62 = vcombine.high %v231_v57, %v235_v58  ;;  %v238_v63 = vld [vmem:[#allocation7 + $0x180] sm:$0xff]  ;;  %v239_v17 = vld [vmem:[#allocation7 + $0x188] sm:$0xff]  ;;  %v4415_v19 = vcombine.low %v230_v55, %v234_v56  ;;  %v4417_v20 = vcombine.low %v231_v57, %v235_v58 }
  0x37   :  { %1793 = vmatpush1.bf16.msra.mxu0 %v4391_v43  ;;  %1879 = vmatpush1.bf16.msra.mxu1 %v4393_v44  ;;  %v242_v16 = vld [vmem:[#allocation7 + $0x1a0] sm:$0xff]  ;;  %v243_v18 = vld [vmem:[#allocation7 + $0x1a8] sm:$0xff] }
  0x38   :  { %1794 = vmatprep.subr.bf16.mxu0 %v4400_v45  ;;  %1880 = vmatprep.subr.bf16.mxu1 %v4402_v46  ;;  %v4424_v21 = vcombine.high %v238_v63, %v242_v16  ;;  %v246_v22 = vld [vmem:[#allocation7 + $0x1c0] sm:$0xff]  ;;  %v4426_v23 = vcombine.high %v239_v17, %v243_v18  ;;  %v247_v26 = vld [vmem:[#allocation7 + $0x1c8] sm:$0xff]  ;;  %v4423_v28 = vcombine.low %v238_v63, %v242_v16 }
  0x39   :  { %v250_v24 = vld [vmem:[#allocation7 + $0x1e0] sm:$0xff]  ;;  %v251_v27 = vld [vmem:[#allocation7 + $0x1e8] sm:$0xff]  ;;  %v4425_v29 = vcombine.low %v239_v17, %v243_v18 }
  0x3a   :  { %v5329_v25 = vld [vmem:[%s7291_s0 + $0x4] ss:$16 sps:$4 sm:$0xff]   ;;  %v4432_v30 = vcombine.high %v246_v22, %v250_v24  ;;  %v4434_v31 = vcombine.high %v247_v26, %v251_v27  ;;  %v255_v34 = vld [vmem:[#allocation7 + $0x208] sm:$0xff]  ;;  %v4431_v36 = vcombine.low %v246_v22, %v250_v24  ;;  %v4433_v37 = vcombine.low %v247_v26, %v251_v27 }
  0x3b   :  { %1795 = vmatpush1.bf16.msra.mxu0 %v4399_v51  ;;  %1881 = vmatpush1.bf16.msra.mxu1 %v4401_v52  ;;  %v254_v32 = vld [vmem:[#allocation7 + $0x200] sm:$0xff]  ;;  %v259_v35 = vld [vmem:[#allocation7 + $0x228] sm:$0xff] }
  0x3c   :  { %1796 = vmatprep.subr.bf16.mxu0 %v4408_v53  ;;  %1882 = vmatprep.subr.bf16.mxu1 %v4410_v54  ;;  %v258_v33 = vld [vmem:[#allocation7 + $0x220] sm:$0xff]  ;;  %v4442_v39 = vcombine.high %v255_v34, %v259_v35  ;;  %v263_v42 = vld [vmem:[#allocation7 + $0x248] sm:$0xff]  ;;  %v4441_v45 = vcombine.low %v255_v34, %v259_v35 }
  0x3d   :  { %1820 = vmatprep.mubr.bf16.mxu0 %v5329_v25  ;;  %1906 = vmatprep.mubr.bf16.mxu1 %v5329_v25  ;;  %v4440_v38 = vcombine.high %v254_v32, %v258_v33  ;;  %v262_v40 = vld [vmem:[#allocation7 + $0x240] sm:$0xff]  ;;  %v267_v43 = vld [vmem:[#allocation7 + $0x268] sm:$0xff]  ;;  %v4439_v44 = vcombine.low %v254_v32, %v258_v33 }
  0x3e   :  { %v266_v41 = vld [vmem:[#allocation7 + $0x260] sm:$0xff]  ;;  %v4450_v47 = vcombine.high %v263_v42, %v267_v43  ;;  %v271_v50 = vld [vmem:[#allocation7 + $0x288] sm:$0xff]  ;;  %v4449_v53 = vcombine.low %v263_v42, %v267_v43 }
  0x3f   :  { %1797 = vmatpush1.bf16.msra.mxu0 %v4407_v59  ;;  %1883 = vmatpush1.bf16.msra.mxu1 %v4409_v60  ;;  %v4448_v46 = vcombine.high %v262_v40, %v266_v41  ;;  %v270_v48 = vld [vmem:[#allocation7 + $0x280] sm:$0xff]  ;;  %v275_v51 = vld [vmem:[#allocation7 + $0x2a8] sm:$0xff]  ;;  %v4447_v52 = vcombine.low %v262_v40, %v266_v41 }
  0x40   :  { %1798 = vmatprep.subr.bf16.mxu0 %v4416_v61  ;;  %1884 = vmatprep.subr.bf16.mxu1 %v4418_v62  ;;  %v274_v49 = vld [vmem:[#allocation7 + $0x2a0] sm:$0xff]  ;;  %v4458_v55 = vcombine.high %v271_v50, %v275_v51  ;;  %v279_v58 = vld [vmem:[#allocation7 + $0x2c8] sm:$0xff]  ;;  %v4457_v61 = vcombine.low %v271_v50, %v275_v51 }
  0x41   :  { %v4456_v54 = vcombine.high %v270_v48, %v274_v49  ;;  %v278_v56 = vld [vmem:[#allocation7 + $0x2c0] sm:$0xff]  ;;  %v283_v59 = vld [vmem:[#allocation7 + $0x2e8] sm:$0xff]  ;;  %v4455_v60 = vcombine.low %v270_v48, %v274_v49 }
  0x42   :  { %v282_v57 = vld [vmem:[#allocation7 + $0x2e0] sm:$0xff]  ;;  %v4466_v63 = vcombine.high %v279_v58, %v283_v59  ;;  %v287_v18 = vld [vmem:[#allocation7 + $0x308] sm:$0xff] }
  0x43   :  { %1799 = vmatpush1.bf16.msra.mxu0 %v4415_v19  ;;  %1885 = vmatpush1.bf16.msra.mxu1 %v4417_v20  ;;  %v4464_v62 = vcombine.high %v278_v56, %v282_v57  ;;  %v286_v16 = vld [vmem:[#allocation7 + $0x300] sm:$0xff]  ;;  %v291_v19 = vld [vmem:[#allocation7 + $0x328] sm:$0xff]  ;;  %v4463_v20 = vcombine.low %v278_v56, %v282_v57 }
  0x44   :  { %1800 = vmatprep.subr.bf16.mxu0 %v4424_v21  ;;  %1886 = vmatprep.subr.bf16.mxu1 %v4426_v23  ;;  %v290_v17 = vld [vmem:[#allocation7 + $0x320] sm:$0xff]  ;;  %v4465_v21 = vcombine.low %v279_v58, %v283_v59  ;;  %v4474_v23 = vcombine.high %v287_v18, %v291_v19  ;;  %v295_v27 = vld [vmem:[#allocation7 + $0x348] sm:$0xff] }
  0x45   :  { %v4472_v22 = vcombine.high %v286_v16, %v290_v17  ;;  %v294_v24 = vld [vmem:[#allocation7 + $0x340] sm:$0xff]  ;;  %v303_v35 = vld [vmem:[#allocation7 + $0x388] sm:$0xff] }
  0x46   :  { %v298_v26 = vld [vmem:[#allocation7 + $0x360] sm:$0xff]  ;;  %v311_v43 = vld [vmem:[#allocation7 + $0x3c8] sm:$0xff] }
  0x47   :  { %1801 = vmatpush1.bf16.msra.mxu0 %v4423_v28  ;;  %1887 = vmatpush1.bf16.msra.mxu1 %v4425_v29  ;;  %v299_v28 = vld [vmem:[#allocation7 + $0x368] sm:$0xff]  ;;  %v4471_v29 = vcombine.low %v286_v16, %v290_v17  ;;  %v302_v33 = vld [vmem:[#allocation7 + $0x380] sm:$0xff] }
  0x48   :  { %1802 = vmatprep.subr.bf16.mxu0 %v4432_v30  ;;  %1888 = vmatprep.subr.bf16.mxu1 %v4434_v31  ;;  %v4473_v30 = vcombine.low %v287_v18, %v291_v19  ;;  %v4480_v31 = vcombine.high %v294_v24, %v298_v26  ;;  %v4482_v32 = vcombine.high %v295_v27, %v299_v28  ;;  %v306_v34 = vld [vmem:[#allocation7 + $0x3a0] sm:$0xff]  ;;  %v319_v51 = vld [vmem:[#allocation7 + $0x408] sm:$0xff] }
  0x49   :  { %v310_v41 = vld [vmem:[#allocation7 + $0x3c0] sm:$0xff] }
  0x4a   :  { %v314_v42 = vld [vmem:[#allocation7 + $0x3e0] sm:$0xff] }
  0x4b   :  { %1803 = vmatpush1.bf16.msra.mxu0 %v4431_v36  ;;  %1889 = vmatpush1.bf16.msra.mxu1 %v4433_v37  ;;  %v307_v36 = vld [vmem:[#allocation7 + $0x3a8] sm:$0xff]  ;;  %v4479_v37 = vcombine.low %v294_v24, %v298_v26  ;;  %v318_v49 = vld [vmem:[#allocation7 + $0x400] sm:$0xff] }
  0x4c   :  { %1804 = vmatprep.subr.bf16.mxu0 %v4440_v38  ;;  %1890 = vmatprep.subr.bf16.mxu1 %v4442_v39  ;;  %v4481_v38 = vcombine.low %v295_v27, %v299_v28  ;;  %v4488_v39 = vcombine.high %v302_v33, %v306_v34  ;;  %v4490_v40 = vcombine.high %v303_v35, %v307_v36  ;;  %v322_v50 = vld [vmem:[#allocation7 + $0x420] sm:$0xff] }
  0x4d   :  { %v326_v57 = vld [vmem:[#allocation7 + $0x440] sm:$0xff] }
  0x4e   :  { %v330_v58 = vld [vmem:[#allocation7 + $0x460] sm:$0xff] }
  0x4f   :  { %1805 = vmatpush1.bf16.msra.mxu0 %v4439_v44  ;;  %1891 = vmatpush1.bf16.msra.mxu1 %v4441_v45  ;;  %v315_v44 = vld [vmem:[#allocation7 + $0x3e8] sm:$0xff]  ;;  %v4487_v45 = vcombine.low %v302_v33, %v306_v34  ;;  %v4512_v16 = vcombine.high %v326_v57, %v330_v58  ;;  %v334_v18 = vld [vmem:[#allocation7 + $0x480] sm:$0xff] }
  0x50   :  { %1806 = vmatprep.subr.bf16.mxu0 %v4448_v46  ;;  %1892 = vmatprep.subr.bf16.mxu1 %v4450_v47  ;;  %v4489_v46 = vcombine.low %v303_v35, %v307_v36  ;;  %v4496_v47 = vcombine.high %v310_v41, %v314_v42  ;;  %v4498_v48 = vcombine.high %v311_v43, %v315_v44  ;;  %v5336_v59 = vld [vmem:[%s7291_s0] ss:$16 sps:$4 sm:$0xff]  }
  0x51   :  { %v338_v19 = vld [vmem:[#allocation7 + $0x4a0] sm:$0xff] }
  0x52   :  { %v4520_v26 = vcombine.high %v334_v18, %v338_v19  ;;  %v342_v28 = vld [vmem:[#allocation7 + $0x4c0] sm:$0xff] }
  0x53   :  { %1807 = vmatpush1.bf16.msra.mxu0 %v4447_v52  ;;  %1893 = vmatpush1.bf16.msra.mxu1 %v4449_v53  ;;  %v323_v52 = vld [vmem:[#allocation7 + $0x428] sm:$0xff]  ;;  %v4495_v53 = vcombine.low %v310_v41, %v314_v42  ;;  %v350_v36 = vld [vmem:[#allocation7 + $0x500] sm:$0xff] }
  0x54   :  { %1808 = vmatprep.subr.bf16.mxu0 %v4456_v54  ;;  %1894 = vmatprep.subr.bf16.mxu1 %v4458_v55  ;;  %v4497_v54 = vcombine.low %v311_v43, %v315_v44  ;;  %v4504_v55 = vcombine.high %v318_v49, %v322_v50  ;;  %v4506_v56 = vcombine.high %v319_v51, %v323_v52  ;;  %v358_v44 = vld [vmem:[#allocation7 + $0x540] sm:$0xff] }
  0x57   :  { %1809 = vmatpush1.bf16.msra.mxu0 %v4455_v60  ;;  %1895 = vmatpush1.bf16.msra.mxu1 %v4457_v61  ;;  %v327_v60 = vld [vmem:[#allocation7 + $0x448] sm:$0xff] }
  0x58   :  { %1810 = vmatprep.subr.bf16.mxu0 %v4464_v62  ;;  %1896 = vmatprep.subr.bf16.mxu1 %v4466_v63  ;;  %v331_v61 = vld [vmem:[#allocation7 + $0x468] sm:$0xff]  ;;  %v4503_v62 = vcombine.low %v318_v49, %v322_v50  ;;  %v4505_v63 = vcombine.low %v319_v51, %v323_v52  ;;  %v366_v52 = vld [vmem:[#allocation7 + $0x580] sm:$0xff] }
  0x59   :  { %v4514_v17 = vcombine.high %v327_v60, %v331_v61  ;;  %v4513_v24 = vcombine.low %v327_v60, %v331_v61  ;;  %v374_v61 = vld [vmem:[#allocation7 + $0x5c0] sm:$0xff] }
  0x5b   :  { %1811 = vmatpush1.bf16.msra.mxu0 %v4463_v20  ;;  %1897 = vmatpush1.bf16.msra.mxu1 %v4465_v21  ;;  %v5341_v20 = vld [vmem:[%s7291_s0 + $0xc] ss:$16 sps:$4 sm:$0xff]  }
  0x5c   :  { %1812 = vmatprep.subr.bf16.mxu0 %v4472_v22  ;;  %1898 = vmatprep.subr.bf16.mxu1 %v4474_v23  ;;  %v335_v21 = vld [vmem:[#allocation7 + $0x488] sm:$0xff]  ;;  %v4511_v23 = vcombine.low %v326_v57, %v330_v58 }
  0x5d   :  { %v339_v22 = vld [vmem:[#allocation7 + $0x4a8] sm:$0xff] }
  0x5e   :  { %v4522_v27 = vcombine.high %v335_v21, %v339_v22  ;;  %v4521_v33 = vcombine.low %v335_v21, %v339_v22  ;;  %v382_v22 = vld [vmem:[#allocation7 + $0x600] sm:$0xff] }
  0x5f   :  { %1813 = vmatpush1.bf16.msra.mxu0 %v4471_v29  ;;  %1899 = vmatpush1.bf16.msra.mxu1 %v4473_v30  ;;  %v346_v29 = vld [vmem:[#allocation7 + $0x4e0] sm:$0xff]  ;;  %v343_v30 = vld [vmem:[#allocation7 + $0x4c8] sm:$0xff] }
  0x60   :  { %1814 = vmatprep.subr.bf16.mxu0 %v4480_v31  ;;  %1900 = vmatprep.subr.bf16.mxu1 %v4482_v32  ;;  %v347_v31 = vld [vmem:[#allocation7 + $0x4e8] sm:$0xff]  ;;  %v4519_v32 = vcombine.low %v334_v18, %v338_v19  ;;  %v4528_v34 = vcombine.high %v342_v28, %v346_v29 }
  0x61   :  { %v4530_v35 = vcombine.high %v343_v30, %v347_v31  ;;  %v4529_v41 = vcombine.low %v343_v30, %v347_v31  ;;  %v390_v31 = vld [vmem:[#allocation7 + $0x640] sm:$0xff] }
  0x63   :  { %1815 = vmatpush1.bf16.msra.mxu0 %v4479_v37  ;;  %1901 = vmatpush1.bf16.msra.mxu1 %v4481_v38  ;;  %v354_v37 = vld [vmem:[#allocation7 + $0x520] sm:$0xff]  ;;  %v351_v38 = vld [vmem:[#allocation7 + $0x508] sm:$0xff] }
  0x64   :  { %1816 = vmatprep.subr.bf16.mxu0 %v4488_v39  ;;  %1902 = vmatprep.subr.bf16.mxu1 %v4490_v40  ;;  %v355_v39 = vld [vmem:[#allocation7 + $0x528] sm:$0xff]  ;;  %v4527_v40 = vcombine.low %v342_v28, %v346_v29  ;;  %v4536_v42 = vcombine.high %v350_v36, %v354_v37 }
  0x65   :  { %v4538_v43 = vcombine.high %v351_v38, %v355_v39  ;;  %v4537_v49 = vcombine.low %v351_v38, %v355_v39  ;;  %v398_v39 = vld [vmem:[#allocation7 + $0x680] sm:$0xff] }
  0x67   :  { %1817 = vmatpush1.bf16.msra.mxu0 %v4487_v45  ;;  %1903 = vmatpush1.bf16.msra.mxu1 %v4489_v46  ;;  %v362_v45 = vld [vmem:[#allocation7 + $0x560] sm:$0xff]  ;;  %v359_v46 = vld [vmem:[#allocation7 + $0x548] sm:$0xff] }
  0x68   :  { %1818 = vmatprep.subr.bf16.mxu0 %v4496_v47  ;;  %1904 = vmatprep.subr.bf16.mxu1 %v4498_v48  ;;  %v363_v47 = vld [vmem:[#allocation7 + $0x568] sm:$0xff]  ;;  %v4535_v48 = vcombine.low %v350_v36, %v354_v37  ;;  %v4544_v50 = vcombine.high %v358_v44, %v362_v45 }
  0x69   :  { %v4546_v51 = vcombine.high %v359_v46, %v363_v47  ;;  %v4545_v57 = vcombine.low %v359_v46, %v363_v47  ;;  %v406_v47 = vld [vmem:[#allocation7 + $0x6c0] sm:$0xff] }
  0x6b   :  { %1819 = vmatpush1.bf16.msra.mxu0 %v4495_v53  ;;  %1905 = vmatpush1.bf16.msra.mxu1 %v4497_v54  ;;  %v370_v53 = vld [vmem:[#allocation7 + $0x5a0] sm:$0xff]  ;;  %v367_v54 = vld [vmem:[#allocation7 + $0x588] sm:$0xff] }
  0x6c   :  { %1831 = vmatprep.subr.bf16.mxu0 %v4504_v55  ;;  %1917 = vmatprep.subr.bf16.mxu1 %v4506_v56  ;;  %v371_v55 = vld [vmem:[#allocation7 + $0x5a8] sm:$0xff]  ;;  %v4543_v56 = vcombine.low %v358_v44, %v362_v45  ;;  %v4552_v58 = vcombine.high %v366_v52, %v370_v53 }
  0x6d   :  { %v4554_v60 = vcombine.high %v367_v54, %v371_v55  ;;  %v4553_v18 = vcombine.low %v367_v54, %v371_v55  ;;  %v414_v55 = vld [vmem:[#allocation7 + $0x700] sm:$0xff] }
  0x6e   :  { %1821 = vmatmul.mubr.bf16.vlgmr.msra.gmra.mrb[0].mxu0 %v5336_v59  ;;  %1907 = vmatmul.mubr.bf16.vlgmr.msra.gmra.mrb[0].mxu1 %v5336_v59 }
  0x6f   :  { %1832 = vmatpush1.bf16.msra.mxu0 %v4503_v62  ;;  %1918 = vmatpush1.bf16.msra.mxu1 %v4505_v63  ;;  %v378_v62 = vld [vmem:[#allocation7 + $0x5e0] sm:$0xff]  ;;  %v375_v63 = vld [vmem:[#allocation7 + $0x5c8] sm:$0xff] }
  0x70   :  { %1833 = vmatprep.subr.bf16.mxu0 %v4512_v16  ;;  %1919 = vmatprep.subr.bf16.mxu1 %v4514_v17  ;;  %v379_v16 = vld [vmem:[#allocation7 + $0x5e8] sm:$0xff]  ;;  %v4551_v17 = vcombine.low %v366_v52, %v370_v53  ;;  %v4560_v19 = vcombine.high %v374_v61, %v378_v62 }
  0x71   :  { %1863 = vmatprep.mubr.bf16.mxu0 %v5341_v20  ;;  %1949 = vmatprep.mubr.bf16.mxu1 %v5341_v20  ;;  %v4562_v21 = vcombine.high %v375_v63, %v379_v16  ;;  %v4561_v28 = vcombine.low %v375_v63, %v379_v16  ;;  %v422_v16 = vld [vmem:[#allocation7 + $0x740] sm:$0xff] }
  0x73   :  { %1834 = vmatpush1.bf16.msra.mxu0 %v4511_v23  ;;  %1920 = vmatpush1.bf16.msra.mxu1 %v4513_v24  ;;  %v386_v23 = vld [vmem:[#allocation7 + $0x620] sm:$0xff]  ;;  %v383_v24 = vld [vmem:[#allocation7 + $0x608] sm:$0xff] }
  0x74   :  { %1835 = vmatprep.subr.bf16.mxu0 %v4520_v26  ;;  %1921 = vmatprep.subr.bf16.mxu1 %v4522_v27  ;;  %v387_v26 = vld [vmem:[#allocation7 + $0x628] sm:$0xff]  ;;  %v4559_v27 = vcombine.low %v374_v61, %v378_v62  ;;  %v4568_v29 = vcombine.high %v382_v22, %v386_v23 }
  0x75   :  { %v4570_v30 = vcombine.high %v383_v24, %v387_v26  ;;  %v4569_v36 = vcombine.low %v383_v24, %v387_v26  ;;  %v430_v26 = vld [vmem:[#allocation7 + $0x780] sm:$0xff] }
  0x77   :  { %1836 = vmatpush1.bf16.msra.mxu0 %v4519_v32  ;;  %1922 = vmatpush1.bf16.msra.mxu1 %v4521_v33  ;;  %v394_v32 = vld [vmem:[#allocation7 + $0x660] sm:$0xff]  ;;  %v391_v33 = vld [vmem:[#allocation7 + $0x648] sm:$0xff] }
  0x78   :  { %1837 = vmatprep.subr.bf16.mxu0 %v4528_v34  ;;  %1923 = vmatprep.subr.bf16.mxu1 %v4530_v35  ;;  %v395_v34 = vld [vmem:[#allocation7 + $0x668] sm:$0xff]  ;;  %v4567_v35 = vcombine.low %v382_v22, %v386_v23  ;;  %v4576_v37 = vcombine.high %v390_v31, %v394_v32 }
  0x79   :  { %v4578_v38 = vcombine.high %v391_v33, %v395_v34  ;;  %v4577_v44 = vcombine.low %v391_v33, %v395_v34  ;;  %v438_v34 = vld [vmem:[#allocation7 + $0x7c0] sm:$0xff] }
  0x7b   :  { %1838 = vmatpush1.bf16.msra.mxu0 %v4527_v40  ;;  %1924 = vmatpush1.bf16.msra.mxu1 %v4529_v41  ;;  %v402_v40 = vld [vmem:[#allocation7 + $0x6a0] sm:$0xff]  ;;  %v399_v41 = vld [vmem:[#allocation7 + $0x688] sm:$0xff] }
  0x7c   :  { %1839 = vmatprep.subr.bf16.mxu0 %v4536_v42  ;;  %1925 = vmatprep.subr.bf16.mxu1 %v4538_v43  ;;  %v403_v42 = vld [vmem:[#allocation7 + $0x6a8] sm:$0xff]  ;;  %v4575_v43 = vcombine.low %v390_v31, %v394_v32  ;;  %v4584_v45 = vcombine.high %v398_v39, %v402_v40 }
  0x7d   :  { %v4586_v46 = vcombine.high %v399_v41, %v403_v42  ;;  %v4585_v52 = vcombine.low %v399_v41, %v403_v42  ;;  %v192_v42 = vld [vmem:[#allocation7 + $0x10] sm:$0xff] }
  0x7f   :  { %1840 = vmatpush1.bf16.msra.mxu0 %v4535_v48  ;;  %1926 = vmatpush1.bf16.msra.mxu1 %v4537_v49  ;;  %v410_v48 = vld [vmem:[#allocation7 + $0x6e0] sm:$0xff]  ;;  %v407_v49 = vld [vmem:[#allocation7 + $0x6c8] sm:$0xff] }
  0x80   :  { %1841 = vmatprep.subr.bf16.mxu0 %v4544_v50  ;;  %1927 = vmatprep.subr.bf16.mxu1 %v4546_v51  ;;  %v411_v50 = vld [vmem:[#allocation7 + $0x6e8] sm:$0xff]  ;;  %v4583_v51 = vcombine.low %v398_v39, %v402_v40  ;;  %v4592_v53 = vcombine.high %v406_v47, %v410_v48 }
  0x81   :  { %v4594_v54 = vcombine.high %v407_v49, %v411_v50  ;;  %v4593_v61 = vcombine.low %v407_v49, %v411_v50  ;;  %v200_v50 = vld [vmem:[#allocation7 + $0x50] sm:$0xff] }
  0x83   :  { %1842 = vmatpush1.bf16.msra.mxu0 %v4543_v56  ;;  %1928 = vmatpush1.bf16.msra.mxu1 %v4545_v57  ;;  %v418_v56 = vld [vmem:[#allocation7 + $0x720] sm:$0xff]  ;;  %v415_v57 = vld [vmem:[#allocation7 + $0x708] sm:$0xff] }
  0x84   :  { %1843 = vmatprep.subr.bf16.mxu0 %v4552_v58  ;;  %1929 = vmatprep.subr.bf16.mxu1 %v4554_v60  ;;  %v419_v58 = vld [vmem:[#allocation7 + $0x728] sm:$0xff]  ;;  %v4591_v60 = vcombine.low %v406_v47, %v410_v48  ;;  %v4600_v62 = vcombine.high %v414_v55, %v418_v56 }
  0x85   :  { %v4602_v63 = vcombine.high %v415_v57, %v419_v58  ;;  %v4601_v22 = vcombine.low %v415_v57, %v419_v58 }
  0x87   :  { %1844 = vmatpush1.bf16.msra.mxu0 %v4551_v17  ;;  %1930 = vmatpush1.bf16.msra.mxu1 %v4553_v18  ;;  %v426_v17 = vld [vmem:[#allocation7 + $0x760] sm:$0xff]  ;;  %v423_v18 = vld [vmem:[#allocation7 + $0x748] sm:$0xff] }
  0x88   :  { %1845 = vmatprep.subr.bf16.mxu0 %v4560_v19  ;;  %1931 = vmatprep.subr.bf16.mxu1 %v4562_v21  ;;  %v427_v19 = vld [vmem:[#allocation7 + $0x768] sm:$0xff]  ;;  %v4599_v21 = vcombine.low %v414_v55, %v418_v56  ;;  %v4608_v23 = vcombine.high %v422_v16, %v426_v17 }
  0x89   :  { %v4610_v24 = vcombine.high %v423_v18, %v427_v19  ;;  %v4609_v31 = vcombine.low %v423_v18, %v427_v19 }
  0x8b   :  { %1846 = vmatpush1.bf16.msra.mxu0 %v4559_v27  ;;  %1932 = vmatpush1.bf16.msra.mxu1 %v4561_v28  ;;  %v434_v27 = vld [vmem:[#allocation7 + $0x7a0] sm:$0xff]  ;;  %v431_v28 = vld [vmem:[#allocation7 + $0x788] sm:$0xff] }
  0x8c   :  { %1847 = vmatprep.subr.bf16.mxu0 %v4568_v29  ;;  %1933 = vmatprep.subr.bf16.mxu1 %v4570_v30  ;;  %v435_v29 = vld [vmem:[#allocation7 + $0x7a8] sm:$0xff]  ;;  %v4607_v30 = vcombine.low %v422_v16, %v426_v17  ;;  %v4616_v32 = vcombine.high %v430_v26, %v434_v27 }
  0x8d   :  { %v4618_v33 = vcombine.high %v431_v28, %v435_v29  ;;  %v4617_v39 = vcombine.low %v431_v28, %v435_v29 }
  0x8f   :  { %1848 = vmatpush1.bf16.msra.mxu0 %v4567_v35  ;;  %1934 = vmatpush1.bf16.msra.mxu1 %v4569_v36  ;;  %v442_v35 = vld [vmem:[#allocation7 + $0x7e0] sm:$0xff]  ;;  %v439_v36 = vld [vmem:[#allocation7 + $0x7c8] sm:$0xff] }
  0x90   :  { %1849 = vmatprep.subr.bf16.mxu0 %v4576_v37  ;;  %1935 = vmatprep.subr.bf16.mxu1 %v4578_v38  ;;  %v443_v37 = vld [vmem:[#allocation7 + $0x7e8] sm:$0xff]  ;;  %v4615_v38 = vcombine.low %v430_v26, %v434_v27  ;;  %v4624_v40 = vcombine.high %v438_v34, %v442_v35 }
  0x91   :  { %v4626_v41 = vcombine.high %v439_v36, %v443_v37  ;;  %v4625_v47 = vcombine.low %v439_v36, %v443_v37  ;;  %v232_v37 = vld [vmem:[#allocation7 + $0x150] sm:$0xff] }
  0x93   :  { %1850 = vmatpush1.bf16.msra.mxu0 %v4575_v43  ;;  %1936 = vmatpush1.bf16.msra.mxu1 %v4577_v44  ;;  %v196_v43 = vld [vmem:[#allocation7 + $0x30] sm:$0xff]  ;;  %v193_v44 = vld [vmem:[#allocation7 + $0x18] sm:$0xff] }
  0x94   :  { %1851 = vmatprep.subr.bf16.mxu0 %v4584_v45  ;;  %1937 = vmatprep.subr.bf16.mxu1 %v4586_v46  ;;  %v197_v45 = vld [vmem:[#allocation7 + $0x38] sm:$0xff]  ;;  %v4623_v46 = vcombine.low %v438_v34, %v442_v35  ;;  %v4380_v48 = vcombine.high %v192_v42, %v196_v43  ;;  %v4379_v55 = vcombine.low %v192_v42, %v196_v43 }
  0x95   :  { %v4382_v49 = vcombine.high %v193_v44, %v197_v45  ;;  %v4381_v56 = vcombine.low %v193_v44, %v197_v45  ;;  %v240_v45 = vld [vmem:[#allocation7 + $0x190] sm:$0xff] }
  0x97   :  { %1852 = vmatpush1.bf16.msra.mxu0 %v4583_v51  ;;  %1938 = vmatpush1.bf16.msra.mxu1 %v4585_v52  ;;  %v204_v51 = vld [vmem:[#allocation7 + $0x70] sm:$0xff] }
  0x98   :  { %1853 = vmatprep.subr.bf16.mxu0 %v4592_v53  ;;  %1939 = vmatprep.subr.bf16.mxu1 %v4594_v54  ;;  %v5350_v52 = vld [vmem:[%s7291_s0 + $0x8] ss:$16 sps:$4 sm:$0xff]   ;;  %v4388_v57 = vcombine.high %v200_v50, %v204_v51  ;;  %v4387_v16 = vcombine.low %v200_v50, %v204_v51 }
  0x99   :  { %v201_v53 = vld [vmem:[#allocation7 + $0x58] sm:$0xff] }
  0x9a   :  { %v205_v54 = vld [vmem:[#allocation7 + $0x78] sm:$0xff] }
  0x9b   :  { %1854 = vmatpush1.bf16.msra.mxu0 %v4591_v60  ;;  %1940 = vmatpush1.bf16.msra.mxu1 %v4593_v61  ;;  %v4390_v58 = vcombine.high %v201_v53, %v205_v54  ;;  %v208_v60 = vld [vmem:[#allocation7 + $0x90] sm:$0xff]  ;;  %v4389_v17 = vcombine.low %v201_v53, %v205_v54 }
  0x9c   :  { %1855 = vmatprep.subr.bf16.mxu0 %v4600_v62  ;;  %1941 = vmatprep.subr.bf16.mxu1 %v4602_v63  ;;  %v212_v61 = vld [vmem:[#allocation7 + $0xb0] sm:$0xff]  ;;  %v209_v62 = vld [vmem:[#allocation7 + $0x98] sm:$0xff] }
  0x9d   :  { %v213_v63 = vld [vmem:[#allocation7 + $0xb8] sm:$0xff]  ;;  %v4396_v18 = vcombine.high %v208_v60, %v212_v61  ;;  %v4395_v26 = vcombine.low %v208_v60, %v212_v61  ;;  %v248_v54 = vld [vmem:[#allocation7 + $0x1d0] sm:$0xff] }
  0x9e   :  { %v4398_v19 = vcombine.high %v209_v62, %v213_v63  ;;  %v4397_v27 = vcombine.low %v209_v62, %v213_v63  ;;  %v256_v63 = vld [vmem:[#allocation7 + $0x210] sm:$0xff] }
  0x9f   :  { %1856 = vmatpush1.bf16.msra.mxu0 %v4599_v21  ;;  %1942 = vmatpush1.bf16.msra.mxu1 %v4601_v22  ;;  %v216_v21 = vld [vmem:[#allocation7 + $0xd0] sm:$0xff] }
  0xa0   :  { %1857 = vmatprep.subr.bf16.mxu0 %v4608_v23  ;;  %1943 = vmatprep.subr.bf16.mxu1 %v4610_v24  ;;  %v220_v22 = vld [vmem:[#allocation7 + $0xf0] sm:$0xff]  ;;  %v217_v23 = vld [vmem:[#allocation7 + $0xd8] sm:$0xff] }
  0xa1   :  { %v221_v24 = vld [vmem:[#allocation7 + $0xf8] sm:$0xff]  ;;  %v4404_v28 = vcombine.high %v216_v21, %v220_v22  ;;  %v4403_v34 = vcombine.low %v216_v21, %v220_v22 }
  0xa2   :  { %v4406_v29 = vcombine.high %v217_v23, %v221_v24  ;;  %v4405_v35 = vcombine.low %v217_v23, %v221_v24  ;;  %v264_v24 = vld [vmem:[#allocation7 + $0x250] sm:$0xff] }
  0xa3   :  { %1858 = vmatpush1.bf16.msra.mxu0 %v4607_v30  ;;  %1944 = vmatpush1.bf16.msra.mxu1 %v4609_v31  ;;  %v224_v30 = vld [vmem:[#allocation7 + $0x110] sm:$0xff] }
  0xa4   :  { %1859 = vmatprep.subr.bf16.mxu0 %v4616_v32  ;;  %1945 = vmatprep.subr.bf16.mxu1 %v4618_v33  ;;  %v228_v31 = vld [vmem:[#allocation7 + $0x130] sm:$0xff]  ;;  %v225_v32 = vld [vmem:[#allocation7 + $0x118] sm:$0xff] }
  0xa5   :  { %v229_v33 = vld [vmem:[#allocation7 + $0x138] sm:$0xff]  ;;  %v4412_v36 = vcombine.high %v224_v30, %v228_v31 }
  0xa6   :  { %v4413_v42 = vcombine.low %v225_v32, %v229_v33 }
  0xa7   :  { %1860 = vmatpush1.bf16.msra.mxu0 %v4615_v38  ;;  %1946 = vmatpush1.bf16.msra.mxu1 %v4617_v39  ;;  %v236_v38 = vld [vmem:[#allocation7 + $0x170] sm:$0xff]  ;;  %v233_v39 = vld [vmem:[#allocation7 + $0x158] sm:$0xff] }
  0xa8   :  { %1861 = vmatprep.subr.bf16.mxu0 %v4624_v40  ;;  %1947 = vmatprep.subr.bf16.mxu1 %v4626_v41  ;;  %v237_v40 = vld [vmem:[#allocation7 + $0x178] sm:$0xff]  ;;  %v4411_v41 = vcombine.low %v224_v30, %v228_v31  ;;  %v4420_v43 = vcombine.high %v232_v37, %v236_v38 }
  0xa9   :  { %v4422_v44 = vcombine.high %v233_v39, %v237_v40  ;;  %v4421_v50 = vcombine.low %v233_v39, %v237_v40  ;;  %v280_v40 = vld [vmem:[#allocation7 + $0x2d0] sm:$0xff] }
  0xab   :  { %1862 = vmatpush1.bf16.msra.mxu0 %v4623_v46  ;;  %1948 = vmatpush1.bf16.msra.mxu1 %v4625_v47  ;;  %v244_v46 = vld [vmem:[#allocation7 + $0x1b0] sm:$0xff]  ;;  %v241_v47 = vld [vmem:[#allocation7 + $0x198] sm:$0xff] }
  0xac   :  { %1960 = vmatprep.subr.bf16.mxu0 %v4380_v48  ;;  %2046 = vmatprep.subr.bf16.mxu1 %v4382_v49  ;;  %v245_v48 = vld [vmem:[#allocation7 + $0x1b8] sm:$0xff]  ;;  %v4419_v49 = vcombine.low %v232_v37, %v236_v38  ;;  %v4428_v51 = vcombine.high %v240_v45, %v244_v46 }
  0xad   :  { %v4430_v53 = vcombine.high %v241_v47, %v245_v48  ;;  %v4429_v60 = vcombine.low %v241_v47, %v245_v48  ;;  %v288_v48 = vld [vmem:[#allocation7 + $0x310] sm:$0xff] }
  0xae   :  { %1864 = vmatmul.mubr.bf16.vlgmr.msra.gmra.mrb[0].mxu0 %v5350_v52  ;;  %1950 = vmatmul.mubr.bf16.vlgmr.msra.gmra.mrb[0].mxu1 %v5350_v52 }
  0xaf   :  { %1961 = vmatpush1.bf16.msra.mxu0 %v4379_v55  ;;  %2047 = vmatpush1.bf16.msra.mxu1 %v4381_v56  ;;  %v252_v55 = vld [vmem:[#allocation7 + $0x1f0] sm:$0xff]  ;;  %v249_v56 = vld [vmem:[#allocation7 + $0x1d8] sm:$0xff] }
  0xb0   :  { %1962 = vmatprep.subr.bf16.mxu0 %v4388_v57  ;;  %2048 = vmatprep.subr.bf16.mxu1 %v4390_v58  ;;  %v253_v57 = vld [vmem:[#allocation7 + $0x1f8] sm:$0xff]  ;;  %v4427_v58 = vcombine.low %v240_v45, %v244_v46  ;;  %v4436_v61 = vcombine.high %v248_v54, %v252_v55 }
  0xb1   :  { %1992 = vmatprep.mubr.bf16.mxu0 %v5329_v25  ;;  %2078 = vmatprep.mubr.bf16.mxu1 %v5329_v25  ;;  %v4414_v25 = vcombine.high %v225_v32, %v229_v33  ;;  %v4438_v62 = vcombine.high %v249_v56, %v253_v57  ;;  %v4437_v21 = vcombine.low %v249_v56, %v253_v57  ;;  %v272_v33 = vld [vmem:[#allocation7 + $0x290] sm:$0xff] }
  0xb2   :  { %v296_v57 = vld [vmem:[#allocation7 + $0x350] sm:$0xff] }
  0xb3   :  { %1963 = vmatpush1.bf16.msra.mxu0 %v4387_v16  ;;  %2049 = vmatpush1.bf16.msra.mxu1 %v4389_v17  ;;  %v260_v16 = vld [vmem:[#allocation7 + $0x230] sm:$0xff]  ;;  %v257_v17 = vld [vmem:[#allocation7 + $0x218] sm:$0xff] }
  0xb4   :  { %1964 = vmatprep.subr.bf16.mxu0 %v4396_v18  ;;  %2050 = vmatprep.subr.bf16.mxu1 %v4398_v19  ;;  %v261_v18 = vld [vmem:[#allocation7 + $0x238] sm:$0xff]  ;;  %v4435_v19 = vcombine.low %v248_v54, %v252_v55  ;;  %v4444_v22 = vcombine.high %v256_v63, %v260_v16 }
  0xb5   :  { %v4446_v23 = vcombine.high %v257_v17, %v261_v18  ;;  %v4445_v30 = vcombine.low %v257_v17, %v261_v18  ;;  %v304_v18 = vld [vmem:[#allocation7 + $0x390] sm:$0xff] }
  0xb7   :  { %1965 = vmatpush1.bf16.msra.mxu0 %v4395_v26  ;;  %2051 = vmatpush1.bf16.msra.mxu1 %v4397_v27  ;;  %v268_v26 = vld [vmem:[#allocation7 + $0x270] sm:$0xff]  ;;  %v265_v27 = vld [vmem:[#allocation7 + $0x258] sm:$0xff] }
  0xb8   :  { %1966 = vmatprep.subr.bf16.mxu0 %v4404_v28  ;;  %2052 = vmatprep.subr.bf16.mxu1 %v4406_v29  ;;  %v269_v28 = vld [vmem:[#allocation7 + $0x278] sm:$0xff]  ;;  %v4443_v29 = vcombine.low %v256_v63, %v260_v16  ;;  %v4452_v31 = vcombine.high %v264_v24, %v268_v26 }
  0xb9   :  { %v4454_v32 = vcombine.high %v265_v27, %v269_v28  ;;  %v4453_v37 = vcombine.low %v265_v27, %v269_v28  ;;  %v312_v28 = vld [vmem:[#allocation7 + $0x3d0] sm:$0xff] }
  0xbb   :  { %1967 = vmatpush1.bf16.msra.mxu0 %v4403_v34  ;;  %2053 = vmatpush1.bf16.msra.mxu1 %v4405_v35  ;;  %v276_v34 = vld [vmem:[#allocation7 + $0x2b0] sm:$0xff]  ;;  %v273_v35 = vld [vmem:[#allocation7 + $0x298] sm:$0xff] }
  0xbc   :  { %1968 = vmatprep.subr.bf16.mxu0 %v4412_v36  ;;  %2054 = vmatprep.subr.bf16.mxu1 %v4414_v25  ;;  %v277_v36 = vld [vmem:[#allocation7 + $0x2b8] sm:$0xff]  ;;  %v4451_v25 = vcombine.low %v264_v24, %v268_v26  ;;  %v4460_v38 = vcombine.high %v272_v33, %v276_v34 }
  0xbd   :  { %v4462_v39 = vcombine.high %v273_v35, %v277_v36  ;;  %v4461_v45 = vcombine.low %v273_v35, %v277_v36  ;;  %v320_v36 = vld [vmem:[#allocation7 + $0x410] sm:$0xff] }
  0xbf   :  { %1969 = vmatpush1.bf16.msra.mxu0 %v4411_v41  ;;  %2055 = vmatpush1.bf16.msra.mxu1 %v4413_v42  ;;  %v284_v41 = vld [vmem:[#allocation7 + $0x2f0] sm:$0xff]  ;;  %v281_v42 = vld [vmem:[#allocation7 + $0x2d8] sm:$0xff] }
  0xc0   :  { %1970 = vmatprep.subr.bf16.mxu0 %v4420_v43  ;;  %2056 = vmatprep.subr.bf16.mxu1 %v4422_v44  ;;  %v285_v43 = vld [vmem:[#allocation7 + $0x2f8] sm:$0xff]  ;;  %v4459_v44 = vcombine.low %v272_v33, %v276_v34  ;;  %v4468_v46 = vcombine.high %v280_v40, %v284_v41 }
  0xc1   :  { %v4470_v47 = vcombine.high %v281_v42, %v285_v43  ;;  %v4469_v54 = vcombine.low %v281_v42, %v285_v43  ;;  %v328_v43 = vld [vmem:[#allocation7 + $0x450] sm:$0xff] }
  0xc3   :  { %1971 = vmatpush1.bf16.msra.mxu0 %v4419_v49  ;;  %2057 = vmatpush1.bf16.msra.mxu1 %v4421_v50  ;;  %v292_v49 = vld [vmem:[#allocation7 + $0x330] sm:$0xff]  ;;  %v289_v50 = vld [vmem:[#allocation7 + $0x318] sm:$0xff] }
  0xc4   :  { %1972 = vmatprep.subr.bf16.mxu0 %v4428_v51  ;;  %2058 = vmatprep.subr.bf16.mxu1 %v4430_v53  ;;  %v293_v51 = vld [vmem:[#allocation7 + $0x338] sm:$0xff]  ;;  %v4467_v53 = vcombine.low %v280_v40, %v284_v41  ;;  %v4476_v55 = vcombine.high %v288_v48, %v292_v49 }
  0xc5   :  { %v4478_v56 = vcombine.high %v289_v50, %v293_v51  ;;  %v4477_v63 = vcombine.low %v289_v50, %v293_v51  ;;  %v336_v51 = vld [vmem:[#allocation7 + $0x490] sm:$0xff] }
  0xc7   :  { %1973 = vmatpush1.bf16.msra.mxu0 %v4427_v58  ;;  %2059 = vmatpush1.bf16.msra.mxu1 %v4429_v60  ;;  %v300_v58 = vld [vmem:[#allocation7 + $0x370] sm:$0xff]  ;;  %v297_v60 = vld [vmem:[#allocation7 + $0x358] sm:$0xff] }
  0xc8   :  { %1974 = vmatprep.subr.bf16.mxu0 %v4436_v61  ;;  %2060 = vmatprep.subr.bf16.mxu1 %v4438_v62  ;;  %v301_v61 = vld [vmem:[#allocation7 + $0x378] sm:$0xff]  ;;  %v4475_v62 = vcombine.low %v288_v48, %v292_v49  ;;  %v4484_v16 = vcombine.high %v296_v57, %v300_v58 }
  0xc9   :  { %v4486_v17 = vcombine.high %v297_v60, %v301_v61  ;;  %v4485_v24 = vcombine.low %v297_v60, %v301_v61  ;;  %v344_v61 = vld [vmem:[#allocation7 + $0x4d0] sm:$0xff] }
  0xcb   :  { %1975 = vmatpush1.bf16.msra.mxu0 %v4435_v19  ;;  %2061 = vmatpush1.bf16.msra.mxu1 %v4437_v21  ;;  %v308_v19 = vld [vmem:[#allocation7 + $0x3b0] sm:$0xff]  ;;  %v305_v21 = vld [vmem:[#allocation7 + $0x398] sm:$0xff] }
  0xcc   :  { %1976 = vmatprep.subr.bf16.mxu0 %v4444_v22  ;;  %2062 = vmatprep.subr.bf16.mxu1 %v4446_v23  ;;  %v309_v22 = vld [vmem:[#allocation7 + $0x3b8] sm:$0xff]  ;;  %v4483_v23 = vcombine.low %v296_v57, %v300_v58  ;;  %v4492_v26 = vcombine.high %v304_v18, %v308_v19 }
  0xcd   :  { %v4494_v27 = vcombine.high %v305_v21, %v309_v22  ;;  %v4493_v33 = vcombine.low %v305_v21, %v309_v22  ;;  %v352_v21 = vld [vmem:[#allocation7 + $0x510] sm:$0xff] }
  0xce   :  { %v356_v22 = vld [vmem:[#allocation7 + $0x530] sm:$0xff] }
  0xcf   :  { %1977 = vmatpush1.bf16.msra.mxu0 %v4443_v29  ;;  %2063 = vmatpush1.bf16.msra.mxu1 %v4445_v30  ;;  %v316_v29 = vld [vmem:[#allocation7 + $0x3f0] sm:$0xff]  ;;  %v313_v30 = vld [vmem:[#allocation7 + $0x3d8] sm:$0xff] }
  0xd0   :  { %1978 = vmatprep.subr.bf16.mxu0 %v4452_v31  ;;  %2064 = vmatprep.subr.bf16.mxu1 %v4454_v32  ;;  %v317_v31 = vld [vmem:[#allocation7 + $0x3f8] sm:$0xff]  ;;  %v4491_v32 = vcombine.low %v304_v18, %v308_v19  ;;  %v4500_v34 = vcombine.high %v312_v28, %v316_v29 }
  0xd1   :  { %v4502_v35 = vcombine.high %v313_v30, %v317_v31  ;;  %v4501_v40 = vcombine.low %v313_v30, %v317_v31  ;;  %v364_v30 = vld [vmem:[#allocation7 + $0x570] sm:$0xff]  ;;  %v361_v31 = vld [vmem:[#allocation7 + $0x558] sm:$0xff] }
  0xd3   :  { %1979 = vmatpush1.bf16.msra.mxu0 %v4451_v25  ;;  %2065 = vmatpush1.bf16.msra.mxu1 %v4453_v37  ;;  %v324_v25 = vld [vmem:[#allocation7 + $0x430] sm:$0xff]  ;;  %v321_v37 = vld [vmem:[#allocation7 + $0x418] sm:$0xff] }
  0xd4   :  { %1980 = vmatprep.subr.bf16.mxu0 %v4460_v38  ;;  %2066 = vmatprep.subr.bf16.mxu1 %v4462_v39  ;;  %v325_v38 = vld [vmem:[#allocation7 + $0x438] sm:$0xff]  ;;  %v4499_v39 = vcombine.low %v312_v28, %v316_v29  ;;  %v4508_v41 = vcombine.high %v320_v36, %v324_v25  ;;  %v4540_v28 = vcombine.high %v352_v21, %v356_v22  ;;  %v360_v29 = vld [vmem:[#allocation7 + $0x550] sm:$0xff] }
  0xd5   :  { %v4510_v42 = vcombine.high %v321_v37, %v325_v38  ;;  %v4509_v48 = vcombine.low %v321_v37, %v325_v38  ;;  %v372_v37 = vld [vmem:[#allocation7 + $0x5b0] sm:$0xff]  ;;  %v369_v38 = vld [vmem:[#allocation7 + $0x598] sm:$0xff] }
  0xd7   :  { %1981 = vmatpush1.bf16.msra.mxu0 %v4459_v44  ;;  %2067 = vmatpush1.bf16.msra.mxu1 %v4461_v45  ;;  %v332_v44 = vld [vmem:[#allocation7 + $0x470] sm:$0xff]  ;;  %v329_v45 = vld [vmem:[#allocation7 + $0x458] sm:$0xff] }
  0xd8   :  { %1982 = vmatprep.subr.bf16.mxu0 %v4468_v46  ;;  %2068 = vmatprep.subr.bf16.mxu1 %v4470_v47  ;;  %v333_v46 = vld [vmem:[#allocation7 + $0x478] sm:$0xff]  ;;  %v4507_v47 = vcombine.low %v320_v36, %v324_v25  ;;  %v4516_v49 = vcombine.high %v328_v43, %v332_v44  ;;  %v368_v25 = vld [vmem:[#allocation7 + $0x590] sm:$0xff] }
  0xd9   :  { %v4518_v50 = vcombine.high %v329_v45, %v333_v46  ;;  %v4517_v57 = vcombine.low %v329_v45, %v333_v46  ;;  %v380_v45 = vld [vmem:[#allocation7 + $0x5f0] sm:$0xff]  ;;  %v377_v46 = vld [vmem:[#allocation7 + $0x5d8] sm:$0xff] }
  0xdb   :  { %1983 = vmatpush1.bf16.msra.mxu0 %v4467_v53  ;;  %2069 = vmatpush1.bf16.msra.mxu1 %v4469_v54  ;;  %v340_v53 = vld [vmem:[#allocation7 + $0x4b0] sm:$0xff]  ;;  %v337_v54 = vld [vmem:[#allocation7 + $0x498] sm:$0xff] }
  0xdc   :  { %1984 = vmatprep.subr.bf16.mxu0 %v4476_v55  ;;  %2070 = vmatprep.subr.bf16.mxu1 %v4478_v56  ;;  %v341_v55 = vld [vmem:[#allocation7 + $0x4b8] sm:$0xff]  ;;  %v4515_v56 = vcombine.low %v328_v43, %v332_v44  ;;  %v4524_v58 = vcombine.high %v336_v51, %v340_v53  ;;  %v376_v44 = vld [vmem:[#allocation7 + $0x5d0] sm:$0xff] }
  0xdd   :  { %v4526_v60 = vcombine.high %v337_v54, %v341_v55 }
  0xdf   :  { %1985 = vmatpush1.bf16.msra.mxu0 %v4475_v62  ;;  %2071 = vmatpush1.bf16.msra.mxu1 %v4477_v63  ;;  %v348_v62 = vld [vmem:[#allocation7 + $0x4f0] sm:$0xff]  ;;  %v345_v63 = vld [vmem:[#allocation7 + $0x4d8] sm:$0xff] }
  0xe0   :  { %1986 = vmatprep.subr.bf16.mxu0 %v4484_v16  ;;  %2072 = vmatprep.subr.bf16.mxu1 %v4486_v17  ;;  %v349_v16 = vld [vmem:[#allocation7 + $0x4f8] sm:$0xff]  ;;  %v4523_v17 = vcombine.low %v336_v51, %v340_v53  ;;  %v4532_v18 = vcombine.high %v344_v61, %v348_v62  ;;  %v384_v53 = vld [vmem:[#allocation7 + $0x610] sm:$0xff] }
  0xe1   :  { %v4534_v19 = vcombine.high %v345_v63, %v349_v16 }
  0xe3   :  { %1987 = vmatpush1.bf16.msra.mxu0 %v4483_v23  ;;  %2073 = vmatpush1.bf16.msra.mxu1 %v4485_v24  ;;  %v353_v23 = vld [vmem:[#allocation7 + $0x518] sm:$0xff] }
  0xe4   :  { %1988 = vmatprep.subr.bf16.mxu0 %v4492_v26  ;;  %2074 = vmatprep.subr.bf16.mxu1 %v4494_v27  ;;  %v357_v24 = vld [vmem:[#allocation7 + $0x538] sm:$0xff]  ;;  %v4531_v26 = vcombine.low %v344_v61, %v348_v62  ;;  %v4533_v27 = vcombine.low %v345_v63, %v349_v16  ;;  %v392_v62 = vld [vmem:[#allocation7 + $0x650] sm:$0xff] }
  0xe5   :  { %v396_v63 = vld [vmem:[#allocation7 + $0x670] sm:$0xff]  ;;  %v393_v16 = vld [vmem:[#allocation7 + $0x658] sm:$0xff] }
  0xe7   :  { %1989 = vmatpush1.bf16.msra.mxu0 %v4491_v32  ;;  %2075 = vmatpush1.bf16.msra.mxu1 %v4493_v33  ;;  %v365_v32 = vld [vmem:[#allocation7 + $0x578] sm:$0xff]  ;;  %v4539_v33 = vcombine.low %v352_v21, %v356_v22  ;;  %v400_v22 = vld [vmem:[#allocation7 + $0x690] sm:$0xff] }
  0xe8   :  { %1990 = vmatprep.subr.bf16.mxu0 %v4500_v34  ;;  %2076 = vmatprep.subr.bf16.mxu1 %v4502_v35  ;;  %v4541_v34 = vcombine.low %v353_v23, %v357_v24  ;;  %v4548_v35 = vcombine.high %v360_v29, %v364_v30  ;;  %v4550_v36 = vcombine.high %v361_v31, %v365_v32 }
  0xeb   :  { %1991 = vmatpush1.bf16.msra.mxu0 %v4499_v39  ;;  %2077 = vmatpush1.bf16.msra.mxu1 %v4501_v40  ;;  %v373_v39 = vld [vmem:[#allocation7 + $0x5b8] sm:$0xff]  ;;  %v4547_v40 = vcombine.low %v360_v29, %v364_v30  ;;  %v408_v30 = vld [vmem:[#allocation7 + $0x6d0] sm:$0xff] }
  0xec   :  { %2003 = vmatprep.subr.bf16.mxu0 %v4508_v41  ;;  %2089 = vmatprep.subr.bf16.mxu1 %v4510_v42  ;;  %v4549_v41 = vcombine.low %v361_v31, %v365_v32  ;;  %v4556_v42 = vcombine.high %v368_v25, %v372_v37  ;;  %v4558_v43 = vcombine.high %v369_v38, %v373_v39  ;;  %v412_v31 = vld [vmem:[#allocation7 + $0x6f0] sm:$0xff]  ;;  %v409_v32 = vld [vmem:[#allocation7 + $0x6d8] sm:$0xff] }
  0xee   :  { %1993 = vmatmul.mubr.bf16.vlgmr.msra.gmra.mrb[4].mxu0 %v5336_v59  ;;  %2079 = vmatmul.mubr.bf16.vlgmr.msra.gmra.mrb[4].mxu1 %v5336_v59  ;;  %v4525_v59 = vcombine.low %v337_v54, %v341_v55  ;;  %v388_v54 = vld [vmem:[#allocation7 + $0x630] sm:$0xff]  ;;  %v385_v55 = vld [vmem:[#allocation7 + $0x618] sm:$0xff] }
  0xef   :  { %2004 = vmatpush1.bf16.msra.mxu0 %v4507_v47  ;;  %2090 = vmatpush1.bf16.msra.mxu1 %v4509_v48  ;;  %v381_v47 = vld [vmem:[#allocation7 + $0x5f8] sm:$0xff]  ;;  %v4555_v48 = vcombine.low %v368_v25, %v372_v37  ;;  %v416_v37 = vld [vmem:[#allocation7 + $0x710] sm:$0xff] }
  0xf0   :  { %2005 = vmatprep.subr.bf16.mxu0 %v4516_v49  ;;  %2091 = vmatprep.subr.bf16.mxu1 %v4518_v50  ;;  %v4557_v49 = vcombine.low %v369_v38, %v373_v39  ;;  %v4564_v50 = vcombine.high %v376_v44, %v380_v45  ;;  %v4566_v51 = vcombine.high %v377_v46, %v381_v47  ;;  %v420_v38 = vld [vmem:[#allocation7 + $0x730] sm:$0xff]  ;;  %v417_v39 = vld [vmem:[#allocation7 + $0x718] sm:$0xff] }
  0xf1   :  { %2035 = vmatprep.mubr.bf16.mxu0 %v5341_v20  ;;  %2121 = vmatprep.mubr.bf16.mxu1 %v5341_v20  ;;  %v4542_v20 = vcombine.high %v353_v23, %v357_v24  ;;  %v404_v23 = vld [vmem:[#allocation7 + $0x6b0] sm:$0xff]  ;;  %v401_v24 = vld [vmem:[#allocation7 + $0x698] sm:$0xff] }
  0xf3   :  { %2006 = vmatpush1.bf16.msra.mxu0 %v4515_v56  ;;  %2092 = vmatpush1.bf16.msra.mxu1 %v4517_v57  ;;  %v389_v56 = vld [vmem:[#allocation7 + $0x638] sm:$0xff]  ;;  %v4563_v57 = vcombine.low %v376_v44, %v380_v45  ;;  %v424_v45 = vld [vmem:[#allocation7 + $0x750] sm:$0xff] }
  0xf4   :  { %2007 = vmatprep.subr.bf16.mxu0 %v4524_v58  ;;  %2093 = vmatprep.subr.bf16.mxu1 %v4526_v60  ;;  %v4565_v58 = vcombine.low %v377_v46, %v381_v47  ;;  %v4572_v60 = vcombine.high %v384_v53, %v388_v54  ;;  %v4574_v61 = vcombine.high %v385_v55, %v389_v56  ;;  %v428_v46 = vld [vmem:[#allocation7 + $0x770] sm:$0xff]  ;;  %v425_v47 = vld [vmem:[#allocation7 + $0x758] sm:$0xff] }
  0xf7   :  { %2008 = vmatpush1.bf16.msra.mxu0 %v4523_v17  ;;  %2094 = vmatpush1.bf16.msra.mxu1 %v4525_v59  ;;  %v397_v17 = vld [vmem:[#allocation7 + $0x678] sm:$0xff]  ;;  %v4571_v59 = vcombine.low %v384_v53, %v388_v54  ;;  %v432_v54 = vld [vmem:[#allocation7 + $0x790] sm:$0xff] }
  0xf8   :  { %2009 = vmatprep.subr.bf16.mxu0 %v4532_v18  ;;  %2095 = vmatprep.subr.bf16.mxu1 %v4534_v19  ;;  %v4573_v18 = vcombine.low %v385_v55, %v389_v56  ;;  %v4580_v19 = vcombine.high %v392_v62, %v396_v63  ;;  %v4582_v21 = vcombine.high %v393_v16, %v397_v17  ;;  %v436_v55 = vld [vmem:[#allocation7 + $0x7b0] sm:$0xff]  ;;  %v433_v56 = vld [vmem:[#allocation7 + $0x798] sm:$0xff] }
  0xfb   :  { %2010 = vmatpush1.bf16.msra.mxu0 %v4531_v26  ;;  %2096 = vmatpush1.bf16.msra.mxu1 %v4533_v27  ;;  %v405_v26 = vld [vmem:[#allocation7 + $0x6b8] sm:$0xff]  ;;  %v4579_v27 = vcombine.low %v392_v62, %v396_v63  ;;  %v440_v63 = vld [vmem:[#allocation7 + $0x7d0] sm:$0xff] }
  0xfc   :  { %2011 = vmatprep.subr.bf16.mxu0 %v4540_v28  ;;  %2097 = vmatprep.subr.bf16.mxu1 %v4542_v20  ;;  %v4581_v28 = vcombine.low %v393_v16, %v397_v17  ;;  %v4588_v20 = vcombine.high %v400_v22, %v404_v23  ;;  %v4590_v29 = vcombine.high %v401_v24, %v405_v26  ;;  %v444_v16 = vld [vmem:[#allocation7 + $0x7f0] sm:$0xff]  ;;  %v441_v17 = vld [vmem:[#allocation7 + $0x7d8] sm:$0xff] }
  0xff   :  { %2012 = vmatpush1.bf16.msra.mxu0 %v4539_v33  ;;  %2098 = vmatpush1.bf16.msra.mxu1 %v4541_v34  ;;  %v413_v33 = vld [vmem:[#allocation7 + $0x6f8] sm:$0xff]  ;;  %v4587_v34 = vcombine.low %v400_v22, %v404_v23  ;;  %v4627_v23 = vcombine.low %v440_v63, %v444_v16 }
 0x100   :  { %2013 = vmatprep.subr.bf16.mxu0 %v4548_v35  ;;  %2099 = vmatprep.subr.bf16.mxu1 %v4550_v36  ;;  %v4589_v35 = vcombine.low %v401_v24, %v405_v26  ;;  %v4596_v36 = vcombine.high %v408_v30, %v412_v31  ;;  %v4598_v25 = vcombine.high %v409_v32, %v413_v33  ;;  %v448_v26 = vlaneseq }
 0x103   :  { %2014 = vmatpush1.bf16.msra.mxu0 %v4547_v40  ;;  %2100 = vmatpush1.bf16.msra.mxu1 %v4549_v41  ;;  %v421_v40 = vld [vmem:[#allocation7 + $0x738] sm:$0xff]  ;;  %v4595_v41 = vcombine.low %v408_v30, %v412_v31 }
 0x104   :  { %2015 = vmatprep.subr.bf16.mxu0 %v4556_v42  ;;  %2101 = vmatprep.subr.bf16.mxu1 %v4558_v43  ;;  %v4597_v42 = vcombine.low %v409_v32, %v413_v33  ;;  %v4604_v43 = vcombine.high %v416_v37, %v420_v38  ;;  %v4606_v44 = vcombine.high %v417_v39, %v421_v40 }
 0x107   :  { %2016 = vmatpush1.bf16.msra.mxu0 %v4555_v48  ;;  %2102 = vmatpush1.bf16.msra.mxu1 %v4557_v49  ;;  %v429_v48 = vld [vmem:[#allocation7 + $0x778] sm:$0xff]  ;;  %v4603_v49 = vcombine.low %v416_v37, %v420_v38 }
 0x108   :  { %2017 = vmatprep.subr.bf16.mxu0 %v4564_v50  ;;  %2103 = vmatprep.subr.bf16.mxu1 %v4566_v51  ;;  %v4605_v50 = vcombine.low %v417_v39, %v421_v40  ;;  %v4612_v51 = vcombine.high %v424_v45, %v428_v46  ;;  %v4614_v53 = vcombine.high %v425_v47, %v429_v48 }
 0x10b   :  { %2018 = vmatpush1.bf16.msra.mxu0 %v4563_v57  ;;  %2104 = vmatpush1.bf16.msra.mxu1 %v4565_v58  ;;  %v437_v57 = vld [vmem:[#allocation7 + $0x7b8] sm:$0xff]  ;;  %v4611_v58 = vcombine.low %v424_v45, %v428_v46 }
 0x10c   :  { %2019 = vmatprep.subr.bf16.mxu0 %v4572_v60  ;;  %2105 = vmatprep.subr.bf16.mxu1 %v4574_v61  ;;  %v4613_v60 = vcombine.low %v425_v47, %v429_v48  ;;  %v4620_v61 = vcombine.high %v432_v54, %v436_v55  ;;  %v4622_v62 = vcombine.high %v433_v56, %v437_v57 }
 0x10f   :  { %2020 = vmatpush1.bf16.msra.mxu0 %v4571_v59  ;;  %2106 = vmatpush1.bf16.msra.mxu1 %v4573_v18  ;;  %v445_v59 = vld [vmem:[#allocation7 + $0x7f8] sm:$0xff]  ;;  %v4619_v18 = vcombine.low %v432_v54, %v436_v55 }
 0x110   :  { %2021 = vmatprep.subr.bf16.mxu0 %v4580_v19  ;;  %2107 = vmatprep.subr.bf16.mxu1 %v4582_v21  ;;  %v4621_v19 = vcombine.low %v433_v56, %v437_v57  ;;  %v4628_v21 = vcombine.high %v440_v63, %v444_v16  ;;  %v4630_v22 = vcombine.high %v441_v17, %v445_v59 }
 0x111   :  { %v4629_v24 = vcombine.low %v441_v17, %v445_v59 }
 0x113   :  { %2022 = vmatpush1.bf16.msra.mxu0 %v4579_v27  ;;  %2108 = vmatpush1.bf16.msra.mxu1 %v4581_v28  ;;  %v449_v27 = vshrl.u32 %v448_v26, 7 }
 0x114   :  { %2023 = vmatprep.subr.bf16.mxu0 %v4588_v20  ;;  %2109 = vmatprep.subr.bf16.mxu1 %v4590_v29  ;;  %v446_v20 = vld [vmem:[%s7293_s2] sm:$0xff] }
 0x115   :  { %v450_v28 = vsub.s32 0, %v449_v27  ;;  %v458_v29 = vsub.s32 2, %v449_v27  ;;  %v454_v30 = vsub.s32 1, %v449_v27  ;;  %v462_v31 = vsub.s32 3, %v449_v27 }
 0x116   :  { %v478_v54 = vsub.s32 7, %v449_v27 }
 0x117   :  { %2024 = vmatpush1.bf16.msra.mxu0 %v4587_v34  ;;  %2110 = vmatpush1.bf16.msra.mxu1 %v4589_v35  ;;  %v451_v32 = vrot.slane %v446_v20, %v450_v28  ;;  %v459_v33 = vrot.slane %v446_v20, %v458_v29  ;;  %v455_v34 = vrot.slane %v446_v20, %v454_v30 }
 0x118   :  { %2025 = vmatprep.subr.bf16.mxu0 %v4596_v36  ;;  %2111 = vmatprep.subr.bf16.mxu1 %v4598_v25  ;;  %v463_v35 = vrot.slane %v446_v20, %v462_v31 }
 0x11b   :  { %2026 = vmatpush1.bf16.msra.mxu0 %v4595_v41  ;;  %2112 = vmatpush1.bf16.msra.mxu1 %v4597_v42 }
 0x11c   :  { %2027 = vmatprep.subr.bf16.mxu0 %v4604_v43  ;;  %2113 = vmatprep.subr.bf16.mxu1 %v4606_v44 }
 0x11f   :  { %2028 = vmatpush1.bf16.msra.mxu0 %v4603_v49  ;;  %2114 = vmatpush1.bf16.msra.mxu1 %v4605_v50  ;;  %v466_v50 = vsub.s32 4, %v449_v27 }
 0x120   :  { %2029 = vmatprep.subr.bf16.mxu0 %v4612_v51  ;;  %2115 = vmatprep.subr.bf16.mxu1 %v4614_v53  ;;  %v474_v51 = vsub.s32 6, %v449_v27  ;;  %v470_v53 = vsub.s32 5, %v449_v27 }
 0x121   :  { %v467_v55 = vrot.slane %v446_v20, %v466_v50 }
 0x122   :  { %v475_v56 = vrot.slane %v446_v20, %v474_v51  ;;  %v471_v57 = vrot.slane %v446_v20, %v470_v53 }
 0x123   :  { %2030 = vmatpush1.bf16.msra.mxu0 %v4611_v58  ;;  %2116 = vmatpush1.bf16.msra.mxu1 %v4613_v60  ;;  %v479_v58 = vrot.slane %v446_v20, %v478_v54 }
 0x124   :  { %2031 = vmatprep.subr.bf16.mxu0 %v4620_v61  ;;  %2117 = vmatprep.subr.bf16.mxu1 %v4622_v62 }
 0x127   :  { %2032 = vmatpush1.bf16.msra.mxu0 %v4619_v18  ;;  %2118 = vmatpush1.bf16.msra.mxu1 %v4621_v19 }
 0x128   :  { %2033 = vmatprep.subr.bf16.mxu0 %v4628_v21  ;;  %2119 = vmatprep.subr.bf16.mxu1 %v4630_v22 }
 0x12b   :  { %2034 = vmatpush1.bf16.msra.mxu0 %v4627_v23  ;;  %2120 = vmatpush1.bf16.msra.mxu1 %v4629_v24 }
 0x12e   :  { %2036 = vmatmul.mubr.bf16.vlgmr.msra.gmra.mrb[4].mxu0 %v5350_v52  ;;  %2122 = vmatmul.mubr.bf16.vlgmr.msra.gmra.mrb[4].mxu1 %v5350_v52 }
 0x181   :  { %v1865_v36 = vpop.f32.mrb[0].mxu0  ;;  %v1951_v37 = vpop.f32.mrb[0].mxu1 }
 0x182   :  { %v4657_v25 = vadd.f32 %v1865_v36, %v451_v32  ;;  %v1867_v38 = vpop.f32.mrb[1].mxu0  ;;  %v4661_v39 = vadd.f32 %v1951_v37, %v459_v33  ;;  %v1953_v40 = vpop.f32.mrb[1].mxu1 }
 0x183   :  { %v4658_v52 = vadd.f32 %v1867_v38, %v455_v34  ;;  %v1869_v41 = vpop.f32.mrb[2].mxu0  ;;  %v4662_v42 = vadd.f32 %v1953_v40, %v463_v35  ;;  %v1955_v44 = vpop.f32.mrb[2].mxu1 }
 0x184   :  { %2132 = vst [vmem:[#allocation2] sm:$0xff] %v4657_v25  ;;  %v4659_v43 = vadd.f32 %v1869_v41, %v451_v32  ;;  %v1871_v45 = vpop.f32.mrb[3].mxu0  ;;  %2134 = vst [vmem:[#allocation2 + $0x10] sm:$0xff] %v4661_v39  ;;  %v4663_v46 = vadd.f32 %v1955_v44, %v459_v33  ;;  %v1957_v48 = vpop.f32.mrb[3].mxu1 }
 0x185   :  { %2133 = vst [vmem:[#allocation2 + $0x8] sm:$0xff] %v4658_v52  ;;  %v4660_v47 = vadd.f32 %v1871_v45, %v455_v34  ;;  %2135 = vst [vmem:[#allocation2 + $0x18] sm:$0xff] %v4662_v42  ;;  %v4664_v49 = vadd.f32 %v1957_v48, %v463_v35 }
 0x186   :  { %2140 = vst [vmem:[#allocation2 + $0x40] sm:$0xff] %v4659_v43  ;;  %2142 = vst [vmem:[#allocation2 + $0x50] sm:$0xff] %v4663_v46 }
 0x187   :  { %2141 = vst [vmem:[#allocation2 + $0x48] sm:$0xff] %v4660_v47  ;;  %2143 = vst [vmem:[#allocation2 + $0x58] sm:$0xff] %v4664_v49 }
 0x201   :  { %v2037_v60 = vpop.f32.mrb[4].mxu0  ;;  %v2123_v62 = vpop.f32.mrb[4].mxu1 }
 0x202   :  { %v4665_v61 = vadd.f32 %v2037_v60, %v467_v55  ;;  %v2039_v63 = vpop.f32.mrb[5].mxu0  ;;  %v4669_v16 = vadd.f32 %v2123_v62, %v475_v56  ;;  %v2125_v59 = vpop.f32.mrb[5].mxu1 }
 0x203   :  { %v4666_v17 = vadd.f32 %v2039_v63, %v471_v57  ;;  %v2041_v18 = vpop.f32.mrb[6].mxu0  ;;  %v4670_v19 = vadd.f32 %v2125_v59, %v479_v58  ;;  %v2127_v22 = vpop.f32.mrb[6].mxu1 }
 0x204   :  { %2136 = vst [vmem:[#allocation2 + $0x20] sm:$0xff] %v4665_v61  ;;  %v4667_v21 = vadd.f32 %v2041_v18, %v467_v55  ;;  %v2043_v23 = vpop.f32.mrb[7].mxu0  ;;  %2138 = vst [vmem:[#allocation2 + $0x30] sm:$0xff] %v4669_v16  ;;  %v4671_v24 = vadd.f32 %v2127_v22, %v475_v56  ;;  %v2129_v27 = vpop.f32.mrb[7].mxu1 }
 0x205   :  { %2137 = vst [vmem:[#allocation2 + $0x28] sm:$0xff] %v4666_v17  ;;  %v4668_v26 = vadd.f32 %v2043_v23, %v471_v57  ;;  %2139 = vst [vmem:[#allocation2 + $0x38] sm:$0xff] %v4670_v19  ;;  %v4672_v28 = vadd.f32 %v2129_v27, %v479_v58 }
 0x206   :  { %2144 = vst [vmem:[#allocation2 + $0x60] sm:$0xff] %v4667_v21  ;;  %2146 = vst [vmem:[#allocation2 + $0x70] sm:$0xff] %v4671_v24 }
 0x207   :  { %2145 = vst [vmem:[#allocation2 + $0x68] sm:$0xff] %v4668_v26  ;;  %2147 = vst [vmem:[#allocation2 + $0x78] sm:$0xff] %v4672_v28 }
 0x208   :  { %5171 = dma.done.wait [#allocation6], 16384 }
 0x209   :  { %5172 = vsyncadd [#allocation6], 4294950912  ;;  %v7298_v20 = vmov 0   ;;  %v5367_v29 = vld [vmem:[#allocation3 + $0x18] sm:$0xff]  ;;  %v5369_v30 = vld [vmem:[#allocation3 + $0x10] sm:$0xff] }
 0x20a   :  { %2361 = vmatprep.mubr.bf16.mxu1 %v7298_v20  ;;  %2320 = vmatprep.mubr.bf16.mxu0 %v7298_v20  ;;  %v5371_v31 = vld [vmem:[#allocation3 + $0x58] sm:$0xff]  ;;  %v5374_v32 = vld [vmem:[#allocation3 + $0x8] sm:$0xff]  ;;  %v5376_v33 = vld [vmem:[#allocation3] sm:$0xff] }
 0x20b   :  { %2329 = vmatprep.subr.bf16.mxu1 %v5367_v29  ;;  %2288 = vmatprep.subr.bf16.mxu0 %v5374_v32  ;;  %v5380_v34 = vld [vmem:[#allocation3 + $0x48] sm:$0xff]  ;;  %v5383_v35 = vld [vmem:[#allocation3 + $0x50] sm:$0xff]  ;;  %v5386_v36 = vld [vmem:[#allocation3 + $0x98] sm:$0xff] }
 0x20c   :  { %2330 = vmatpush1.bf16.msra.mxu1 %v5369_v30  ;;  %2289 = vmatpush1.bf16.msra.mxu0 %v5376_v33  ;;  %v5389_v25 = vld [vmem:[#allocation3 + $0x40] sm:$0xff]  ;;  %v5391_v37 = vld [vmem:[#allocation3 + $0x88] sm:$0xff]  ;;  %v5395_v38 = vld [vmem:[#allocation3 + $0x90] sm:$0xff] }
 0x20d   :  { %2331 = vmatprep.subr.bf16.mxu1 %v5371_v31  ;;  %2290 = vmatprep.subr.bf16.mxu0 %v5380_v34  ;;  %v5398_v39 = vld [vmem:[#allocation3 + $0xd8] sm:$0xff]  ;;  %v5401_v52 = vld [vmem:[#allocation3 + $0x80] sm:$0xff]  ;;  %v5403_v40 = vld [vmem:[#allocation3 + $0xc8] sm:$0xff] }
 0x20e   :  { %v5407_v41 = vld [vmem:[#allocation3 + $0xd0] sm:$0xff]  ;;  %v5410_v42 = vld [vmem:[#allocation3 + $0x118] sm:$0xff]  ;;  %v5413_v43 = vld [vmem:[#allocation3 + $0xc0] sm:$0xff] }
 0x20f   :  { %v5415_v44 = vld [vmem:[#allocation3 + $0x108] sm:$0xff]  ;;  %v5419_v45 = vld [vmem:[#allocation3 + $0x110] sm:$0xff]  ;;  %v5422_v46 = vld [vmem:[#allocation3 + $0x158] sm:$0xff] }
 0x210   :  { %2332 = vmatpush1.bf16.msra.mxu1 %v5383_v35  ;;  %2291 = vmatpush1.bf16.msra.mxu0 %v5389_v25  ;;  %v5425_v47 = vld [vmem:[#allocation3 + $0x100] sm:$0xff]  ;;  %v5427_v48 = vld [vmem:[#allocation3 + $0x148] sm:$0xff]  ;;  %v5431_v49 = vld [vmem:[#allocation3 + $0x150] sm:$0xff] }
 0x211   :  { %2333 = vmatprep.subr.bf16.mxu1 %v5386_v36  ;;  %2292 = vmatprep.subr.bf16.mxu0 %v5391_v37  ;;  %v5434_v50 = vld [vmem:[#allocation3 + $0x198] sm:$0xff]  ;;  %v5437_v51 = vld [vmem:[#allocation3 + $0x140] sm:$0xff]  ;;  %v5439_v53 = vld [vmem:[#allocation3 + $0x188] sm:$0xff] }
 0x212   :  { %v5443_v54 = vld [vmem:[#allocation3 + $0x190] sm:$0xff]  ;;  %v5446_v55 = vld [vmem:[#allocation3 + $0x1d8] sm:$0xff]  ;;  %v5449_v56 = vld [vmem:[#allocation3 + $0x180] sm:$0xff] }
 0x213   :  { %v5451_v57 = vld [vmem:[#allocation3 + $0x1c8] sm:$0xff]  ;;  %v5455_v58 = vld [vmem:[#allocation3 + $0x1d0] sm:$0xff]  ;;  %v5458_v60 = vld [vmem:[#allocation3 + $0x218] sm:$0xff] }
 0x214   :  { %2334 = vmatpush1.bf16.msra.mxu1 %v5395_v38  ;;  %2293 = vmatpush1.bf16.msra.mxu0 %v5401_v52  ;;  %7697 = vst [vmem:[#allocation36_spill] sm:$0xff] %v5458_v60  ;;  %v5461_v61 = vld [vmem:[#allocation3 + $0x1c0] sm:$0xff]  ;;  %v5463_v62 = vld [vmem:[#allocation3 + $0x208] sm:$0xff]  ;;  %v5467_v63 = vld [vmem:[#allocation3 + $0x210] sm:$0xff] }
 0x215   :  { %2335 = vmatprep.subr.bf16.mxu1 %v5398_v39  ;;  %2294 = vmatprep.subr.bf16.mxu0 %v5403_v40  ;;  %7698 = vst [vmem:[#allocation37_spill] sm:$0xff] %v5463_v62  ;;  %7699 = vst [vmem:[#allocation38_spill] sm:$0xff] %v5467_v63  ;;  %v5470_v16 = vld [vmem:[#allocation3 + $0x258] sm:$0xff]  ;;  %v5473_v17 = vld [vmem:[#allocation3 + $0x200] sm:$0xff] }
 0x216   :  { %7700 = vst [vmem:[#allocation39_spill] sm:$0xff] %v5470_v16  ;;  %7701 = vst [vmem:[#allocation40_spill] sm:$0xff] %v5473_v17  ;;  %v5475_v59 = vld [vmem:[#allocation3 + $0x248] sm:$0xff]  ;;  %v5479_v18 = vld [vmem:[#allocation3 + $0x250] sm:$0xff] }
 0x217   :  { %7702 = vst [vmem:[#allocation41_spill] sm:$0xff] %v5475_v59  ;;  %7703 = vst [vmem:[#allocation42_spill] sm:$0xff] %v5479_v18  ;;  %v5482_v19 = vld [vmem:[#allocation3 + $0x298] sm:$0xff]  ;;  %v5485_v21 = vld [vmem:[#allocation3 + $0x240] sm:$0xff] }
 0x218   :  { %2336 = vmatpush1.bf16.msra.mxu1 %v5407_v41  ;;  %2295 = vmatpush1.bf16.msra.mxu0 %v5413_v43  ;;  %7704 = vst [vmem:[#allocation43_spill] sm:$0xff] %v5482_v19  ;;  %7705 = vst [vmem:[#allocation44_spill] sm:$0xff] %v5485_v21  ;;  %v5487_v22 = vld [vmem:[#allocation3 + $0x288] sm:$0xff]  ;;  %v5491_v23 = vld [vmem:[#allocation3 + $0x290] sm:$0xff] }
 0x219   :  { %2337 = vmatprep.subr.bf16.mxu1 %v5410_v42  ;;  %2296 = vmatprep.subr.bf16.mxu0 %v5415_v44  ;;  %7706 = vst [vmem:[#allocation45_spill] sm:$0xff] %v5487_v22  ;;  %7707 = vst [vmem:[#allocation46_spill] sm:$0xff] %v5491_v23  ;;  %v5494_v24 = vld [vmem:[#allocation3 + $0x2d8] sm:$0xff]  ;;  %v5497_v26 = vld [vmem:[#allocation3 + $0x280] sm:$0xff] }
 0x21a   :  { %7708 = vst [vmem:[#allocation47_spill] sm:$0xff] %v5494_v24  ;;  %7709 = vst [vmem:[#allocation48_spill] sm:$0xff] %v5497_v26  ;;  %v5499_v27 = vld [vmem:[#allocation3 + $0x2c8] sm:$0xff]  ;;  %v5503_v28 = vld [vmem:[#allocation3 + $0x2d0] sm:$0xff] }
 0x21b   :  { %7710 = vst [vmem:[#allocation49_spill] sm:$0xff] %v5499_v27  ;;  %7711 = vst [vmem:[#allocation50_spill] sm:$0xff] %v5503_v28  ;;  %v5506_v20 = vld [vmem:[#allocation3 + $0x318] sm:$0xff]  ;;  %v5509_v7 = vld [vmem:[#allocation3 + $0x2c0] sm:$0xff] }
 0x21c   :  { %2338 = vmatpush1.bf16.msra.mxu1 %v5419_v45  ;;  %2297 = vmatpush1.bf16.msra.mxu0 %v5425_v47  ;;  %7712 = vst [vmem:[#allocation51_spill] sm:$0xff] %v5506_v20  ;;  %7713 = vst [vmem:[#allocation52_spill] sm:$0xff] %v5509_v7  ;;  %v5511_v15 = vld [vmem:[#allocation3 + $0x308] sm:$0xff]  ;;  %v5515_v6 = vld [vmem:[#allocation3 + $0x310] sm:$0xff] }
 0x21d   :  { %2339 = vmatprep.subr.bf16.mxu1 %v5422_v46  ;;  %2298 = vmatprep.subr.bf16.mxu0 %v5427_v48  ;;  %7714 = vst [vmem:[#allocation53_spill] sm:$0xff] %v5511_v15  ;;  %7715 = vst [vmem:[#allocation54_spill] sm:$0xff] %v5515_v6  ;;  %v5518_v14 = vld [vmem:[#allocation3 + $0x358] sm:$0xff]  ;;  %v5521_v5 = vld [vmem:[#allocation3 + $0x300] sm:$0xff] }
 0x21e   :  { %7716 = vst [vmem:[#allocation55_spill] sm:$0xff] %v5518_v14  ;;  %7717 = vst [vmem:[#allocation56_spill] sm:$0xff] %v5521_v5  ;;  %v5523_v13 = vld [vmem:[#allocation3 + $0x348] sm:$0xff]  ;;  %v5527_v4 = vld [vmem:[#allocation3 + $0x350] sm:$0xff] }
 0x21f   :  { %7718 = vst [vmem:[#allocation57_spill] sm:$0xff] %v5523_v13  ;;  %7719 = vst [vmem:[#allocation58_spill] sm:$0xff] %v5527_v4  ;;  %v5530_v12 = vld [vmem:[#allocation3 + $0x398] sm:$0xff]  ;;  %v5533_v3 = vld [vmem:[#allocation3 + $0x340] sm:$0xff] }
 0x220   :  { %2340 = vmatpush1.bf16.msra.mxu1 %v5431_v49  ;;  %2299 = vmatpush1.bf16.msra.mxu0 %v5437_v51  ;;  %7720 = vst [vmem:[#allocation59_spill] sm:$0xff] %v5530_v12  ;;  %7721 = vst [vmem:[#allocation60_spill] sm:$0xff] %v5533_v3  ;;  %v5535_v11 = vld [vmem:[#allocation3 + $0x388] sm:$0xff]  ;;  %v5539_v2 = vld [vmem:[#allocation3 + $0x390] sm:$0xff] }
 0x221   :  { %2341 = vmatprep.subr.bf16.mxu1 %v5434_v50  ;;  %2300 = vmatprep.subr.bf16.mxu0 %v5439_v53  ;;  %7722 = vst [vmem:[#allocation61_spill] sm:$0xff] %v5535_v11  ;;  %7723 = vst [vmem:[#allocation62_spill] sm:$0xff] %v5539_v2  ;;  %v5542_v10 = vld [vmem:[#allocation3 + $0x3d8] sm:$0xff]  ;;  %v5545_v1 = vld [vmem:[#allocation3 + $0x380] sm:$0xff] }
 0x222   :  { %7724 = vst [vmem:[#allocation63_spill] sm:$0xff] %v5542_v10  ;;  %7725 = vst [vmem:[#allocation64_spill] sm:$0xff] %v5545_v1  ;;  %v5547_v9 = vld [vmem:[#allocation3 + $0x3c8] sm:$0xff]  ;;  %v5551_v0 = vld [vmem:[#allocation3 + $0x3d0] sm:$0xff] }
 0x223   :  { %7726 = vst [vmem:[#allocation65_spill] sm:$0xff] %v5547_v9  ;;  %7727 = vst [vmem:[#allocation66_spill] sm:$0xff] %v5551_v0  ;;  %v5554_v8 = vld [vmem:[#allocation3 + $0x38] sm:$0xff] }
 0x224   :  { %2342 = vmatpush1.bf16.msra.mxu1 %v5443_v54  ;;  %2301 = vmatpush1.bf16.msra.mxu0 %v5449_v56  ;;  %7728 = vst [vmem:[#allocation67_spill] sm:$0xff] %v5554_v8 }
 0x225   :  { %2343 = vmatprep.subr.bf16.mxu1 %v5446_v55  ;;  %2302 = vmatprep.subr.bf16.mxu0 %v5451_v57 }
 0x228   :  { %2344 = vmatpush1.bf16.msra.mxu1 %v5455_v58  ;;  %2303 = vmatpush1.bf16.msra.mxu0 %v5461_v61 }
 0x229   :  { %2345 = vmatprep.subr.bf16.mxu1 %v5458_v60  ;;  %2304 = vmatprep.subr.bf16.mxu0 %v5463_v62 }
 0x22c   :  { %2346 = vmatpush1.bf16.msra.mxu1 %v5467_v63  ;;  %2305 = vmatpush1.bf16.msra.mxu0 %v5473_v17 }
 0x22d   :  { %2347 = vmatprep.subr.bf16.mxu1 %v5470_v16  ;;  %2306 = vmatprep.subr.bf16.mxu0 %v5475_v59 }
 0x230   :  { %2348 = vmatpush1.bf16.msra.mxu1 %v5479_v18  ;;  %2307 = vmatpush1.bf16.msra.mxu0 %v5485_v21 }
 0x231   :  { %2349 = vmatprep.subr.bf16.mxu1 %v5482_v19  ;;  %2308 = vmatprep.subr.bf16.mxu0 %v5487_v22 }
 0x234   :  { %2350 = vmatpush1.bf16.msra.mxu1 %v5491_v23  ;;  %2309 = vmatpush1.bf16.msra.mxu0 %v5497_v26 }
 0x235   :  { %2351 = vmatprep.subr.bf16.mxu1 %v5494_v24  ;;  %2310 = vmatprep.subr.bf16.mxu0 %v5499_v27 }
 0x238   :  { %2352 = vmatpush1.bf16.msra.mxu1 %v5503_v28  ;;  %2311 = vmatpush1.bf16.msra.mxu0 %v5509_v7 }
 0x239   :  { %2353 = vmatprep.subr.bf16.mxu1 %v5506_v20  ;;  %2312 = vmatprep.subr.bf16.mxu0 %v5511_v15 }
 0x23c   :  { %2354 = vmatpush1.bf16.msra.mxu1 %v5515_v6  ;;  %2313 = vmatpush1.bf16.msra.mxu0 %v5521_v5 }
 0x23d   :  { %2355 = vmatprep.subr.bf16.mxu1 %v5518_v14  ;;  %2314 = vmatprep.subr.bf16.mxu0 %v5523_v13 }
 0x240   :  { %2356 = vmatpush1.bf16.msra.mxu1 %v5527_v4  ;;  %2315 = vmatpush1.bf16.msra.mxu0 %v5533_v3  ;;  %v5559_v3 = vld [vmem:[#allocation3 + $0x28] sm:$0xff]  ;;  %v5603_v4 = vld [vmem:[#allocation3 + $0xf0] sm:$0xff] }
 0x241   :  { %2357 = vmatprep.subr.bf16.mxu1 %v5530_v12  ;;  %2316 = vmatprep.subr.bf16.mxu0 %v5535_v11  ;;  %v5557_v12 = vld [vmem:[#allocation3 + $0x3c0] sm:$0xff]  ;;  %7730 = vst [vmem:[#allocation69_spill] sm:$0xff] %v5559_v3  ;;  %v5563_v11 = vld [vmem:[#allocation3 + $0x30] sm:$0xff]  ;;  %7744 = vst [vmem:[#allocation82_spill] sm:$0xff] %v5603_v4 }
 0x242   :  { %7729 = vst [vmem:[#allocation68_spill] sm:$0xff] %v5557_v12  ;;  %7731 = vst [vmem:[#allocation70_spill] sm:$0xff] %v5563_v11 }
 0x244   :  { %2358 = vmatpush1.bf16.msra.mxu1 %v5539_v2  ;;  %2317 = vmatpush1.bf16.msra.mxu0 %v5545_v1  ;;  %v5569_v1 = vld [vmem:[#allocation3 + $0x20] sm:$0xff]  ;;  %v7734_v2 = vmov 0  }
 0x245   :  { %2359 = vmatprep.subr.bf16.mxu1 %v5542_v10  ;;  %2318 = vmatprep.subr.bf16.mxu0 %v5547_v9  ;;  %v5566_v10 = vld [vmem:[#allocation3 + $0x78] sm:$0xff]  ;;  %7733 = vst [vmem:[#allocation72_spill] sm:$0xff] %v5569_v1  ;;  %v5572_v9 = vld [vmem:[#allocation3 + $0x68] sm:$0xff] }
 0x246   :  { %7732 = vst [vmem:[#allocation71_spill] sm:$0xff] %v5566_v10  ;;  %7735 = vst [vmem:[#allocation73_spill] sm:$0xff] %v5572_v9 }
 0x248   :  { %2360 = vmatpush1.bf16.msra.mxu1 %v5551_v0  ;;  %2319 = vmatpush1.bf16.msra.mxu0 %v5557_v12  ;;  %v5580_v12 = vld [vmem:[#allocation3 + $0xb8] sm:$0xff]  ;;  %v5586_v0 = vld [vmem:[#allocation3 + $0xa8] sm:$0xff] }
 0x249   :  { %2411 = vmatprep.subr.bf16.mxu1 %v5554_v8  ;;  %2370 = vmatprep.subr.bf16.mxu0 %v5559_v3  ;;  %v5577_v8 = vld [vmem:[#allocation3 + $0x70] sm:$0xff]  ;;  %7737 = vst [vmem:[#allocation75_spill] sm:$0xff] %v5580_v12  ;;  %v5583_v3 = vld [vmem:[#allocation3 + $0x60] sm:$0xff]  ;;  %7739 = vst [vmem:[#allocation77_spill] sm:$0xff] %v5586_v0 }
 0x24a   :  { %7736 = vst [vmem:[#allocation74_spill] sm:$0xff] %v5577_v8  ;;  %7738 = vst [vmem:[#allocation76_spill] sm:$0xff] %v5583_v3 }
 0x24b   :  { %2362 = vmatmul.mubr.bf16.vlgmr.msra.gmra.mrb[8].mxu1 %v7734_v2  ;;  %2321 = vmatmul.mubr.bf16.vlgmr.msra.gmra.mrb[8].mxu0 %v7734_v2 }
 0x24c   :  { %2412 = vmatpush1.bf16.msra.mxu1 %v5563_v11  ;;  %2371 = vmatpush1.bf16.msra.mxu0 %v5569_v1  ;;  %v5594_v11 = vld [vmem:[#allocation3 + $0xf8] sm:$0xff]  ;;  %v5599_v1 = vld [vmem:[#allocation3 + $0xe8] sm:$0xff] }
 0x24d   :  { %2413 = vmatprep.subr.bf16.mxu1 %v5566_v10  ;;  %2372 = vmatprep.subr.bf16.mxu0 %v5572_v9  ;;  %v5591_v10 = vld [vmem:[#allocation3 + $0xb0] sm:$0xff]  ;;  %7741 = vst [vmem:[#allocation79_spill] sm:$0xff] %v5594_v11  ;;  %v5597_v9 = vld [vmem:[#allocation3 + $0xa0] sm:$0xff]  ;;  %7743 = vst [vmem:[#allocation81_spill] sm:$0xff] %v5599_v1 }
 0x24e   :  { %2443 = vmatprep.mubr.bf16.mxu1 %v7734_v2  ;;  %2402 = vmatprep.mubr.bf16.mxu0 %v7734_v2  ;;  %7740 = vst [vmem:[#allocation78_spill] sm:$0xff] %v5591_v10  ;;  %7742 = vst [vmem:[#allocation80_spill] sm:$0xff] %v5597_v9 }
 0x250   :  { %2414 = vmatpush1.bf16.msra.mxu1 %v5577_v8  ;;  %2373 = vmatpush1.bf16.msra.mxu0 %v5583_v3  ;;  %v5609_v8 = vld [vmem:[#allocation3 + $0xe0] sm:$0xff]  ;;  %v5611_v3 = vld [vmem:[#allocation3 + $0x128] sm:$0xff] }
 0x251   :  { %2415 = vmatprep.subr.bf16.mxu1 %v5580_v12  ;;  %2374 = vmatprep.subr.bf16.mxu0 %v5586_v0  ;;  %v5606_v12 = vld [vmem:[#allocation3 + $0x138] sm:$0xff]  ;;  %7746 = vst [vmem:[#allocation84_spill] sm:$0xff] %v5609_v8  ;;  %7747 = vst [vmem:[#allocation85_spill] sm:$0xff] %v5611_v3  ;;  %v5615_v0 = vld [vmem:[#allocation3 + $0x130] sm:$0xff] }
 0x252   :  { %7745 = vst [vmem:[#allocation83_spill] sm:$0xff] %v5606_v12  ;;  %7748 = vst [vmem:[#allocation86_spill] sm:$0xff] %v5615_v0 }
 0x254   :  { %2416 = vmatpush1.bf16.msra.mxu1 %v5591_v10  ;;  %2375 = vmatpush1.bf16.msra.mxu0 %v5597_v9  ;;  %v5621_v10 = vld [vmem:[#allocation3 + $0x120] sm:$0xff]  ;;  %v5623_v9 = vld [vmem:[#allocation3 + $0x168] sm:$0xff] }
 0x255   :  { %2417 = vmatprep.subr.bf16.mxu1 %v5594_v11  ;;  %2376 = vmatprep.subr.bf16.mxu0 %v5599_v1  ;;  %v5618_v11 = vld [vmem:[#allocation3 + $0x178] sm:$0xff]  ;;  %7750 = vst [vmem:[#allocation88_spill] sm:$0xff] %v5621_v10  ;;  %7751 = vst [vmem:[#allocation89_spill] sm:$0xff] %v5623_v9  ;;  %v5627_v1 = vld [vmem:[#allocation3 + $0x170] sm:$0xff] }
 0x256   :  { %7749 = vst [vmem:[#allocation87_spill] sm:$0xff] %v5618_v11  ;;  %7752 = vst [vmem:[#allocation90_spill] sm:$0xff] %v5627_v1 }
 0x258   :  { %2418 = vmatpush1.bf16.msra.mxu1 %v5603_v4  ;;  %2377 = vmatpush1.bf16.msra.mxu0 %v5609_v8  ;;  %v5633_v4 = vld [vmem:[#allocation3 + $0x160] sm:$0xff]  ;;  %v5635_v8 = vld [vmem:[#allocation3 + $0x1a8] sm:$0xff] }
 0x259   :  { %2419 = vmatprep.subr.bf16.mxu1 %v5606_v12  ;;  %2378 = vmatprep.subr.bf16.mxu0 %v5611_v3  ;;  %v5630_v12 = vld [vmem:[#allocation3 + $0x1b8] sm:$0xff]  ;;  %7754 = vst [vmem:[#allocation92_spill] sm:$0xff] %v5633_v4  ;;  %7755 = vst [vmem:[#allocation93_spill] sm:$0xff] %v5635_v8  ;;  %v5639_v3 = vld [vmem:[#allocation3 + $0x1b0] sm:$0xff] }
 0x25a   :  { %7753 = vst [vmem:[#allocation91_spill] sm:$0xff] %v5630_v12  ;;  %7756 = vst [vmem:[#allocation94_spill] sm:$0xff] %v5639_v3 }
 0x25c   :  { %2420 = vmatpush1.bf16.msra.mxu1 %v5615_v0  ;;  %2379 = vmatpush1.bf16.msra.mxu0 %v5621_v10  ;;  %v5645_v0 = vld [vmem:[#allocation3 + $0x1a0] sm:$0xff]  ;;  %v5647_v10 = vld [vmem:[#allocation3 + $0x1e8] sm:$0xff] }
 0x25d   :  { %2421 = vmatprep.subr.bf16.mxu1 %v5618_v11  ;;  %2380 = vmatprep.subr.bf16.mxu0 %v5623_v9  ;;  %v5642_v11 = vld [vmem:[#allocation3 + $0x1f8] sm:$0xff]  ;;  %7758 = vst [vmem:[#allocation96_spill] sm:$0xff] %v5645_v0  ;;  %7759 = vst [vmem:[#allocation97_spill] sm:$0xff] %v5647_v10  ;;  %v5651_v9 = vld [vmem:[#allocation3 + $0x1f0] sm:$0xff] }
 0x25e   :  { %7757 = vst [vmem:[#allocation95_spill] sm:$0xff] %v5642_v11  ;;  %7760 = vst [vmem:[#allocation98_spill] sm:$0xff] %v5651_v9 }
 0x260   :  { %2422 = vmatpush1.bf16.msra.mxu1 %v5627_v1  ;;  %2381 = vmatpush1.bf16.msra.mxu0 %v5633_v4  ;;  %v5657_v1 = vld [vmem:[#allocation3 + $0x1e0] sm:$0xff]  ;;  %v5659_v4 = vld [vmem:[#allocation3 + $0x228] sm:$0xff] }
 0x261   :  { %2423 = vmatprep.subr.bf16.mxu1 %v5630_v12  ;;  %2382 = vmatprep.subr.bf16.mxu0 %v5635_v8  ;;  %v5654_v12 = vld [vmem:[#allocation3 + $0x238] sm:$0xff]  ;;  %7762 = vst [vmem:[#allocation100_spill] sm:$0xff] %v5657_v1  ;;  %7763 = vst [vmem:[#allocation101_spill] sm:$0xff] %v5659_v4  ;;  %v5663_v8 = vld [vmem:[#allocation3 + $0x230] sm:$0xff] }
 0x262   :  { %7761 = vst [vmem:[#allocation99_spill] sm:$0xff] %v5654_v12  ;;  %7764 = vst [vmem:[#allocation102_spill] sm:$0xff] %v5663_v8 }
 0x264   :  { %2424 = vmatpush1.bf16.msra.mxu1 %v5639_v3  ;;  %2383 = vmatpush1.bf16.msra.mxu0 %v5645_v0  ;;  %v5669_v3 = vld [vmem:[#allocation3 + $0x220] sm:$0xff]  ;;  %v5671_v0 = vld [vmem:[#allocation3 + $0x268] sm:$0xff] }
 0x265   :  { %2425 = vmatprep.subr.bf16.mxu1 %v5642_v11  ;;  %2384 = vmatprep.subr.bf16.mxu0 %v5647_v10  ;;  %v5666_v11 = vld [vmem:[#allocation3 + $0x278] sm:$0xff]  ;;  %7766 = vst [vmem:[#allocation104_spill] sm:$0xff] %v5669_v3  ;;  %7767 = vst [vmem:[#allocation105_spill] sm:$0xff] %v5671_v0  ;;  %v5675_v10 = vld [vmem:[#allocation3 + $0x270] sm:$0xff] }
 0x266   :  { %7765 = vst [vmem:[#allocation103_spill] sm:$0xff] %v5666_v11  ;;  %7768 = vst [vmem:[#allocation106_spill] sm:$0xff] %v5675_v10 }
 0x268   :  { %2426 = vmatpush1.bf16.msra.mxu1 %v5651_v9  ;;  %2385 = vmatpush1.bf16.msra.mxu0 %v5657_v1  ;;  %v5681_v9 = vld [vmem:[#allocation3 + $0x260] sm:$0xff]  ;;  %v5683_v1 = vld [vmem:[#allocation3 + $0x2a8] sm:$0xff] }
 0x269   :  { %2427 = vmatprep.subr.bf16.mxu1 %v5654_v12  ;;  %2386 = vmatprep.subr.bf16.mxu0 %v5659_v4  ;;  %v5678_v12 = vld [vmem:[#allocation3 + $0x2b8] sm:$0xff]  ;;  %7770 = vst [vmem:[#allocation108_spill] sm:$0xff] %v5681_v9  ;;  %7771 = vst [vmem:[#allocation109_spill] sm:$0xff] %v5683_v1  ;;  %v5687_v4 = vld [vmem:[#allocation3 + $0x2b0] sm:$0xff] }
 0x26a   :  { %7769 = vst [vmem:[#allocation107_spill] sm:$0xff] %v5678_v12  ;;  %7772 = vst [vmem:[#allocation110_spill] sm:$0xff] %v5687_v4 }
 0x26c   :  { %2428 = vmatpush1.bf16.msra.mxu1 %v5663_v8  ;;  %2387 = vmatpush1.bf16.msra.mxu0 %v5669_v3  ;;  %v5693_v8 = vld [vmem:[#allocation3 + $0x2a0] sm:$0xff]  ;;  %v5695_v3 = vld [vmem:[#allocation3 + $0x2e8] sm:$0xff] }
 0x26d   :  { %2429 = vmatprep.subr.bf16.mxu1 %v5666_v11  ;;  %2388 = vmatprep.subr.bf16.mxu0 %v5671_v0  ;;  %v5690_v11 = vld [vmem:[#allocation3 + $0x2f8] sm:$0xff]  ;;  %7774 = vst [vmem:[#allocation112_spill] sm:$0xff] %v5693_v8  ;;  %7775 = vst [vmem:[#allocation113_spill] sm:$0xff] %v5695_v3  ;;  %v5699_v0 = vld [vmem:[#allocation3 + $0x2f0] sm:$0xff] }
 0x26e   :  { %7773 = vst [vmem:[#allocation111_spill] sm:$0xff] %v5690_v11  ;;  %7776 = vst [vmem:[#allocation114_spill] sm:$0xff] %v5699_v0 }
 0x270   :  { %2430 = vmatpush1.bf16.msra.mxu1 %v5675_v10  ;;  %2389 = vmatpush1.bf16.msra.mxu0 %v5681_v9  ;;  %v5705_v10 = vld [vmem:[#allocation3 + $0x2e0] sm:$0xff]  ;;  %v5707_v9 = vld [vmem:[#allocation3 + $0x328] sm:$0xff] }
 0x271   :  { %2431 = vmatprep.subr.bf16.mxu1 %v5678_v12  ;;  %2390 = vmatprep.subr.bf16.mxu0 %v5683_v1  ;;  %v5702_v12 = vld [vmem:[#allocation3 + $0x338] sm:$0xff]  ;;  %7778 = vst [vmem:[#allocation116_spill] sm:$0xff] %v5705_v10  ;;  %7779 = vst [vmem:[#allocation117_spill] sm:$0xff] %v5707_v9  ;;  %v5711_v1 = vld [vmem:[#allocation3 + $0x330] sm:$0xff] }
 0x272   :  { %7777 = vst [vmem:[#allocation115_spill] sm:$0xff] %v5702_v12  ;;  %7780 = vst [vmem:[#allocation118_spill] sm:$0xff] %v5711_v1 }
 0x274   :  { %2432 = vmatpush1.bf16.msra.mxu1 %v5687_v4  ;;  %2391 = vmatpush1.bf16.msra.mxu0 %v5693_v8  ;;  %v5717_v4 = vld [vmem:[#allocation3 + $0x320] sm:$0xff]  ;;  %v5719_v8 = vld [vmem:[#allocation3 + $0x368] sm:$0xff] }
 0x275   :  { %2433 = vmatprep.subr.bf16.mxu1 %v5690_v11  ;;  %2392 = vmatprep.subr.bf16.mxu0 %v5695_v3  ;;  %v5714_v11 = vld [vmem:[#allocation3 + $0x378] sm:$0xff]  ;;  %7782 = vst [vmem:[#allocation120_spill] sm:$0xff] %v5717_v4  ;;  %7783 = vst [vmem:[#allocation121_spill] sm:$0xff] %v5719_v8  ;;  %v5723_v3 = vld [vmem:[#allocation3 + $0x370] sm:$0xff] }
 0x276   :  { %7781 = vst [vmem:[#allocation119_spill] sm:$0xff] %v5714_v11 }
 0x278   :  { %2434 = vmatpush1.bf16.msra.mxu1 %v5699_v0  ;;  %2393 = vmatpush1.bf16.msra.mxu0 %v5705_v10  ;;  %v5729_v0 = vld [vmem:[#allocation3 + $0x360] sm:$0xff]  ;;  %v5731_v10 = vld [vmem:[#allocation3 + $0x3a8] sm:$0xff] }
 0x279   :  { %2435 = vmatprep.subr.bf16.mxu1 %v5702_v12  ;;  %2394 = vmatprep.subr.bf16.mxu0 %v5707_v9  ;;  %v5726_v12 = vld [vmem:[#allocation3 + $0x3b8] sm:$0xff]  ;;  %v5735_v9 = vld [vmem:[#allocation3 + $0x3b0] sm:$0xff] }
 0x27a   :  { %7784 = vst [vmem:[#allocation122_spill] sm:$0xff] %v5726_v12 }
 0x27c   :  { %2436 = vmatpush1.bf16.msra.mxu1 %v5711_v1  ;;  %2395 = vmatpush1.bf16.msra.mxu0 %v5717_v4  ;;  %v5741_v1 = vld [vmem:[#allocation3 + $0x3a0] sm:$0xff]  ;;  %v5743_v4 = vld [vmem:[#allocation3 + $0x3e8] sm:$0xff] }
 0x27d   :  { %2437 = vmatprep.subr.bf16.mxu1 %v5714_v11  ;;  %2396 = vmatprep.subr.bf16.mxu0 %v5719_v8  ;;  %v5738_v11 = vld [vmem:[#allocation3 + $0x3f8] sm:$0xff]  ;;  %v5747_v8 = vld [vmem:[#allocation3 + $0x3f0] sm:$0xff] }
 0x280   :  { %2438 = vmatpush1.bf16.msra.mxu1 %v5723_v3  ;;  %2397 = vmatpush1.bf16.msra.mxu0 %v5729_v0 }
 0x281   :  { %2439 = vmatprep.subr.bf16.mxu1 %v5726_v12  ;;  %2398 = vmatprep.subr.bf16.mxu0 %v5731_v10  ;;  %v5751_v12 = vld [vmem:[#allocation3 + $0x3e0] sm:$0xff] }
 0x284   :  { %2440 = vmatpush1.bf16.msra.mxu1 %v5735_v9  ;;  %2399 = vmatpush1.bf16.msra.mxu0 %v5741_v1 }
 0x285   :  { %2441 = vmatprep.subr.bf16.mxu1 %v5738_v11  ;;  %2400 = vmatprep.subr.bf16.mxu0 %v5743_v4 }
 0x288   :  { %2442 = vmatpush1.bf16.msra.mxu1 %v5747_v8  ;;  %2401 = vmatpush1.bf16.msra.mxu0 %v5751_v12 }
 0x289   :  { %2547 = vmatprep.subr.bf16.mxu1 %v5367_v29  ;;  %2506 = vmatprep.subr.bf16.mxu0 %v5374_v32 }
 0x28b   :  { %2444 = vmatmul.mubr.bf16.vlgmr.msra.gmra.mrb[12].mxu1 %v7734_v2  ;;  %2403 = vmatmul.mubr.bf16.vlgmr.msra.gmra.mrb[12].mxu0 %v7734_v2  ;;  %v7785_v2 = vld [vmem:[#allocation58_spill] sm:$0xff] }
 0x28c   :  { %2548 = vmatpush1.bf16.msra.mxu1 %v5369_v30  ;;  %2507 = vmatpush1.bf16.msra.mxu0 %v5376_v33 }
 0x28d   :  { %2549 = vmatprep.subr.bf16.mxu1 %v5371_v31  ;;  %2508 = vmatprep.subr.bf16.mxu0 %v5380_v34 }
 0x290   :  { %2550 = vmatpush1.bf16.msra.mxu1 %v5383_v35  ;;  %2509 = vmatpush1.bf16.msra.mxu0 %v5389_v25 }
 0x291   :  { %2551 = vmatprep.subr.bf16.mxu1 %v5386_v36  ;;  %2510 = vmatprep.subr.bf16.mxu0 %v5391_v37 }
 0x294   :  { %2552 = vmatpush1.bf16.msra.mxu1 %v5395_v38  ;;  %2511 = vmatpush1.bf16.msra.mxu0 %v5401_v52 }
 0x295   :  { %2553 = vmatprep.subr.bf16.mxu1 %v5398_v39  ;;  %2512 = vmatprep.subr.bf16.mxu0 %v5403_v40 }
 0x298   :  { %2554 = vmatpush1.bf16.msra.mxu1 %v5407_v41  ;;  %2513 = vmatpush1.bf16.msra.mxu0 %v5413_v43 }
 0x299   :  { %2555 = vmatprep.subr.bf16.mxu1 %v5410_v42  ;;  %2514 = vmatprep.subr.bf16.mxu0 %v5415_v44 }
 0x29c   :  { %2556 = vmatpush1.bf16.msra.mxu1 %v5419_v45  ;;  %2515 = vmatpush1.bf16.msra.mxu0 %v5425_v47 }
 0x29d   :  { %2557 = vmatprep.subr.bf16.mxu1 %v5422_v46  ;;  %2516 = vmatprep.subr.bf16.mxu0 %v5427_v48 }
 0x2a0   :  { %2558 = vmatpush1.bf16.msra.mxu1 %v5431_v49  ;;  %2517 = vmatpush1.bf16.msra.mxu0 %v5437_v51 }
 0x2a1   :  { %2559 = vmatprep.subr.bf16.mxu1 %v5434_v50  ;;  %2518 = vmatprep.subr.bf16.mxu0 %v5439_v53 }
 0x2a4   :  { %2560 = vmatpush1.bf16.msra.mxu1 %v5443_v54  ;;  %2519 = vmatpush1.bf16.msra.mxu0 %v5449_v56 }
 0x2a5   :  { %2561 = vmatprep.subr.bf16.mxu1 %v5446_v55  ;;  %2520 = vmatprep.subr.bf16.mxu0 %v5451_v57 }
 0x2a8   :  { %2562 = vmatpush1.bf16.msra.mxu1 %v5455_v58  ;;  %2521 = vmatpush1.bf16.msra.mxu0 %v5461_v61 }
 0x2a9   :  { %2563 = vmatprep.subr.bf16.mxu1 %v5458_v60  ;;  %2522 = vmatprep.subr.bf16.mxu0 %v5463_v62 }
 0x2ac   :  { %2564 = vmatpush1.bf16.msra.mxu1 %v5467_v63  ;;  %2523 = vmatpush1.bf16.msra.mxu0 %v5473_v17  ;;  %v2157_v17 = vld [vmem:[#allocation2 + $0x28] sm:$0x3] }
 0x2ad   :  { %2565 = vmatprep.subr.bf16.mxu1 %v5470_v16  ;;  %2524 = vmatprep.subr.bf16.mxu0 %v5475_v59 }
 0x2b0   :  { %2566 = vmatpush1.bf16.msra.mxu1 %v5479_v18  ;;  %2525 = vmatpush1.bf16.msra.mxu0 %v5485_v21  ;;  %v2152_v18 = vld [vmem:[#allocation2] sm:$0x3]  ;;  %v2153_v21 = vld [vmem:[#allocation2 + $0x8] sm:$0x3] }
 0x2b1   :  { %2567 = vmatprep.subr.bf16.mxu1 %v5482_v19  ;;  %2526 = vmatprep.subr.bf16.mxu0 %v5487_v22  ;;  %v2154_v22 = vld [vmem:[#allocation2 + $0x10] sm:$0x3] }
 0x2b4   :  { %2568 = vmatpush1.bf16.msra.mxu1 %v5491_v23  ;;  %2527 = vmatpush1.bf16.msra.mxu0 %v5497_v26 }
 0x2b5   :  { %2569 = vmatprep.subr.bf16.mxu1 %v5494_v24  ;;  %2528 = vmatprep.subr.bf16.mxu0 %v5499_v27  ;;  %v7786_v24 = vld [vmem:[#allocation60_spill] sm:$0xff]  ;;  %v7787_v27 = vld [vmem:[#allocation59_spill] sm:$0xff] }
 0x2b8   :  { %2570 = vmatpush1.bf16.msra.mxu1 %v5503_v28  ;;  %2529 = vmatpush1.bf16.msra.mxu0 %v5509_v7  ;;  %v7788_v28 = vld [vmem:[#allocation61_spill] sm:$0xff]  ;;  %v7789_v7 = vld [vmem:[#allocation62_spill] sm:$0xff] }
 0x2b9   :  { %2571 = vmatprep.subr.bf16.mxu1 %v5506_v20  ;;  %2530 = vmatprep.subr.bf16.mxu0 %v5511_v15  ;;  %v7790_v20 = vld [vmem:[#allocation64_spill] sm:$0xff]  ;;  %v7791_v15 = vld [vmem:[#allocation63_spill] sm:$0xff] }
 0x2bc   :  { %2572 = vmatpush1.bf16.msra.mxu1 %v5515_v6  ;;  %2531 = vmatpush1.bf16.msra.mxu0 %v5521_v5  ;;  %v7792_v6 = vld [vmem:[#allocation65_spill] sm:$0xff]  ;;  %v7793_v5 = vld [vmem:[#allocation66_spill] sm:$0xff] }
 0x2bd   :  { %2573 = vmatprep.subr.bf16.mxu1 %v5518_v14  ;;  %2532 = vmatprep.subr.bf16.mxu0 %v5523_v13  ;;  %v7794_v14 = vld [vmem:[#allocation68_spill] sm:$0xff]  ;;  %v7795_v13 = vld [vmem:[#allocation67_spill] sm:$0xff] }
 0x2c0   :  { %2574 = vmatpush1.bf16.msra.mxu1 %v7785_v2  ;;  %2533 = vmatpush1.bf16.msra.mxu0 %v7786_v24  ;;  %v7796_v2 = vld [vmem:[#allocation69_spill] sm:$0xff] }
 0x2c1   :  { %2575 = vmatprep.subr.bf16.mxu1 %v7787_v27  ;;  %2534 = vmatprep.subr.bf16.mxu0 %v7788_v28 }
 0x2c4   :  { %2576 = vmatpush1.bf16.msra.mxu1 %v7789_v7  ;;  %2535 = vmatpush1.bf16.msra.mxu0 %v7790_v20 }
 0x2c5   :  { %2577 = vmatprep.subr.bf16.mxu1 %v7791_v15  ;;  %2536 = vmatprep.subr.bf16.mxu0 %v7792_v6  ;;  %v2155_v15 = vld [vmem:[#allocation2 + $0x18] sm:$0x3] }
 0x2c8   :  { %2578 = vmatpush1.bf16.msra.mxu1 %v7793_v5  ;;  %2537 = vmatpush1.bf16.msra.mxu0 %v7794_v14 }
 0x2c9   :  { %2629 = vmatprep.subr.bf16.mxu1 %v7795_v13  ;;  %2588 = vmatprep.subr.bf16.mxu0 %v7796_v2 }
 0x31e   :  { %v2363_v24 = vpop.f32.mrb[8].mxu1  ;;  %v2322_v23 = vpop.f32.mrb[8].mxu0 }
 0x31f   :  { %v2365_v27 = vpop.f32.mrb[9].mxu1  ;;  %v2324_v26 = vpop.f32.mrb[9].mxu0  ;;  %v2454_v6 = vadd.f32 %v2363_v24, %v2154_v22  ;;  %v2452_v16 = vadd.f32 %v2322_v23, %v2152_v18 }
 0x320   :  { %v2367_v28 = vpop.f32.mrb[10].mxu1  ;;  %v2326_v19 = vpop.f32.mrb[10].mxu0  ;;  %v2455_v5 = vadd.f32 %v2365_v27, %v2155_v15  ;;  %v2453_v14 = vadd.f32 %v2324_v26, %v2153_v21 }
 0x321   :  { %v2368_v7 = vpop.f32.mrb[11].mxu1  ;;  %v2327_v20 = vpop.f32.mrb[11].mxu0  ;;  %v2462_v59 = vmul.f32 0.5, %v2454_v6  ;;  %v2460_v63 = vmul.f32 0.5, %v2452_v16  ;;  %v2158_v28 = vld [vmem:[#allocation2 + $0x30] sm:$0x3] }
 0x322   :  { %v2463_v13 = vmul.f32 0.5, %v2455_v5  ;;  %v2461_v2 = vmul.f32 0.5, %v2453_v14  ;;  %v2159_v7 = vld [vmem:[#allocation2 + $0x38] sm:$0x3]  ;;  %v2156_v19 = vld [vmem:[#allocation2 + $0x20] sm:$0x3] }
 0x323   :  { %4709 = vtanh.f32 %v2462_v59 }
 0x324   :  { %4711 = vtanh.f32 %v2463_v13 }
 0x325   :  { %4713 = vtanh.f32 %v2460_v63 }
 0x326   :  { %4715 = vtanh.f32 %v2461_v2 }
 0x32d   :  { %v4710_v6 = vpop.eup %4709 }
 0x32e   :  { %v4712_v13 = vpop.eup %4711  ;;  %v2474_v2 = vmul.f32 0.5, %v4710_v6 }
 0x32f   :  { %v4714_v23 = vpop.eup %4713 }
 0x330   :  { %v4716_v27 = vpop.eup %4715 }
 0x35e   :  { %v2445_v20 = vpop.f32.mrb[12].mxu1  ;;  %v2404_v22 = vpop.f32.mrb[12].mxu0 }
 0x35f   :  { %v2458_v60 = vadd.f32 %v2445_v20, %v2158_v28  ;;  %v2447_v62 = vpop.f32.mrb[13].mxu1  ;;  %v2456_v18 = vadd.f32 %v2404_v22, %v2156_v19  ;;  %v2406_v21 = vpop.f32.mrb[13].mxu0  ;;  %v2475_v28 = vmul.f32 0.5, %v4712_v13  ;;  %v2472_v20 = vmul.f32 0.5, %v4714_v23 }
 0x360   :  { %v2459_v24 = vadd.f32 %v2447_v62, %v2159_v7  ;;  %v2449_v15 = vpop.f32.mrb[14].mxu1  ;;  %v2457_v14 = vadd.f32 %v2406_v21, %v2157_v17  ;;  %v2408_v16 = vpop.f32.mrb[14].mxu0  ;;  %v2473_v62 = vmul.f32 0.5, %v4716_v27  ;;  %v2480_v7 = vadd.f32 0.5, %v2474_v2 }
 0x361   :  { %4717 = vtanh.f32 %v2458_v60  ;;  %v2450_v5 = vpop.f32.mrb[15].mxu1  ;;  %v2464_v63 = vmul.f32 0.5, %v2456_v18  ;;  %v2409_v59 = vpop.f32.mrb[15].mxu0  ;;  %v2481_v19 = vadd.f32 0.5, %v2475_v28  ;;  %v2478_v22 = vadd.f32 0.5, %v2472_v20 }
 0x362   :  { %4719 = vtanh.f32 %v2459_v24  ;;  %v2465_v26 = vmul.f32 0.5, %v2457_v14  ;;  %v2479_v15 = vadd.f32 0.5, %v2473_v62  ;;  %v2486_v21 = vmul.f32 0.0, %v2480_v7 }
 0x363   :  { %4721 = vtanh.f32 %v2464_v63  ;;  %v2487_v24 = vmul.f32 0.0, %v2481_v19  ;;  %v7797_v19 = vld [vmem:[#allocation72_spill] sm:$0xff] }
 0x364   :  { %4723 = vtanh.f32 %v2465_v26 }
 0x36b   :  { %v4718_v60 = vpop.eup %4717 }
 0x36c   :  { %v4720_v17 = vpop.eup %4719  ;;  %v2488_v5 = vmul.f32 %v4718_v60, %v2478_v22  ;;  %v7798_v22 = vld [vmem:[#allocation70_spill] sm:$0xff]  ;;  %v7799_v60 = vld [vmem:[#allocation73_spill] sm:$0xff] }
 0x36d   :  { %v2489_v18 = vmul.f32 %v4720_v17, %v2479_v15  ;;  %v4722_v6 = vpop.eup %4721  ;;  %v7800_v15 = vld [vmem:[#allocation71_spill] sm:$0xff]  ;;  %v7801_v17 = vld [vmem:[#allocation76_spill] sm:$0xff] }
 0x36e   :  { %v5823_v16 = vadd.f32 %v2488_v5, %v2486_v21  ;;  %v4724_v13 = vpop.eup %4723  ;;  %v2476_v63 = vmul.f32 0.5, %v4722_v6  ;;  %v7802_v21 = vld [vmem:[#allocation74_spill] sm:$0xff]  ;;  %v7803_v5 = vld [vmem:[#allocation77_spill] sm:$0xff] }
 0x36f   :  { %v5825_v14 = vadd.f32 %v2489_v18, %v2487_v24  ;;  %v2477_v59 = vmul.f32 0.5, %v4724_v13  ;;  %v7804_v24 = vld [vmem:[#allocation75_spill] sm:$0xff]  ;;  %v7805_v18 = vld [vmem:[#allocation80_spill] sm:$0xff]  ;;  %v7806_v6 = vld [vmem:[#allocation78_spill] sm:$0xff] }
 0x370   :  { %4725 = vtanh.f32 %v5823_v16  ;;  %v2482_v23 = vadd.f32 0.5, %v2476_v63  ;;  %v7807_v13 = vld [vmem:[#allocation81_spill] sm:$0xff]  ;;  %v7808_v63 = vld [vmem:[#allocation79_spill] sm:$0xff] }
 0x371   :  { %4727 = vtanh.f32 %v5825_v14  ;;  %v2483_v26 = vadd.f32 0.5, %v2477_v59  ;;  %v7809_v59 = vld [vmem:[#allocation84_spill] sm:$0xff] }
 0x37a   :  { %v4726_v27 = vpop.eup %4725 }
 0x37b   :  { %v4728_v2 = vpop.eup %4727  ;;  %v2494_v28 = vmul.f32 %v4726_v27, %v2482_v23  ;;  %v7810_v23 = vld [vmem:[#allocation82_spill] sm:$0xff]  ;;  %v7812_v27 = vld [vmem:[#allocation83_spill] sm:$0xff] }
 0x37c   :  { %v2495_v20 = vmul.f32 %v4728_v2, %v2483_v26  ;;  %v7811_v26 = vld [vmem:[#allocation85_spill] sm:$0xff]  ;;  %v7813_v2 = vld [vmem:[#allocation88_spill] sm:$0xff] }
 0x37d   :  { %v5829_v7 = vpack.c.bf16 %v2494_v28, %v2494_v28  ;;  %v7814_v28 = vld [vmem:[#allocation86_spill] sm:$0xff] }
 0x37e   :  { %v2505_v62 = vpack.c.bf16 %v2495_v20, %v2495_v20  ;;  %v7815_v20 = vld [vmem:[#allocation89_spill] sm:$0xff] }
 0x380   :  { %2538 = vmatprep.mubr.bf16.mxu0 %v2505_v62  ;;  %2579 = vmatprep.mubr.bf16.mxu1 %v2505_v62 }
 0x381   :  { %2539 = vmatmul.mubr.bf16.vlgmr.msra.gmra.mrb[16].mxu0 %v5829_v7  ;;  %2580 = vmatmul.mubr.bf16.vlgmr.msra.gmra.mrb[16].mxu1 %v5829_v7 }
 0x382   :  { %2589 = vmatpush1.bf16.msra.mxu0 %v7797_v19  ;;  %2630 = vmatpush1.bf16.msra.mxu1 %v7798_v22 }
 0x383   :  { %2620 = vmatprep.mubr.bf16.mxu0 %v2505_v62  ;;  %2661 = vmatprep.mubr.bf16.mxu1 %v2505_v62  ;;  %v7816_v62 = vld [vmem:[#allocation87_spill] sm:$0xff] }
 0x384   :  { %2590 = vmatprep.subr.bf16.mxu0 %v7799_v60  ;;  %2631 = vmatprep.subr.bf16.mxu1 %v7800_v15  ;;  %v7817_v15 = vld [vmem:[#allocation92_spill] sm:$0xff] }
 0x386   :  { %2591 = vmatpush1.bf16.msra.mxu0 %v7801_v17  ;;  %2632 = vmatpush1.bf16.msra.mxu1 %v7802_v21 }
 0x387   :  { %2592 = vmatprep.subr.bf16.mxu0 %v7803_v5  ;;  %2633 = vmatprep.subr.bf16.mxu1 %v7804_v24 }
 0x38a   :  { %2593 = vmatpush1.bf16.msra.mxu0 %v7805_v18  ;;  %2634 = vmatpush1.bf16.msra.mxu1 %v7806_v6 }
 0x38b   :  { %2594 = vmatprep.subr.bf16.mxu0 %v7807_v13  ;;  %2635 = vmatprep.subr.bf16.mxu1 %v7808_v63  ;;  %v7818_v13 = vld [vmem:[#allocation90_spill] sm:$0xff]  ;;  %v7819_v63 = vld [vmem:[#allocation93_spill] sm:$0xff] }
 0x38e   :  { %2595 = vmatpush1.bf16.msra.mxu0 %v7809_v59  ;;  %2636 = vmatpush1.bf16.msra.mxu1 %v7810_v23  ;;  %v7820_v59 = vld [vmem:[#allocation91_spill] sm:$0xff]  ;;  %v7821_v23 = vld [vmem:[#allocation96_spill] sm:$0xff] }
 0x38f   :  { %2596 = vmatprep.subr.bf16.mxu0 %v7811_v26  ;;  %2637 = vmatprep.subr.bf16.mxu1 %v7812_v27  ;;  %v7822_v26 = vld [vmem:[#allocation94_spill] sm:$0xff]  ;;  %v7823_v27 = vld [vmem:[#allocation97_spill] sm:$0xff] }
 0x392   :  { %2597 = vmatpush1.bf16.msra.mxu0 %v7813_v2  ;;  %2638 = vmatpush1.bf16.msra.mxu1 %v7814_v28  ;;  %v7824_v2 = vld [vmem:[#allocation95_spill] sm:$0xff]  ;;  %v7825_v28 = vld [vmem:[#allocation100_spill] sm:$0xff] }
 0x393   :  { %2598 = vmatprep.subr.bf16.mxu0 %v7815_v20  ;;  %2639 = vmatprep.subr.bf16.mxu1 %v7816_v62  ;;  %v7826_v20 = vld [vmem:[#allocation98_spill] sm:$0xff]  ;;  %v7827_v62 = vld [vmem:[#allocation101_spill] sm:$0xff] }
 0x396   :  { %2599 = vmatpush1.bf16.msra.mxu0 %v7817_v15  ;;  %2640 = vmatpush1.bf16.msra.mxu1 %v7818_v13  ;;  %v7828_v15 = vld [vmem:[#allocation99_spill] sm:$0xff]  ;;  %v7829_v13 = vld [vmem:[#allocation104_spill] sm:$0xff] }
 0x397   :  { %2600 = vmatprep.subr.bf16.mxu0 %v7819_v63  ;;  %2641 = vmatprep.subr.bf16.mxu1 %v7820_v59  ;;  %v7830_v63 = vld [vmem:[#allocation102_spill] sm:$0xff]  ;;  %v7831_v59 = vld [vmem:[#allocation105_spill] sm:$0xff] }
 0x39a   :  { %2601 = vmatpush1.bf16.msra.mxu0 %v7821_v23  ;;  %2642 = vmatpush1.bf16.msra.mxu1 %v7822_v26  ;;  %v7832_v23 = vld [vmem:[#allocation103_spill] sm:$0xff]  ;;  %v7833_v26 = vld [vmem:[#allocation108_spill] sm:$0xff] }
 0x39b   :  { %2602 = vmatprep.subr.bf16.mxu0 %v7823_v27  ;;  %2643 = vmatprep.subr.bf16.mxu1 %v7824_v2  ;;  %v7834_v27 = vld [vmem:[#allocation106_spill] sm:$0xff]  ;;  %v7835_v2 = vld [vmem:[#allocation109_spill] sm:$0xff] }
 0x39e   :  { %2603 = vmatpush1.bf16.msra.mxu0 %v7825_v28  ;;  %2644 = vmatpush1.bf16.msra.mxu1 %v7826_v20  ;;  %v7836_v28 = vld [vmem:[#allocation107_spill] sm:$0xff]  ;;  %v7837_v20 = vld [vmem:[#allocation112_spill] sm:$0xff] }
 0x39f   :  { %2604 = vmatprep.subr.bf16.mxu0 %v7827_v62  ;;  %2645 = vmatprep.subr.bf16.mxu1 %v7828_v15  ;;  %v7838_v62 = vld [vmem:[#allocation110_spill] sm:$0xff]  ;;  %v7839_v15 = vld [vmem:[#allocation113_spill] sm:$0xff] }
 0x3a2   :  { %2605 = vmatpush1.bf16.msra.mxu0 %v7829_v13  ;;  %2646 = vmatpush1.bf16.msra.mxu1 %v7830_v63  ;;  %v7840_v13 = vld [vmem:[#allocation111_spill] sm:$0xff]  ;;  %v7841_v63 = vld [vmem:[#allocation116_spill] sm:$0xff] }
 0x3a3   :  { %2606 = vmatprep.subr.bf16.mxu0 %v7831_v59  ;;  %2647 = vmatprep.subr.bf16.mxu1 %v7832_v23  ;;  %v7842_v59 = vld [vmem:[#allocation114_spill] sm:$0xff]  ;;  %v7843_v23 = vld [vmem:[#allocation117_spill] sm:$0xff] }
 0x3a6   :  { %2607 = vmatpush1.bf16.msra.mxu0 %v7833_v26  ;;  %2648 = vmatpush1.bf16.msra.mxu1 %v7834_v27  ;;  %v7844_v26 = vld [vmem:[#allocation115_spill] sm:$0xff]  ;;  %v7845_v27 = vld [vmem:[#allocation120_spill] sm:$0xff] }
 0x3a7   :  { %2608 = vmatprep.subr.bf16.mxu0 %v7835_v2  ;;  %2649 = vmatprep.subr.bf16.mxu1 %v7836_v28  ;;  %v7846_v2 = vld [vmem:[#allocation118_spill] sm:$0xff]  ;;  %v7847_v28 = vld [vmem:[#allocation121_spill] sm:$0xff] }
 0x3aa   :  { %2609 = vmatpush1.bf16.msra.mxu0 %v7837_v20  ;;  %2650 = vmatpush1.bf16.msra.mxu1 %v7838_v62  ;;  %v7848_v20 = vld [vmem:[#allocation119_spill] sm:$0xff] }
 0x3ab   :  { %2610 = vmatprep.subr.bf16.mxu0 %v7839_v15  ;;  %2651 = vmatprep.subr.bf16.mxu1 %v7840_v13 }
 0x3ae   :  { %2611 = vmatpush1.bf16.msra.mxu0 %v7841_v63  ;;  %2652 = vmatpush1.bf16.msra.mxu1 %v7842_v59  ;;  %v7849_v63 = vld [vmem:[#allocation122_spill] sm:$0xff] }
 0x3af   :  { %2612 = vmatprep.subr.bf16.mxu0 %v7843_v23  ;;  %2653 = vmatprep.subr.bf16.mxu1 %v7844_v26 }
 0x3b2   :  { %2613 = vmatpush1.bf16.msra.mxu0 %v7845_v27  ;;  %2654 = vmatpush1.bf16.msra.mxu1 %v7846_v2 }
 0x3b3   :  { %2614 = vmatprep.subr.bf16.mxu0 %v7847_v28  ;;  %2655 = vmatprep.subr.bf16.mxu1 %v7848_v20 }
 0x3b6   :  { %2615 = vmatpush1.bf16.msra.mxu0 %v5729_v0  ;;  %2656 = vmatpush1.bf16.msra.mxu1 %v5723_v3 }
 0x3b7   :  { %2616 = vmatprep.subr.bf16.mxu0 %v5731_v10  ;;  %2657 = vmatprep.subr.bf16.mxu1 %v7849_v63 }
 0x3ba   :  { %2617 = vmatpush1.bf16.msra.mxu0 %v5741_v1  ;;  %2658 = vmatpush1.bf16.msra.mxu1 %v5735_v9 }
 0x3bb   :  { %2618 = vmatprep.subr.bf16.mxu0 %v5743_v4  ;;  %2659 = vmatprep.subr.bf16.mxu1 %v5738_v11 }
 0x3be   :  { %2619 = vmatpush1.bf16.msra.mxu0 %v5751_v12  ;;  %2660 = vmatpush1.bf16.msra.mxu1 %v5747_v8 }
 0x3bf   :  { %2760 = vmatprep.subr.bf16.mxu0 %v5374_v32  ;;  %2801 = vmatprep.subr.bf16.mxu1 %v5367_v29  ;;  %v7850_v29 = vld [vmem:[#allocation37_spill] sm:$0xff]  ;;  %v7853_v32 = vld [vmem:[#allocation38_spill] sm:$0xff] }
 0x3c1   :  { %2621 = vmatmul.mubr.bf16.vlgmr.msra.gmra.mrb[20].mxu0 %v5829_v7  ;;  %2662 = vmatmul.mubr.bf16.vlgmr.msra.gmra.mrb[20].mxu1 %v5829_v7  ;;  %v7882_v7 = vld [vmem:[#allocation69_spill] sm:$0xff] }
 0x3c2   :  { %2761 = vmatpush1.bf16.msra.mxu0 %v5376_v33  ;;  %2802 = vmatpush1.bf16.msra.mxu1 %v5369_v30  ;;  %v7851_v30 = vld [vmem:[#allocation36_spill] sm:$0xff]  ;;  %v7854_v33 = vld [vmem:[#allocation41_spill] sm:$0xff] }
 0x3c3   :  { %2762 = vmatprep.subr.bf16.mxu0 %v5380_v34  ;;  %2803 = vmatprep.subr.bf16.mxu1 %v5371_v31  ;;  %v7852_v31 = vld [vmem:[#allocation40_spill] sm:$0xff]  ;;  %v7855_v34 = vld [vmem:[#allocation39_spill] sm:$0xff] }
 0x3c6   :  { %2763 = vmatpush1.bf16.msra.mxu0 %v5389_v25  ;;  %2804 = vmatpush1.bf16.msra.mxu1 %v5383_v35  ;;  %v7856_v35 = vld [vmem:[#allocation44_spill] sm:$0xff]  ;;  %v7858_v25 = vld [vmem:[#allocation45_spill] sm:$0xff] }
 0x3c7   :  { %2764 = vmatprep.subr.bf16.mxu0 %v5391_v37  ;;  %2805 = vmatprep.subr.bf16.mxu1 %v5386_v36  ;;  %v7857_v36 = vld [vmem:[#allocation42_spill] sm:$0xff]  ;;  %v7859_v37 = vld [vmem:[#allocation43_spill] sm:$0xff] }
 0x3ca   :  { %2765 = vmatpush1.bf16.msra.mxu0 %v5401_v52  ;;  %2806 = vmatpush1.bf16.msra.mxu1 %v5395_v38  ;;  %v7860_v38 = vld [vmem:[#allocation48_spill] sm:$0xff]  ;;  %v7862_v52 = vld [vmem:[#allocation49_spill] sm:$0xff] }
 0x3cb   :  { %2766 = vmatprep.subr.bf16.mxu0 %v5403_v40  ;;  %2807 = vmatprep.subr.bf16.mxu1 %v5398_v39  ;;  %v7861_v39 = vld [vmem:[#allocation46_spill] sm:$0xff]  ;;  %v7863_v40 = vld [vmem:[#allocation47_spill] sm:$0xff] }
 0x3ce   :  { %2767 = vmatpush1.bf16.msra.mxu0 %v5413_v43  ;;  %2808 = vmatpush1.bf16.msra.mxu1 %v5407_v41  ;;  %v7864_v41 = vld [vmem:[#allocation52_spill] sm:$0xff]  ;;  %v7866_v43 = vld [vmem:[#allocation53_spill] sm:$0xff] }
 0x3cf   :  { %2768 = vmatprep.subr.bf16.mxu0 %v5415_v44  ;;  %2809 = vmatprep.subr.bf16.mxu1 %v5410_v42  ;;  %v7865_v42 = vld [vmem:[#allocation50_spill] sm:$0xff]  ;;  %v7867_v44 = vld [vmem:[#allocation51_spill] sm:$0xff] }
 0x3d2   :  { %2769 = vmatpush1.bf16.msra.mxu0 %v5425_v47  ;;  %2810 = vmatpush1.bf16.msra.mxu1 %v5419_v45  ;;  %v7868_v45 = vld [vmem:[#allocation56_spill] sm:$0xff]  ;;  %v7870_v47 = vld [vmem:[#allocation57_spill] sm:$0xff] }
 0x3d3   :  { %2770 = vmatprep.subr.bf16.mxu0 %v5427_v48  ;;  %2811 = vmatprep.subr.bf16.mxu1 %v5422_v46  ;;  %v7869_v46 = vld [vmem:[#allocation54_spill] sm:$0xff]  ;;  %v7871_v48 = vld [vmem:[#allocation55_spill] sm:$0xff] }
 0x3d6   :  { %2771 = vmatpush1.bf16.msra.mxu0 %v5437_v51  ;;  %2812 = vmatpush1.bf16.msra.mxu1 %v5431_v49  ;;  %v7872_v49 = vld [vmem:[#allocation60_spill] sm:$0xff]  ;;  %v7874_v51 = vld [vmem:[#allocation61_spill] sm:$0xff] }
 0x3d7   :  { %2772 = vmatprep.subr.bf16.mxu0 %v5439_v53  ;;  %2813 = vmatprep.subr.bf16.mxu1 %v5434_v50  ;;  %v7873_v50 = vld [vmem:[#allocation58_spill] sm:$0xff]  ;;  %v7875_v53 = vld [vmem:[#allocation59_spill] sm:$0xff] }
 0x3da   :  { %2773 = vmatpush1.bf16.msra.mxu0 %v5449_v56  ;;  %2814 = vmatpush1.bf16.msra.mxu1 %v5443_v54  ;;  %v7876_v54 = vld [vmem:[#allocation64_spill] sm:$0xff]  ;;  %v7878_v56 = vld [vmem:[#allocation65_spill] sm:$0xff] }
 0x3db   :  { %2774 = vmatprep.subr.bf16.mxu0 %v5451_v57  ;;  %2815 = vmatprep.subr.bf16.mxu1 %v5446_v55  ;;  %v7877_v55 = vld [vmem:[#allocation62_spill] sm:$0xff]  ;;  %v7879_v57 = vld [vmem:[#allocation63_spill] sm:$0xff] }
 0x3de   :  { %2775 = vmatpush1.bf16.msra.mxu0 %v5461_v61  ;;  %2816 = vmatpush1.bf16.msra.mxu1 %v5455_v58  ;;  %v7880_v58 = vld [vmem:[#allocation68_spill] sm:$0xff]  ;;  %v7881_v61 = vld [vmem:[#allocation66_spill] sm:$0xff] }
 0x3df   :  { %2776 = vmatprep.subr.bf16.mxu0 %v7850_v29  ;;  %2817 = vmatprep.subr.bf16.mxu1 %v7851_v30  ;;  %v7883_v29 = vld [vmem:[#allocation67_spill] sm:$0xff] }
 0x3e2   :  { %2777 = vmatpush1.bf16.msra.mxu0 %v7852_v31  ;;  %2818 = vmatpush1.bf16.msra.mxu1 %v7853_v32  ;;  %v2498_v31 = vld [vmem:[#allocation2 + $0x10] sm:$0xc] }
 0x3e3   :  { %2778 = vmatprep.subr.bf16.mxu0 %v7854_v33  ;;  %2819 = vmatprep.subr.bf16.mxu1 %v7855_v34 }
 0x3e6   :  { %2779 = vmatpush1.bf16.msra.mxu0 %v7856_v35  ;;  %2820 = vmatpush1.bf16.msra.mxu1 %v7857_v36  ;;  %v2499_v35 = vld [vmem:[#allocation2 + $0x18] sm:$0xc] }
 0x3e7   :  { %2780 = vmatprep.subr.bf16.mxu0 %v7858_v25  ;;  %2821 = vmatprep.subr.bf16.mxu1 %v7859_v37 }
 0x3ea   :  { %2781 = vmatpush1.bf16.msra.mxu0 %v7860_v38  ;;  %2822 = vmatpush1.bf16.msra.mxu1 %v7861_v39 }
 0x3eb   :  { %2782 = vmatprep.subr.bf16.mxu0 %v7862_v52  ;;  %2823 = vmatprep.subr.bf16.mxu1 %v7863_v40 }
 0x3ee   :  { %2783 = vmatpush1.bf16.msra.mxu0 %v7864_v41  ;;  %2824 = vmatpush1.bf16.msra.mxu1 %v7865_v42 }
 0x3ef   :  { %2784 = vmatprep.subr.bf16.mxu0 %v7866_v43  ;;  %2825 = vmatprep.subr.bf16.mxu1 %v7867_v44 }
 0x3f2   :  { %2785 = vmatpush1.bf16.msra.mxu0 %v7868_v45  ;;  %2826 = vmatpush1.bf16.msra.mxu1 %v7869_v46 }
 0x3f3   :  { %2786 = vmatprep.subr.bf16.mxu0 %v7870_v47  ;;  %2827 = vmatprep.subr.bf16.mxu1 %v7871_v48  ;;  %v2730_v48 = vrot.slane %v5823_v16, 6 }
 0x3f6   :  { %2787 = vmatpush1.bf16.msra.mxu0 %v7872_v49  ;;  %2828 = vmatpush1.bf16.msra.mxu1 %v7873_v50 }
 0x3f7   :  { %2788 = vmatprep.subr.bf16.mxu0 %v7874_v51  ;;  %2829 = vmatprep.subr.bf16.mxu1 %v7875_v53  ;;  %v2731_v53 = vrot.slane %v5825_v14, 6 }
 0x3fa   :  { %2789 = vmatpush1.bf16.msra.mxu0 %v7876_v54  ;;  %2830 = vmatpush1.bf16.msra.mxu1 %v7877_v55 }
 0x3fb   :  { %2790 = vmatprep.subr.bf16.mxu0 %v7878_v56  ;;  %2831 = vmatprep.subr.bf16.mxu1 %v7879_v57  ;;  %v2496_v56 = vld [vmem:[#allocation2] sm:$0xc] }
 0x3fe   :  { %2791 = vmatpush1.bf16.msra.mxu0 %v7880_v58  ;;  %2832 = vmatpush1.bf16.msra.mxu1 %v7881_v61  ;;  %v2497_v58 = vld [vmem:[#allocation2 + $0x8] sm:$0xc] }
 0x3ff   :  { %2842 = vmatprep.subr.bf16.mxu0 %v7882_v7  ;;  %2883 = vmatprep.subr.bf16.mxu1 %v7883_v29 }
 0x454   :  { %v2540_v30 = vpop.f32.mrb[16].mxu0  ;;  %v2581_v32 = vpop.f32.mrb[16].mxu1 }
 0x455   :  { %v2680_v33 = vrot.slane %v2581_v32, 6  ;;  %v2542_v34 = vpop.f32.mrb[17].mxu0  ;;  %v2583_v36 = vpop.f32.mrb[17].mxu1  ;;  %v2678_v55 = vrot.slane %v2540_v30, 6  ;;  %v2500_v32 = vld [vmem:[#allocation2 + $0x20] sm:$0xc] }
 0x456   :  { %v2681_v25 = vrot.slane %v2583_v36, 6  ;;  %v2544_v37 = vpop.f32.mrb[18].mxu0  ;;  %v2585_v38 = vpop.f32.mrb[18].mxu1  ;;  %v2679_v57 = vrot.slane %v2542_v34, 6 }
 0x457   :  { %v2696_v39 = vadd.f32 %v2680_v33, %v2498_v31  ;;  %v2545_v52 = vpop.f32.mrb[19].mxu0  ;;  %v2586_v40 = vpop.f32.mrb[19].mxu1  ;;  %v2694_v61 = vadd.f32 %v2678_v55, %v2496_v56  ;;  %v2503_v38 = vld [vmem:[#allocation2 + $0x38] sm:$0xc] }
 0x458   :  { %v2697_v41 = vadd.f32 %v2681_v25, %v2499_v35  ;;  %v2695_v7 = vadd.f32 %v2679_v57, %v2497_v58  ;;  %v2502_v35 = vld [vmem:[#allocation2 + $0x30] sm:$0xc] }
 0x459   :  { %v2704_v42 = vmul.f32 0.5, %v2696_v39  ;;  %v2702_v29 = vmul.f32 0.5, %v2694_v61  ;;  %v2501_v39 = vld [vmem:[#allocation2 + $0x28] sm:$0xc] }
 0x45a   :  { %v2705_v43 = vmul.f32 0.5, %v2697_v41  ;;  %v2703_v31 = vmul.f32 0.5, %v2695_v7 }
 0x45b   :  { %4729 = vtanh.f32 %v2704_v42 }
 0x45c   :  { %4731 = vtanh.f32 %v2705_v43 }
 0x45d   :  { %4733 = vtanh.f32 %v2702_v29 }
 0x45e   :  { %4735 = vtanh.f32 %v2703_v31 }
 0x465   :  { %v4730_v44 = vpop.eup %4729 }
 0x466   :  { %v2716_v45 = vmul.f32 0.5, %v4730_v44  ;;  %v4732_v46 = vpop.eup %4731 }
 0x467   :  { %v2717_v49 = vmul.f32 0.5, %v4732_v46 }
 0x468   :  { %v2722_v47 = vadd.f32 0.5, %v2716_v45 }
 0x469   :  { %v2723_v51 = vadd.f32 0.5, %v2717_v49 }
 0x46a   :  { %v2734_v50 = vmul.f32 %v2730_v48, %v2722_v47  ;;  %v4734_v47 = vpop.eup %4733 }
 0x46b   :  { %v2735_v54 = vmul.f32 %v2731_v53, %v2723_v51  ;;  %v4736_v48 = vpop.eup %4735  ;;  %v2714_v53 = vmul.f32 0.5, %v4734_v47  ;;  %v7899_v47 = vld [vmem:[#allocation94_spill] sm:$0xff] }
 0x46c   :  { %v2715_v55 = vmul.f32 0.5, %v4736_v48  ;;  %v7900_v48 = vld [vmem:[#allocation97_spill] sm:$0xff] }
 0x46d   :  { %v2720_v56 = vadd.f32 0.5, %v2714_v53  ;;  %v7903_v53 = vld [vmem:[#allocation98_spill] sm:$0xff] }
 0x46e   :  { %v2721_v58 = vadd.f32 0.5, %v2715_v55  ;;  %v7904_v55 = vld [vmem:[#allocation101_spill] sm:$0xff] }
 0x494   :  { %v2622_v33 = vpop.f32.mrb[20].mxu0  ;;  %v2663_v16 = vpop.f32.mrb[20].mxu1 }
 0x495   :  { %v2682_v36 = vrot.slane %v2622_v33, 6  ;;  %v2684_v25 = vrot.slane %v2663_v16, 6  ;;  %v2624_v37 = vpop.f32.mrb[21].mxu0  ;;  %v2665_v14 = vpop.f32.mrb[21].mxu1 }
 0x496   :  { %v2683_v30 = vrot.slane %v2624_v37, 6  ;;  %v2685_v52 = vrot.slane %v2665_v14, 6  ;;  %v2626_v34 = vpop.f32.mrb[22].mxu0  ;;  %v2667_v40 = vpop.f32.mrb[22].mxu1 }
 0x497   :  { %v2700_v41 = vadd.f32 %v2684_v25, %v2502_v35  ;;  %v2627_v42 = vpop.f32.mrb[23].mxu0  ;;  %v2668_v43 = vpop.f32.mrb[23].mxu1  ;;  %v2698_v44 = vadd.f32 %v2682_v36, %v2500_v32 }
 0x498   :  { %v2701_v45 = vadd.f32 %v2685_v52, %v2503_v38  ;;  %v2699_v46 = vadd.f32 %v2683_v30, %v2501_v39  ;;  %v7888_v42 = vld [vmem:[#allocation85_spill] sm:$0xff]  ;;  %v7895_v43 = vld [vmem:[#allocation90_spill] sm:$0xff] }
 0x499   :  { %4737 = vtanh.f32 %v2700_v41  ;;  %v2706_v49 = vmul.f32 0.5, %v2698_v44  ;;  %v7887_v41 = vld [vmem:[#allocation82_spill] sm:$0xff]  ;;  %v7896_v44 = vld [vmem:[#allocation93_spill] sm:$0xff] }
 0x49a   :  { %4739 = vtanh.f32 %v2701_v45  ;;  %v2707_v51 = vmul.f32 0.5, %v2699_v46  ;;  %v7897_v45 = vld [vmem:[#allocation91_spill] sm:$0xff]  ;;  %v7898_v46 = vld [vmem:[#allocation96_spill] sm:$0xff] }
 0x49b   :  { %4741 = vtanh.f32 %v2706_v49  ;;  %v7901_v49 = vld [vmem:[#allocation95_spill] sm:$0xff] }
 0x49c   :  { %4743 = vtanh.f32 %v2707_v51  ;;  %v7902_v51 = vld [vmem:[#allocation100_spill] sm:$0xff] }
 0x4a3   :  { %v4738_v57 = vpop.eup %4737 }
 0x4a4   :  { %v4740_v61 = vpop.eup %4739  ;;  %v2736_v7 = vmul.f32 %v4738_v57, %v2720_v56  ;;  %v7905_v56 = vld [vmem:[#allocation99_spill] sm:$0xff]  ;;  %v7906_v57 = vld [vmem:[#allocation104_spill] sm:$0xff] }
 0x4a5   :  { %v2737_v29 = vmul.f32 %v4740_v61, %v2721_v58  ;;  %v4742_v33 = vpop.eup %4741  ;;  %v7907_v58 = vld [vmem:[#allocation102_spill] sm:$0xff]  ;;  %v7908_v61 = vld [vmem:[#allocation105_spill] sm:$0xff] }
 0x4a6   :  { %v5965_v31 = vadd.f32 %v2736_v7, %v2734_v50  ;;  %v4744_v35 = vpop.eup %4743  ;;  %v2718_v16 = vmul.f32 0.5, %v4742_v33  ;;  %v7909_v7 = vld [vmem:[#allocation103_spill] sm:$0xff]  ;;  %v7911_v33 = vld [vmem:[#allocation106_spill] sm:$0xff] }
 0x4a7   :  { %v5967_v32 = vadd.f32 %v2737_v29, %v2735_v54  ;;  %v2719_v36 = vmul.f32 0.5, %v4744_v35  ;;  %v5978_v54 = vld [vmem:[#allocation3 + $0x78] sm:$0xff]  ;;  %v7910_v29 = vld [vmem:[#allocation108_spill] sm:$0xff]  ;;  %v7912_v35 = vld [vmem:[#allocation109_spill] sm:$0xff] }
 0x4a8   :  { %4745 = vtanh.f32 %v5965_v31  ;;  %v2724_v25 = vadd.f32 0.5, %v2718_v16  ;;  %v7913_v16 = vld [vmem:[#allocation107_spill] sm:$0xff] }
 0x4a9   :  { %4747 = vtanh.f32 %v5967_v32  ;;  %v2725_v38 = vadd.f32 0.5, %v2719_v36  ;;  %v7914_v36 = vld [vmem:[#allocation112_spill] sm:$0xff] }
 0x4b2   :  { %v4746_v37 = vpop.eup %4745 }
 0x4b3   :  { %v4748_v14 = vpop.eup %4747  ;;  %v2742_v39 = vmul.f32 %v4746_v37, %v2724_v25  ;;  %v7915_v25 = vld [vmem:[#allocation116_spill] sm:$0xff] }
 0x4b4   :  { %v2743_v30 = vmul.f32 %v4748_v14, %v2725_v38  ;;  %v6101_v37 = vld [vmem:[#allocation3 + $0x148] sm:$0xff]  ;;  %v6104_v38 = vld [vmem:[#allocation3 + $0x158] sm:$0xff]  ;;  %v6107_v14 = vld [vmem:[#allocation3 + $0x140] sm:$0xff] }
 0x4b5   :  { %v2752_v52 = vpack.c.bf16 %v2742_v39, %v2742_v39  ;;  %7922 = vst [vmem:[#allocation77_spill] sm:$0xff] %v6101_v37  ;;  %7923 = vst [vmem:[#allocation75_spill] sm:$0xff] %v6104_v38  ;;  %v6110_v39 = vld [vmem:[#allocation3 + $0x150] sm:$0xff] }
 0x4b6   :  { %v2753_v34 = vpack.c.bf16 %v2743_v30, %v2743_v30  ;;  %7924 = vst [vmem:[#allocation80_spill] sm:$0xff] %v6107_v14  ;;  %7925 = vst [vmem:[#allocation78_spill] sm:$0xff] %v6110_v39  ;;  %v6113_v30 = vld [vmem:[#allocation3 + $0x188] sm:$0xff] }
 0x4b7   :  { %v5971_v40 = vrot.slane %v2752_v52, 1  ;;  %7926 = vst [vmem:[#allocation110_spill] sm:$0xff] %v6113_v30  ;;  %v6116_v52 = vld [vmem:[#allocation3 + $0x198] sm:$0xff] }
 0x4b8   :  { %v2757_v50 = vrot.slane %v2753_v34, 1  ;;  %7927 = vst [vmem:[#allocation113_spill] sm:$0xff] %v6116_v52  ;;  %v6119_v34 = vld [vmem:[#allocation3 + $0x180] sm:$0xff] }
 0x4b9   :  { %7928 = vst [vmem:[#allocation111_spill] sm:$0xff] %v6119_v34 }
 0x4ba   :  { %2792 = vmatprep.mubr.bf16.mxu0 %v2757_v50  ;;  %2833 = vmatprep.mubr.bf16.mxu1 %v2757_v50 }
 0x4bb   :  { %2793 = vmatmul.mubr.bf16.vlgmr.msra.gmra.mrb[24].mxu0 %v5971_v40  ;;  %2834 = vmatmul.mubr.bf16.vlgmr.msra.gmra.mrb[24].mxu1 %v5971_v40 }
 0x4bc   :  { %2843 = vmatpush1.bf16.msra.mxu0 %v7797_v19  ;;  %2884 = vmatpush1.bf16.msra.mxu1 %v7798_v22  ;;  %v7884_v19 = vld [vmem:[#allocation81_spill] sm:$0xff]  ;;  %v7885_v22 = vld [vmem:[#allocation79_spill] sm:$0xff] }
 0x4bd   :  { %2874 = vmatprep.mubr.bf16.mxu0 %v2757_v50  ;;  %2915 = vmatprep.mubr.bf16.mxu1 %v2757_v50  ;;  %v6122_v50 = vld [vmem:[#allocation3 + $0x190] sm:$0xff] }
 0x4be   :  { %2844 = vmatprep.subr.bf16.mxu0 %v7799_v60  ;;  %2885 = vmatprep.subr.bf16.mxu1 %v5978_v54  ;;  %v7886_v60 = vld [vmem:[#allocation84_spill] sm:$0xff]  ;;  %7929 = vst [vmem:[#allocation114_spill] sm:$0xff] %v6122_v50 }
 0x4c0   :  { %2845 = vmatpush1.bf16.msra.mxu0 %v7801_v17  ;;  %2886 = vmatpush1.bf16.msra.mxu1 %v7802_v21  ;;  %v7889_v17 = vld [vmem:[#allocation83_spill] sm:$0xff]  ;;  %v7890_v21 = vld [vmem:[#allocation88_spill] sm:$0xff] }
 0x4c1   :  { %2846 = vmatprep.subr.bf16.mxu0 %v7803_v5  ;;  %2887 = vmatprep.subr.bf16.mxu1 %v7804_v24  ;;  %v7891_v5 = vld [vmem:[#allocation86_spill] sm:$0xff]  ;;  %v7892_v24 = vld [vmem:[#allocation89_spill] sm:$0xff] }
 0x4c4   :  { %2847 = vmatpush1.bf16.msra.mxu0 %v7805_v18  ;;  %2888 = vmatpush1.bf16.msra.mxu1 %v7806_v6  ;;  %v7893_v18 = vld [vmem:[#allocation87_spill] sm:$0xff]  ;;  %v7894_v6 = vld [vmem:[#allocation92_spill] sm:$0xff] }
 0x4c5   :  { %2848 = vmatprep.subr.bf16.mxu0 %v7884_v19  ;;  %2889 = vmatprep.subr.bf16.mxu1 %v7885_v22  ;;  %v6128_v19 = vld [vmem:[#allocation3 + $0x1d8] sm:$0xff]  ;;  %v6131_v22 = vld [vmem:[#allocation3 + $0x1c0] sm:$0xff] }
 0x4c6   :  { %7931 = vst [vmem:[#allocation115_spill] sm:$0xff] %v6128_v19  ;;  %7932 = vst [vmem:[#allocation120_spill] sm:$0xff] %v6131_v22 }
 0x4c8   :  { %2849 = vmatpush1.bf16.msra.mxu0 %v7886_v60  ;;  %2890 = vmatpush1.bf16.msra.mxu1 %v7887_v41  ;;  %v6134_v60 = vld [vmem:[#allocation3 + $0x1d0] sm:$0xff]  ;;  %v6137_v41 = vld [vmem:[#allocation3 + $0x208] sm:$0xff] }
 0x4c9   :  { %2850 = vmatprep.subr.bf16.mxu0 %v7888_v42  ;;  %2891 = vmatprep.subr.bf16.mxu1 %v7889_v17  ;;  %7933 = vst [vmem:[#allocation118_spill] sm:$0xff] %v6134_v60  ;;  %7934 = vst [vmem:[#allocation121_spill] sm:$0xff] %v6137_v41  ;;  %v6140_v42 = vld [vmem:[#allocation3 + $0x218] sm:$0xff]  ;;  %v6143_v17 = vld [vmem:[#allocation3 + $0x200] sm:$0xff] }
 0x4ca   :  { %7935 = vst [vmem:[#allocation119_spill] sm:$0xff] %v6140_v42  ;;  %7936 = vst [vmem:[#allocation122_spill] sm:$0xff] %v6143_v17 }
 0x4cc   :  { %2851 = vmatpush1.bf16.msra.mxu0 %v7890_v21  ;;  %2892 = vmatpush1.bf16.msra.mxu1 %v7891_v5  ;;  %v6146_v21 = vld [vmem:[#allocation3 + $0x210] sm:$0xff]  ;;  %v6149_v5 = vld [vmem:[#allocation3 + $0x248] sm:$0xff] }
 0x4cd   :  { %2852 = vmatprep.subr.bf16.mxu0 %v7892_v24  ;;  %2893 = vmatprep.subr.bf16.mxu1 %v7893_v18  ;;  %7937 = vst [vmem:[#allocation37_spill] sm:$0xff] %v6146_v21  ;;  %7938 = vst [vmem:[#allocation36_spill] sm:$0xff] %v6149_v5  ;;  %v6152_v24 = vld [vmem:[#allocation3 + $0x258] sm:$0xff]  ;;  %v6155_v18 = vld [vmem:[#allocation3 + $0x240] sm:$0xff] }
 0x4ce   :  { %7939 = vst [vmem:[#allocation40_spill] sm:$0xff] %v6152_v24  ;;  %7940 = vst [vmem:[#allocation38_spill] sm:$0xff] %v6155_v18 }
 0x4d0   :  { %2853 = vmatpush1.bf16.msra.mxu0 %v7894_v6  ;;  %2894 = vmatpush1.bf16.msra.mxu1 %v7895_v43  ;;  %v6158_v6 = vld [vmem:[#allocation3 + $0x250] sm:$0xff]  ;;  %v6161_v43 = vld [vmem:[#allocation3 + $0x288] sm:$0xff] }
 0x4d1   :  { %2854 = vmatprep.subr.bf16.mxu0 %v7896_v44  ;;  %2895 = vmatprep.subr.bf16.mxu1 %v7897_v45  ;;  %7941 = vst [vmem:[#allocation41_spill] sm:$0xff] %v6158_v6  ;;  %7942 = vst [vmem:[#allocation39_spill] sm:$0xff] %v6161_v43  ;;  %v6164_v44 = vld [vmem:[#allocation3 + $0x298] sm:$0xff]  ;;  %v6167_v45 = vld [vmem:[#allocation3 + $0x280] sm:$0xff] }
 0x4d2   :  { %7943 = vst [vmem:[#allocation44_spill] sm:$0xff] %v6164_v44  ;;  %7944 = vst [vmem:[#allocation42_spill] sm:$0xff] %v6167_v45 }
 0x4d4   :  { %2855 = vmatpush1.bf16.msra.mxu0 %v7898_v46  ;;  %2896 = vmatpush1.bf16.msra.mxu1 %v7899_v47  ;;  %v6170_v46 = vld [vmem:[#allocation3 + $0x290] sm:$0xff]  ;;  %v6173_v47 = vld [vmem:[#allocation3 + $0x2c8] sm:$0xff] }
 0x4d5   :  { %2856 = vmatprep.subr.bf16.mxu0 %v7900_v48  ;;  %2897 = vmatprep.subr.bf16.mxu1 %v7901_v49  ;;  %7945 = vst [vmem:[#allocation45_spill] sm:$0xff] %v6170_v46  ;;  %7946 = vst [vmem:[#allocation43_spill] sm:$0xff] %v6173_v47  ;;  %v6176_v48 = vld [vmem:[#allocation3 + $0x2d8] sm:$0xff]  ;;  %v6179_v49 = vld [vmem:[#allocation3 + $0x2c0] sm:$0xff] }
 0x4d6   :  { %7947 = vst [vmem:[#allocation48_spill] sm:$0xff] %v6176_v48  ;;  %7948 = vst [vmem:[#allocation46_spill] sm:$0xff] %v6179_v49 }
 0x4d8   :  { %2857 = vmatpush1.bf16.msra.mxu0 %v7902_v51  ;;  %2898 = vmatpush1.bf16.msra.mxu1 %v7903_v53  ;;  %v6182_v51 = vld [vmem:[#allocation3 + $0x2d0] sm:$0xff]  ;;  %v6185_v53 = vld [vmem:[#allocation3 + $0x308] sm:$0xff] }
 0x4d9   :  { %2858 = vmatprep.subr.bf16.mxu0 %v7904_v55  ;;  %2899 = vmatprep.subr.bf16.mxu1 %v7905_v56  ;;  %7949 = vst [vmem:[#allocation49_spill] sm:$0xff] %v6182_v51  ;;  %7950 = vst [vmem:[#allocation47_spill] sm:$0xff] %v6185_v53  ;;  %v6188_v55 = vld [vmem:[#allocation3 + $0x318] sm:$0xff]  ;;  %v6191_v56 = vld [vmem:[#allocation3 + $0x300] sm:$0xff] }
 0x4da   :  { %7951 = vst [vmem:[#allocation52_spill] sm:$0xff] %v6188_v55  ;;  %7952 = vst [vmem:[#allocation50_spill] sm:$0xff] %v6191_v56 }
 0x4dc   :  { %2859 = vmatpush1.bf16.msra.mxu0 %v7906_v57  ;;  %2900 = vmatpush1.bf16.msra.mxu1 %v7907_v58  ;;  %v6194_v57 = vld [vmem:[#allocation3 + $0x310] sm:$0xff]  ;;  %v6197_v58 = vld [vmem:[#allocation3 + $0x348] sm:$0xff] }
 0x4dd   :  { %2860 = vmatprep.subr.bf16.mxu0 %v7908_v61  ;;  %2901 = vmatprep.subr.bf16.mxu1 %v7909_v7  ;;  %7953 = vst [vmem:[#allocation53_spill] sm:$0xff] %v6194_v57  ;;  %7954 = vst [vmem:[#allocation51_spill] sm:$0xff] %v6197_v58  ;;  %v6200_v61 = vld [vmem:[#allocation3 + $0x358] sm:$0xff]  ;;  %v6203_v7 = vld [vmem:[#allocation3 + $0x340] sm:$0xff] }
 0x4de   :  { %7955 = vst [vmem:[#allocation56_spill] sm:$0xff] %v6200_v61  ;;  %7956 = vst [vmem:[#allocation54_spill] sm:$0xff] %v6203_v7 }
 0x4e0   :  { %2861 = vmatpush1.bf16.msra.mxu0 %v7910_v29  ;;  %2902 = vmatpush1.bf16.msra.mxu1 %v7911_v33  ;;  %v6206_v29 = vld [vmem:[#allocation3 + $0x350] sm:$0xff]  ;;  %v6209_v33 = vld [vmem:[#allocation3 + $0x388] sm:$0xff] }
 0x4e1   :  { %2862 = vmatprep.subr.bf16.mxu0 %v7912_v35  ;;  %2903 = vmatprep.subr.bf16.mxu1 %v7913_v16  ;;  %7957 = vst [vmem:[#allocation57_spill] sm:$0xff] %v6206_v29  ;;  %7958 = vst [vmem:[#allocation55_spill] sm:$0xff] %v6209_v33  ;;  %v6212_v35 = vld [vmem:[#allocation3 + $0x398] sm:$0xff]  ;;  %v6215_v16 = vld [vmem:[#allocation3 + $0x380] sm:$0xff] }
 0x4e2   :  { %7959 = vst [vmem:[#allocation60_spill] sm:$0xff] %v6212_v35  ;;  %7960 = vst [vmem:[#allocation58_spill] sm:$0xff] %v6215_v16 }
 0x4e4   :  { %2863 = vmatpush1.bf16.msra.mxu0 %v7914_v36  ;;  %2904 = vmatpush1.bf16.msra.mxu1 %v7838_v62  ;;  %v6095_v62 = vld [vmem:[#allocation3 + $0x100] sm:$0xff]  ;;  %v6218_v36 = vld [vmem:[#allocation3 + $0x390] sm:$0xff] }
 0x4e5   :  { %2864 = vmatprep.subr.bf16.mxu0 %v7839_v15  ;;  %2905 = vmatprep.subr.bf16.mxu1 %v7840_v13  ;;  %v6039_v13 = vld [vmem:[#allocation3 + $0x8] sm:$0xff]  ;;  %7920 = vst [vmem:[#allocation76_spill] sm:$0xff] %v6095_v62  ;;  %v6098_v15 = vld [vmem:[#allocation3 + $0x110] sm:$0xff]  ;;  %7961 = vst [vmem:[#allocation61_spill] sm:$0xff] %v6218_v36 }
 0x4e6   :  { %7921 = vst [vmem:[#allocation74_spill] sm:$0xff] %v6098_v15 }
 0x4e8   :  { %2865 = vmatpush1.bf16.msra.mxu0 %v7915_v25  ;;  %2906 = vmatpush1.bf16.msra.mxu1 %v7842_v59  ;;  %v6074_v59 = vld [vmem:[#allocation3 + $0x90] sm:$0xff]  ;;  %v6221_v25 = vld [vmem:[#allocation3 + $0x3c8] sm:$0xff] }
 0x4e9   :  { %2866 = vmatprep.subr.bf16.mxu0 %v7843_v23  ;;  %2907 = vmatprep.subr.bf16.mxu1 %v7844_v26  ;;  %v6077_v23 = vld [vmem:[#allocation3 + $0xc8] sm:$0xff]  ;;  %v6080_v26 = vld [vmem:[#allocation3 + $0xd8] sm:$0xff]  ;;  %7962 = vst [vmem:[#allocation59_spill] sm:$0xff] %v6221_v25 }
 0x4ec   :  { %2867 = vmatpush1.bf16.msra.mxu0 %v7845_v27  ;;  %2908 = vmatpush1.bf16.msra.mxu1 %v7846_v2  ;;  %v6083_v27 = vld [vmem:[#allocation3 + $0xc0] sm:$0xff]  ;;  %v6086_v2 = vld [vmem:[#allocation3 + $0xd0] sm:$0xff] }
 0x4ed   :  { %2868 = vmatprep.subr.bf16.mxu0 %v7847_v28  ;;  %2909 = vmatprep.subr.bf16.mxu1 %v7848_v20  ;;  %7916 = vst [vmem:[#allocation72_spill] sm:$0xff] %v6083_v27  ;;  %7917 = vst [vmem:[#allocation70_spill] sm:$0xff] %v6086_v2  ;;  %v6089_v28 = vld [vmem:[#allocation3 + $0x108] sm:$0xff]  ;;  %v6092_v20 = vld [vmem:[#allocation3 + $0x118] sm:$0xff] }
 0x4ee   :  { %7918 = vst [vmem:[#allocation73_spill] sm:$0xff] %v6089_v28  ;;  %7919 = vst [vmem:[#allocation71_spill] sm:$0xff] %v6092_v20 }
 0x4f0   :  { %2869 = vmatpush1.bf16.msra.mxu0 %v5729_v0  ;;  %2910 = vmatpush1.bf16.msra.mxu1 %v5723_v3  ;;  %v6042_v0 = vld [vmem:[#allocation3 + $0x18] sm:$0xff]  ;;  %v6050_v3 = vld [vmem:[#allocation3 + $0x10] sm:$0xff] }
 0x4f1   :  { %2870 = vmatprep.subr.bf16.mxu0 %v5731_v10  ;;  %2911 = vmatprep.subr.bf16.mxu1 %v7849_v63  ;;  %v6062_v10 = vld [vmem:[#allocation3 + $0x50] sm:$0xff]  ;;  %v6071_v63 = vld [vmem:[#allocation3 + $0x80] sm:$0xff] }
 0x4f4   :  { %2871 = vmatpush1.bf16.msra.mxu0 %v5741_v1  ;;  %2912 = vmatpush1.bf16.msra.mxu1 %v5735_v9  ;;  %v6047_v1 = vld [vmem:[#allocation3] sm:$0xff] }
 0x4f5   :  { %2872 = vmatprep.subr.bf16.mxu0 %v5743_v4  ;;  %2913 = vmatprep.subr.bf16.mxu1 %v5738_v11  ;;  %v6053_v4 = vld [vmem:[#allocation3 + $0x48] sm:$0xff]  ;;  %v6059_v9 = vld [vmem:[#allocation3 + $0x40] sm:$0xff] }
 0x4f6   :  { %v6065_v11 = vld [vmem:[#allocation3 + $0x88] sm:$0xff] }
 0x4f8   :  { %2873 = vmatpush1.bf16.msra.mxu0 %v5751_v12  ;;  %2914 = vmatpush1.bf16.msra.mxu1 %v5747_v8  ;;  %v6056_v8 = vld [vmem:[#allocation3 + $0x58] sm:$0xff] }
 0x4f9   :  { %3014 = vmatprep.subr.bf16.mxu0 %v6039_v13  ;;  %3055 = vmatprep.subr.bf16.mxu1 %v6042_v0  ;;  %v6068_v12 = vld [vmem:[#allocation3 + $0x98] sm:$0xff] }
 0x4fb   :  { %2875 = vmatmul.mubr.bf16.vlgmr.msra.gmra.mrb[28].mxu0 %v5971_v40  ;;  %2916 = vmatmul.mubr.bf16.vlgmr.msra.gmra.mrb[28].mxu1 %v5971_v40  ;;  %v6125_v40 = vld [vmem:[#allocation3 + $0x1c8] sm:$0xff] }
 0x4fc   :  { %3015 = vmatpush1.bf16.msra.mxu0 %v6047_v1  ;;  %3056 = vmatpush1.bf16.msra.mxu1 %v6050_v3  ;;  %7930 = vst [vmem:[#allocation117_spill] sm:$0xff] %v6125_v40 }
 0x4fd   :  { %3016 = vmatprep.subr.bf16.mxu0 %v6053_v4  ;;  %3057 = vmatprep.subr.bf16.mxu1 %v6056_v8 }
 0x500   :  { %3017 = vmatpush1.bf16.msra.mxu0 %v6059_v9  ;;  %3058 = vmatpush1.bf16.msra.mxu1 %v6062_v10 }
 0x501   :  { %3018 = vmatprep.subr.bf16.mxu0 %v6065_v11  ;;  %3059 = vmatprep.subr.bf16.mxu1 %v6068_v12 }
 0x504   :  { %3019 = vmatpush1.bf16.msra.mxu0 %v6071_v63  ;;  %3060 = vmatpush1.bf16.msra.mxu1 %v6074_v59 }
 0x505   :  { %3020 = vmatprep.subr.bf16.mxu0 %v6077_v23  ;;  %3061 = vmatprep.subr.bf16.mxu1 %v6080_v26 }
 0x508   :  { %3021 = vmatpush1.bf16.msra.mxu0 %v6083_v27  ;;  %3062 = vmatpush1.bf16.msra.mxu1 %v6086_v2 }
 0x509   :  { %3022 = vmatprep.subr.bf16.mxu0 %v6089_v28  ;;  %3063 = vmatprep.subr.bf16.mxu1 %v6092_v20 }
 0x50c   :  { %3023 = vmatpush1.bf16.msra.mxu0 %v6095_v62  ;;  %3064 = vmatpush1.bf16.msra.mxu1 %v6098_v15 }
 0x50d   :  { %3024 = vmatprep.subr.bf16.mxu0 %v6101_v37  ;;  %3065 = vmatprep.subr.bf16.mxu1 %v6104_v38 }
 0x510   :  { %3025 = vmatpush1.bf16.msra.mxu0 %v6107_v14  ;;  %3066 = vmatpush1.bf16.msra.mxu1 %v6110_v39 }
 0x511   :  { %3026 = vmatprep.subr.bf16.mxu0 %v6113_v30  ;;  %3067 = vmatprep.subr.bf16.mxu1 %v6116_v52 }
 0x514   :  { %3027 = vmatpush1.bf16.msra.mxu0 %v6119_v34  ;;  %3068 = vmatpush1.bf16.msra.mxu1 %v6122_v50 }
 0x515   :  { %3028 = vmatprep.subr.bf16.mxu0 %v6125_v40  ;;  %3069 = vmatprep.subr.bf16.mxu1 %v6128_v19 }
 0x518   :  { %3029 = vmatpush1.bf16.msra.mxu0 %v6131_v22  ;;  %3070 = vmatpush1.bf16.msra.mxu1 %v6134_v60 }
 0x519   :  { %3030 = vmatprep.subr.bf16.mxu0 %v6137_v41  ;;  %3071 = vmatprep.subr.bf16.mxu1 %v6140_v42 }
 0x51c   :  { %3031 = vmatpush1.bf16.msra.mxu0 %v6143_v17  ;;  %3072 = vmatpush1.bf16.msra.mxu1 %v6146_v21 }
 0x51d   :  { %3032 = vmatprep.subr.bf16.mxu0 %v6149_v5  ;;  %3073 = vmatprep.subr.bf16.mxu1 %v6152_v24 }
 0x520   :  { %3033 = vmatpush1.bf16.msra.mxu0 %v6155_v18  ;;  %3074 = vmatpush1.bf16.msra.mxu1 %v6158_v6 }
 0x521   :  { %3034 = vmatprep.subr.bf16.mxu0 %v6161_v43  ;;  %3075 = vmatprep.subr.bf16.mxu1 %v6164_v44 }
 0x524   :  { %3035 = vmatpush1.bf16.msra.mxu0 %v6167_v45  ;;  %3076 = vmatpush1.bf16.msra.mxu1 %v6170_v46 }
 0x525   :  { %3036 = vmatprep.subr.bf16.mxu0 %v6173_v47  ;;  %3077 = vmatprep.subr.bf16.mxu1 %v6176_v48 }
 0x528   :  { %3037 = vmatpush1.bf16.msra.mxu0 %v6179_v49  ;;  %3078 = vmatpush1.bf16.msra.mxu1 %v6182_v51 }
 0x529   :  { %3038 = vmatprep.subr.bf16.mxu0 %v6185_v53  ;;  %3079 = vmatprep.subr.bf16.mxu1 %v6188_v55 }
 0x52c   :  { %3039 = vmatpush1.bf16.msra.mxu0 %v6191_v56  ;;  %3080 = vmatpush1.bf16.msra.mxu1 %v6194_v57  ;;  %v2747_v57 = vld [vmem:[#allocation2 + $0x18] sm:$0x30] }
 0x52d   :  { %3040 = vmatprep.subr.bf16.mxu0 %v6197_v58  ;;  %3081 = vmatprep.subr.bf16.mxu1 %v6200_v61 }
 0x530   :  { %3041 = vmatpush1.bf16.msra.mxu0 %v6203_v7  ;;  %3082 = vmatpush1.bf16.msra.mxu1 %v6206_v29  ;;  %v6224_v29 = vld [vmem:[#allocation3 + $0x3d8] sm:$0xff]  ;;  %v2746_v7 = vld [vmem:[#allocation2 + $0x10] sm:$0x30] }
 0x531   :  { %3042 = vmatprep.subr.bf16.mxu0 %v6209_v33  ;;  %3083 = vmatprep.subr.bf16.mxu1 %v6212_v35  ;;  %7963 = vst [vmem:[#allocation64_spill] sm:$0xff] %v6224_v29  ;;  %v6227_v33 = vld [vmem:[#allocation3 + $0x3c0] sm:$0xff]  ;;  %v6230_v35 = vld [vmem:[#allocation3 + $0x3d0] sm:$0xff] }
 0x532   :  { %7964 = vst [vmem:[#allocation62_spill] sm:$0xff] %v6227_v33  ;;  %7965 = vst [vmem:[#allocation65_spill] sm:$0xff] %v6230_v35 }
 0x534   :  { %3043 = vmatpush1.bf16.msra.mxu0 %v6215_v16  ;;  %3084 = vmatpush1.bf16.msra.mxu1 %v6218_v36  ;;  %v6233_v16 = vld [vmem:[#allocation3 + $0x28] sm:$0xff]  ;;  %v6236_v36 = vld [vmem:[#allocation3 + $0x38] sm:$0xff] }
 0x535   :  { %3044 = vmatprep.subr.bf16.mxu0 %v6221_v25  ;;  %3085 = vmatprep.subr.bf16.mxu1 %v6224_v29  ;;  %7966 = vst [vmem:[#allocation63_spill] sm:$0xff] %v6233_v16  ;;  %7967 = vst [vmem:[#allocation68_spill] sm:$0xff] %v6236_v36 }
 0x538   :  { %3045 = vmatpush1.bf16.msra.mxu0 %v6227_v33  ;;  %3086 = vmatpush1.bf16.msra.mxu1 %v6230_v35 }
 0x539   :  { %3096 = vmatprep.subr.bf16.mxu0 %v6233_v16  ;;  %3137 = vmatprep.subr.bf16.mxu1 %v6236_v36 }
 0x58e   :  { %v2794_v25 = vpop.f32.mrb[24].mxu0  ;;  %v2835_v61 = vpop.f32.mrb[24].mxu1 }
 0x58f   :  { %v2934_v29 = vrot.slane %v2835_v61, 4  ;;  %v2796_v58 = vpop.f32.mrb[25].mxu0  ;;  %v2837_v56 = vpop.f32.mrb[25].mxu1  ;;  %v2984_v61 = vrot.slane %v5965_v31, 6 }
 0x590   :  { %v2935_v33 = vrot.slane %v2837_v56, 4  ;;  %v2798_v55 = vpop.f32.mrb[26].mxu0  ;;  %v2839_v53 = vpop.f32.mrb[26].mxu1  ;;  %v2932_v56 = vrot.slane %v2794_v25, 4 }
 0x591   :  { %v2950_v51 = vadd.f32 %v2934_v29, %v2746_v7  ;;  %v2799_v35 = vpop.f32.mrb[27].mxu0  ;;  %v2840_v49 = vpop.f32.mrb[27].mxu1  ;;  %v2985_v55 = vrot.slane %v5967_v32, 6  ;;  %v2744_v7 = vld [vmem:[#allocation2] sm:$0x30] }
 0x592   :  { %v2951_v48 = vadd.f32 %v2935_v33, %v2747_v57  ;;  %v2933_v49 = vrot.slane %v2796_v58, 4  ;;  %v2745_v57 = vld [vmem:[#allocation2 + $0x8] sm:$0x30]  ;;  %v2750_v35 = vld [vmem:[#allocation2 + $0x30] sm:$0x30] }
 0x593   :  { %v2958_v47 = vmul.f32 0.5, %v2950_v51  ;;  %v2948_v51 = vadd.f32 %v2932_v56, %v2744_v7 }
 0x594   :  { %v2959_v16 = vmul.f32 0.5, %v2951_v48  ;;  %v2949_v48 = vadd.f32 %v2933_v49, %v2745_v57 }
 0x595   :  { %4749 = vtanh.f32 %v2958_v47  ;;  %v2956_v47 = vmul.f32 0.5, %v2948_v51 }
 0x596   :  { %4751 = vtanh.f32 %v2959_v16  ;;  %v2957_v29 = vmul.f32 0.5, %v2949_v48  ;;  %v2751_v16 = vld [vmem:[#allocation2 + $0x38] sm:$0x30] }
 0x597   :  { %4753 = vtanh.f32 %v2956_v47 }
 0x598   :  { %4755 = vtanh.f32 %v2957_v29 }
 0x59f   :  { %v4750_v46 = vpop.eup %4749 }
 0x5a0   :  { %v2970_v36 = vmul.f32 0.5, %v4750_v46  ;;  %v4752_v45 = vpop.eup %4751  ;;  %v2748_v46 = vld [vmem:[#allocation2 + $0x20] sm:$0x30] }
 0x5a1   :  { %v2971_v43 = vmul.f32 0.5, %v4752_v45  ;;  %v4754_v48 = vpop.eup %4753 }
 0x5a2   :  { %v2976_v44 = vadd.f32 0.5, %v2970_v36  ;;  %v4756_v47 = vpop.eup %4755 }
 0x5a3   :  { %v2977_v18 = vadd.f32 0.5, %v2971_v43  ;;  %v2969_v24 = vmul.f32 0.5, %v4756_v47 }
 0x5a4   :  { %v2988_v6 = vmul.f32 %v2984_v61, %v2976_v44 }
 0x5a5   :  { %v2989_v53 = vmul.f32 %v2985_v55, %v2977_v18  ;;  %v2749_v18 = vld [vmem:[#allocation2 + $0x28] sm:$0x30] }
 0x5ce   :  { %v2876_v33 = vpop.f32.mrb[28].mxu0  ;;  %v2917_v31 = vpop.f32.mrb[28].mxu1 }
 0x5cf   :  { %v2936_v45 = vrot.slane %v2876_v33, 4  ;;  %v2938_v44 = vrot.slane %v2917_v31, 4  ;;  %v2878_v43 = vpop.f32.mrb[29].mxu0  ;;  %v2919_v32 = vpop.f32.mrb[29].mxu1  ;;  %v2968_v31 = vmul.f32 0.5, %v4754_v48 }
 0x5d0   :  { %v2937_v36 = vrot.slane %v2878_v43, 4  ;;  %v2939_v25 = vrot.slane %v2919_v32, 4  ;;  %v2880_v58 = vpop.f32.mrb[30].mxu0  ;;  %v2921_v61 = vpop.f32.mrb[30].mxu1 }
 0x5d1   :  { %v2954_v55 = vadd.f32 %v2938_v44, %v2750_v35  ;;  %v2881_v56 = vpop.f32.mrb[31].mxu0  ;;  %v2922_v7 = vpop.f32.mrb[31].mxu1  ;;  %v2952_v49 = vadd.f32 %v2936_v45, %v2748_v46  ;;  %v2974_v43 = vadd.f32 0.5, %v2968_v31  ;;  %v2975_v58 = vadd.f32 0.5, %v2969_v24  ;;  %v6261_v31 = vld [vmem:[#allocation3 + $0x60] sm:$0xff] }
 0x5d2   :  { %v2955_v57 = vadd.f32 %v2939_v25, %v2751_v16  ;;  %v2953_v51 = vadd.f32 %v2937_v36, %v2749_v18 }
 0x5d3   :  { %4757 = vtanh.f32 %v2954_v55  ;;  %v2960_v29 = vmul.f32 0.5, %v2952_v49 }
 0x5d4   :  { %4759 = vtanh.f32 %v2955_v57  ;;  %v2961_v33 = vmul.f32 0.5, %v2953_v51 }
 0x5d5   :  { %4761 = vtanh.f32 %v2960_v29  ;;  %v6254_v29 = vld [vmem:[#allocation3 + $0x30] sm:$0xff] }
 0x5d6   :  { %4763 = vtanh.f32 %v2961_v33  ;;  %v6257_v33 = vld [vmem:[#allocation3 + $0x68] sm:$0xff] }
 0x5dd   :  { %v4758_v32 = vpop.eup %4757 }
 0x5de   :  { %v4760_v61 = vpop.eup %4759  ;;  %v2990_v35 = vmul.f32 %v4758_v32, %v2974_v43  ;;  %v6264_v43 = vld [vmem:[#allocation3 + $0x70] sm:$0xff]  ;;  %v6267_v32 = vld [vmem:[#allocation3 + $0xa8] sm:$0xff] }
 0x5df   :  { %v2991_v44 = vmul.f32 %v4760_v61, %v2975_v58  ;;  %v4762_v45 = vpop.eup %4761  ;;  %v6270_v58 = vld [vmem:[#allocation3 + $0xb8] sm:$0xff]  ;;  %v6273_v61 = vld [vmem:[#allocation3 + $0xa0] sm:$0xff] }
 0x5e0   :  { %v6241_v56 = vadd.f32 %v2990_v35, %v2988_v6  ;;  %v4764_v16 = vpop.eup %4763  ;;  %v2972_v18 = vmul.f32 0.5, %v4762_v45  ;;  %v6276_v35 = vld [vmem:[#allocation3 + $0xb0] sm:$0xff]  ;;  %v6282_v45 = vld [vmem:[#allocation3 + $0xf8] sm:$0xff] }
 0x5e1   :  { %v6243_v46 = vadd.f32 %v2991_v44, %v2989_v53  ;;  %v2973_v36 = vmul.f32 0.5, %v4764_v16  ;;  %v6251_v53 = vld [vmem:[#allocation3 + $0x20] sm:$0xff]  ;;  %v6279_v44 = vld [vmem:[#allocation3 + $0xe8] sm:$0xff] }
 0x5e2   :  { %4765 = vtanh.f32 %v6241_v56  ;;  %v2978_v25 = vadd.f32 0.5, %v2972_v18  ;;  %v6285_v16 = vld [vmem:[#allocation3 + $0xe0] sm:$0xff]  ;;  %v6288_v18 = vld [vmem:[#allocation3 + $0xf0] sm:$0xff] }
 0x5e3   :  { %4767 = vtanh.f32 %v6243_v46  ;;  %v2979_v7 = vadd.f32 0.5, %v2973_v36  ;;  %v6291_v36 = vld [vmem:[#allocation3 + $0x128] sm:$0xff] }
 0x5ec   :  { %v4766_v55 = vpop.eup %4765 }
 0x5ed   :  { %v4768_v49 = vpop.eup %4767  ;;  %v2996_v24 = vmul.f32 %v4766_v55, %v2978_v25  ;;  %v6294_v25 = vld [vmem:[#allocation3 + $0x138] sm:$0xff]  ;;  %v6297_v55 = vld [vmem:[#allocation3 + $0x120] sm:$0xff] }
 0x5ee   :  { %v2997_v57 = vmul.f32 %v4768_v49, %v2979_v7  ;;  %v6300_v7 = vld [vmem:[#allocation3 + $0x130] sm:$0xff]  ;;  %v6303_v49 = vld [vmem:[#allocation3 + $0x168] sm:$0xff] }
 0x5ef   :  { %v3006_v51 = vpack.c.bf16 %v2996_v24, %v2996_v24  ;;  %7968 = vst [vmem:[#allocation66_spill] sm:$0xff] %v6303_v49  ;;  %v6306_v24 = vld [vmem:[#allocation3 + $0x178] sm:$0xff] }
 0x5f0   :  { %v3007_v48 = vpack.c.bf16 %v2997_v57, %v2997_v57  ;;  %7969 = vst [vmem:[#allocation69_spill] sm:$0xff] %v6306_v24  ;;  %v6309_v57 = vld [vmem:[#allocation3 + $0x160] sm:$0xff] }
 0x5f1   :  { %v6247_v47 = vrot.slane %v3006_v51, 2  ;;  %7970 = vst [vmem:[#allocation67_spill] sm:$0xff] %v6309_v57  ;;  %v6312_v51 = vld [vmem:[#allocation3 + $0x170] sm:$0xff] }
 0x5f2   :  { %v3011_v6 = vrot.slane %v3007_v48, 2  ;;  %7971 = vst [vmem:[#allocation81_spill] sm:$0xff] %v6312_v51  ;;  %v6315_v48 = vld [vmem:[#allocation3 + $0x1a8] sm:$0xff] }
 0x5f3   :  { %7972 = vst [vmem:[#allocation79_spill] sm:$0xff] %v6315_v48 }
 0x5f4   :  { %3046 = vmatprep.mubr.bf16.mxu0 %v3011_v6  ;;  %3087 = vmatprep.mubr.bf16.mxu1 %v3011_v6 }
 0x5f5   :  { %3047 = vmatmul.mubr.bf16.vlgmr.msra.gmra.mrb[32].mxu0 %v6247_v47  ;;  %3088 = vmatmul.mubr.bf16.vlgmr.msra.gmra.mrb[32].mxu1 %v6247_v47 }
 0x5f6   :  { %3097 = vmatpush1.bf16.msra.mxu0 %v6251_v53  ;;  %3138 = vmatpush1.bf16.msra.mxu1 %v6254_v29 }
 0x5f7   :  { %3128 = vmatprep.mubr.bf16.mxu0 %v3011_v6  ;;  %3169 = vmatprep.mubr.bf16.mxu1 %v3011_v6  ;;  %v6318_v6 = vld [vmem:[#allocation3 + $0x1b8] sm:$0xff] }
 0x5f8   :  { %3098 = vmatprep.subr.bf16.mxu0 %v6257_v33  ;;  %3139 = vmatprep.subr.bf16.mxu1 %v5978_v54  ;;  %7973 = vst [vmem:[#allocation84_spill] sm:$0xff] %v6318_v6 }
 0x5fa   :  { %3099 = vmatpush1.bf16.msra.mxu0 %v6261_v31  ;;  %3140 = vmatpush1.bf16.msra.mxu1 %v6264_v43 }
 0x5fb   :  { %3100 = vmatprep.subr.bf16.mxu0 %v6267_v32  ;;  %3141 = vmatprep.subr.bf16.mxu1 %v6270_v58 }
 0x5fe   :  { %3101 = vmatpush1.bf16.msra.mxu0 %v6273_v61  ;;  %3142 = vmatpush1.bf16.msra.mxu1 %v6276_v35 }
 0x5ff   :  { %3102 = vmatprep.subr.bf16.mxu0 %v6279_v44  ;;  %3143 = vmatprep.subr.bf16.mxu1 %v6282_v45 }
 0x602   :  { %3103 = vmatpush1.bf16.msra.mxu0 %v6285_v16  ;;  %3144 = vmatpush1.bf16.msra.mxu1 %v6288_v18 }
 0x603   :  { %3104 = vmatprep.subr.bf16.mxu0 %v6291_v36  ;;  %3145 = vmatprep.subr.bf16.mxu1 %v6294_v25 }
 0x606   :  { %3105 = vmatpush1.bf16.msra.mxu0 %v6297_v55  ;;  %3146 = vmatpush1.bf16.msra.mxu1 %v6300_v7 }
 0x607   :  { %3106 = vmatprep.subr.bf16.mxu0 %v6303_v49  ;;  %3147 = vmatprep.subr.bf16.mxu1 %v6306_v24  ;;  %v6321_v49 = vld [vmem:[#allocation3 + $0x1a0] sm:$0xff]  ;;  %v6324_v24 = vld [vmem:[#allocation3 + $0x1b0] sm:$0xff] }
 0x608   :  { %7974 = vst [vmem:[#allocation82_spill] sm:$0xff] %v6321_v49  ;;  %7975 = vst [vmem:[#allocation85_spill] sm:$0xff] %v6324_v24 }
 0x60a   :  { %3107 = vmatpush1.bf16.msra.mxu0 %v6309_v57  ;;  %3148 = vmatpush1.bf16.msra.mxu1 %v6312_v51  ;;  %v6327_v57 = vld [vmem:[#allocation3 + $0x1e8] sm:$0xff]  ;;  %v6330_v51 = vld [vmem:[#allocation3 + $0x1f8] sm:$0xff] }
 0x60b   :  { %3108 = vmatprep.subr.bf16.mxu0 %v6315_v48  ;;  %3149 = vmatprep.subr.bf16.mxu1 %v6318_v6  ;;  %7976 = vst [vmem:[#allocation83_spill] sm:$0xff] %v6327_v57  ;;  %7977 = vst [vmem:[#allocation88_spill] sm:$0xff] %v6330_v51  ;;  %v6333_v48 = vld [vmem:[#allocation3 + $0x1e0] sm:$0xff]  ;;  %v6336_v6 = vld [vmem:[#allocation3 + $0x1f0] sm:$0xff] }
 0x60c   :  { %7978 = vst [vmem:[#allocation86_spill] sm:$0xff] %v6333_v48  ;;  %7979 = vst [vmem:[#allocation89_spill] sm:$0xff] %v6336_v6 }
 0x60e   :  { %3109 = vmatpush1.bf16.msra.mxu0 %v6321_v49  ;;  %3150 = vmatpush1.bf16.msra.mxu1 %v6324_v24  ;;  %v6339_v49 = vld [vmem:[#allocation3 + $0x228] sm:$0xff]  ;;  %v6342_v24 = vld [vmem:[#allocation3 + $0x238] sm:$0xff] }
 0x60f   :  { %3110 = vmatprep.subr.bf16.mxu0 %v6327_v57  ;;  %3151 = vmatprep.subr.bf16.mxu1 %v6330_v51  ;;  %7980 = vst [vmem:[#allocation87_spill] sm:$0xff] %v6339_v49  ;;  %7981 = vst [vmem:[#allocation92_spill] sm:$0xff] %v6342_v24  ;;  %v6345_v57 = vld [vmem:[#allocation3 + $0x220] sm:$0xff]  ;;  %v6348_v51 = vld [vmem:[#allocation3 + $0x230] sm:$0xff] }
 0x610   :  { %7982 = vst [vmem:[#allocation90_spill] sm:$0xff] %v6345_v57  ;;  %7983 = vst [vmem:[#allocation93_spill] sm:$0xff] %v6348_v51 }
 0x612   :  { %3111 = vmatpush1.bf16.msra.mxu0 %v6333_v48  ;;  %3152 = vmatpush1.bf16.msra.mxu1 %v6336_v6  ;;  %v6351_v48 = vld [vmem:[#allocation3 + $0x268] sm:$0xff]  ;;  %v6354_v6 = vld [vmem:[#allocation3 + $0x278] sm:$0xff] }
 0x613   :  { %3112 = vmatprep.subr.bf16.mxu0 %v6339_v49  ;;  %3153 = vmatprep.subr.bf16.mxu1 %v6342_v24  ;;  %7984 = vst [vmem:[#allocation91_spill] sm:$0xff] %v6351_v48  ;;  %7985 = vst [vmem:[#allocation96_spill] sm:$0xff] %v6354_v6  ;;  %v6357_v49 = vld [vmem:[#allocation3 + $0x260] sm:$0xff]  ;;  %v6360_v24 = vld [vmem:[#allocation3 + $0x270] sm:$0xff] }
 0x614   :  { %7986 = vst [vmem:[#allocation94_spill] sm:$0xff] %v6357_v49  ;;  %7987 = vst [vmem:[#allocation97_spill] sm:$0xff] %v6360_v24 }
 0x616   :  { %3113 = vmatpush1.bf16.msra.mxu0 %v6345_v57  ;;  %3154 = vmatpush1.bf16.msra.mxu1 %v6348_v51  ;;  %v6363_v57 = vld [vmem:[#allocation3 + $0x2a8] sm:$0xff]  ;;  %v6366_v51 = vld [vmem:[#allocation3 + $0x2b8] sm:$0xff] }
 0x617   :  { %3114 = vmatprep.subr.bf16.mxu0 %v6351_v48  ;;  %3155 = vmatprep.subr.bf16.mxu1 %v6354_v6  ;;  %7988 = vst [vmem:[#allocation95_spill] sm:$0xff] %v6363_v57  ;;  %7989 = vst [vmem:[#allocation100_spill] sm:$0xff] %v6366_v51  ;;  %v6369_v48 = vld [vmem:[#allocation3 + $0x2a0] sm:$0xff]  ;;  %v6372_v6 = vld [vmem:[#allocation3 + $0x2b0] sm:$0xff] }
 0x618   :  { %7990 = vst [vmem:[#allocation98_spill] sm:$0xff] %v6369_v48  ;;  %7991 = vst [vmem:[#allocation101_spill] sm:$0xff] %v6372_v6 }
 0x61a   :  { %3115 = vmatpush1.bf16.msra.mxu0 %v6357_v49  ;;  %3156 = vmatpush1.bf16.msra.mxu1 %v6360_v24  ;;  %v6375_v49 = vld [vmem:[#allocation3 + $0x2e8] sm:$0xff]  ;;  %v6378_v24 = vld [vmem:[#allocation3 + $0x2f8] sm:$0xff] }
 0x61b   :  { %3116 = vmatprep.subr.bf16.mxu0 %v6363_v57  ;;  %3157 = vmatprep.subr.bf16.mxu1 %v6366_v51  ;;  %7992 = vst [vmem:[#allocation99_spill] sm:$0xff] %v6375_v49  ;;  %7993 = vst [vmem:[#allocation104_spill] sm:$0xff] %v6378_v24  ;;  %v6381_v57 = vld [vmem:[#allocation3 + $0x2e0] sm:$0xff]  ;;  %v6384_v51 = vld [vmem:[#allocation3 + $0x2f0] sm:$0xff] }
 0x61c   :  { %7994 = vst [vmem:[#allocation102_spill] sm:$0xff] %v6381_v57  ;;  %7995 = vst [vmem:[#allocation105_spill] sm:$0xff] %v6384_v51 }
 0x61e   :  { %3117 = vmatpush1.bf16.msra.mxu0 %v6369_v48  ;;  %3158 = vmatpush1.bf16.msra.mxu1 %v6372_v6  ;;  %v6387_v48 = vld [vmem:[#allocation3 + $0x328] sm:$0xff]  ;;  %v6390_v6 = vld [vmem:[#allocation3 + $0x338] sm:$0xff] }
 0x61f   :  { %3118 = vmatprep.subr.bf16.mxu0 %v6375_v49  ;;  %3159 = vmatprep.subr.bf16.mxu1 %v6378_v24  ;;  %7996 = vst [vmem:[#allocation103_spill] sm:$0xff] %v6387_v48  ;;  %7997 = vst [vmem:[#allocation108_spill] sm:$0xff] %v6390_v6  ;;  %v6393_v49 = vld [vmem:[#allocation3 + $0x320] sm:$0xff]  ;;  %v6396_v24 = vld [vmem:[#allocation3 + $0x330] sm:$0xff] }
 0x620   :  { %7998 = vst [vmem:[#allocation106_spill] sm:$0xff] %v6393_v49  ;;  %7999 = vst [vmem:[#allocation109_spill] sm:$0xff] %v6396_v24 }
 0x622   :  { %3119 = vmatpush1.bf16.msra.mxu0 %v6381_v57  ;;  %3160 = vmatpush1.bf16.msra.mxu1 %v6384_v51  ;;  %v6399_v57 = vld [vmem:[#allocation3 + $0x368] sm:$0xff]  ;;  %v6402_v51 = vld [vmem:[#allocation3 + $0x378] sm:$0xff] }
 0x623   :  { %3120 = vmatprep.subr.bf16.mxu0 %v6387_v48  ;;  %3161 = vmatprep.subr.bf16.mxu1 %v6390_v6  ;;  %8000 = vst [vmem:[#allocation107_spill] sm:$0xff] %v6399_v57  ;;  %8001 = vst [vmem:[#allocation112_spill] sm:$0xff] %v6402_v51  ;;  %v6405_v48 = vld [vmem:[#allocation3 + $0x360] sm:$0xff]  ;;  %v6408_v6 = vld [vmem:[#allocation3 + $0x370] sm:$0xff] }
 0x624   :  { %8002 = vst [vmem:[#allocation116_spill] sm:$0xff] %v6405_v48  ;;  %8003 = vst [vmem:[#allocation123_spill] sm:$0xff] %v6408_v6 }
 0x626   :  { %3121 = vmatpush1.bf16.msra.mxu0 %v6393_v49  ;;  %3162 = vmatpush1.bf16.msra.mxu1 %v6396_v24  ;;  %v6411_v49 = vld [vmem:[#allocation3 + $0x3a8] sm:$0xff]  ;;  %v6414_v24 = vld [vmem:[#allocation3 + $0x3b8] sm:$0xff] }
 0x627   :  { %3122 = vmatprep.subr.bf16.mxu0 %v6399_v57  ;;  %3163 = vmatprep.subr.bf16.mxu1 %v6402_v51  ;;  %8004 = vst [vmem:[#allocation124_spill] sm:$0xff] %v6411_v49  ;;  %8005 = vst [vmem:[#allocation125_spill] sm:$0xff] %v6414_v24  ;;  %v6417_v57 = vld [vmem:[#allocation3 + $0x3a0] sm:$0xff]  ;;  %v6420_v51 = vld [vmem:[#allocation3 + $0x3b0] sm:$0xff] }
 0x628   :  { %8006 = vst [vmem:[#allocation126_spill] sm:$0xff] %v6417_v57  ;;  %8007 = vst [vmem:[#allocation127_spill] sm:$0xff] %v6420_v51 }
 0x62a   :  { %3123 = vmatpush1.bf16.msra.mxu0 %v6405_v48  ;;  %3164 = vmatpush1.bf16.msra.mxu1 %v6408_v6  ;;  %v6423_v48 = vld [vmem:[#allocation3 + $0x3e8] sm:$0xff]  ;;  %v6426_v6 = vld [vmem:[#allocation3 + $0x3f8] sm:$0xff] }
 0x62b   :  { %3124 = vmatprep.subr.bf16.mxu0 %v6411_v49  ;;  %3165 = vmatprep.subr.bf16.mxu1 %v6414_v24  ;;  %8008 = vst [vmem:[#allocation128_spill] sm:$0xff] %v6423_v48  ;;  %8009 = vst [vmem:[#allocation129_spill] sm:$0xff] %v6426_v6  ;;  %v6429_v49 = vld [vmem:[#allocation3 + $0x3e0] sm:$0xff]  ;;  %v6432_v24 = vld [vmem:[#allocation3 + $0x3f0] sm:$0xff] }
 0x62c   :  { %8010 = vst [vmem:[#allocation130_spill] sm:$0xff] %v6429_v49  ;;  %8011 = vst [vmem:[#allocation131_spill] sm:$0xff] %v6432_v24 }
 0x62e   :  { %3125 = vmatpush1.bf16.msra.mxu0 %v6417_v57  ;;  %3166 = vmatpush1.bf16.msra.mxu1 %v6420_v51 }
 0x62f   :  { %3126 = vmatprep.subr.bf16.mxu0 %v6423_v48  ;;  %3167 = vmatprep.subr.bf16.mxu1 %v6426_v6 }
 0x632   :  { %3127 = vmatpush1.bf16.msra.mxu0 %v6429_v49  ;;  %3168 = vmatpush1.bf16.msra.mxu1 %v6432_v24 }
 0x633   :  { %3268 = vmatprep.subr.bf16.mxu0 %v6039_v13  ;;  %3309 = vmatprep.subr.bf16.mxu1 %v6042_v0 }
 0x635   :  { %3129 = vmatmul.mubr.bf16.vlgmr.msra.gmra.mrb[36].mxu0 %v6247_v47  ;;  %3170 = vmatmul.mubr.bf16.vlgmr.msra.gmra.mrb[36].mxu1 %v6247_v47  ;;  %v8012_v47 = vld [vmem:[#allocation40_spill] sm:$0xff] }
 0x636   :  { %3269 = vmatpush1.bf16.msra.mxu0 %v6047_v1  ;;  %3310 = vmatpush1.bf16.msra.mxu1 %v6050_v3 }
 0x637   :  { %3270 = vmatprep.subr.bf16.mxu0 %v6053_v4  ;;  %3311 = vmatprep.subr.bf16.mxu1 %v6056_v8 }
 0x63a   :  { %3271 = vmatpush1.bf16.msra.mxu0 %v6059_v9  ;;  %3312 = vmatpush1.bf16.msra.mxu1 %v6062_v10 }
 0x63b   :  { %3272 = vmatprep.subr.bf16.mxu0 %v6065_v11  ;;  %3313 = vmatprep.subr.bf16.mxu1 %v6068_v12 }
 0x63e   :  { %3273 = vmatpush1.bf16.msra.mxu0 %v6071_v63  ;;  %3314 = vmatpush1.bf16.msra.mxu1 %v6074_v59 }
 0x63f   :  { %3274 = vmatprep.subr.bf16.mxu0 %v6077_v23  ;;  %3315 = vmatprep.subr.bf16.mxu1 %v6080_v26 }
 0x642   :  { %3275 = vmatpush1.bf16.msra.mxu0 %v6083_v27  ;;  %3316 = vmatpush1.bf16.msra.mxu1 %v6086_v2 }
 0x643   :  { %3276 = vmatprep.subr.bf16.mxu0 %v6089_v28  ;;  %3317 = vmatprep.subr.bf16.mxu1 %v6092_v20 }
 0x646   :  { %3277 = vmatpush1.bf16.msra.mxu0 %v6095_v62  ;;  %3318 = vmatpush1.bf16.msra.mxu1 %v6098_v15 }
 0x647   :  { %3278 = vmatprep.subr.bf16.mxu0 %v6101_v37  ;;  %3319 = vmatprep.subr.bf16.mxu1 %v6104_v38 }
 0x64a   :  { %3279 = vmatpush1.bf16.msra.mxu0 %v6107_v14  ;;  %3320 = vmatpush1.bf16.msra.mxu1 %v6110_v39 }
 0x64b   :  { %3280 = vmatprep.subr.bf16.mxu0 %v6113_v30  ;;  %3321 = vmatprep.subr.bf16.mxu1 %v6116_v52 }
 0x64e   :  { %3281 = vmatpush1.bf16.msra.mxu0 %v6119_v34  ;;  %3322 = vmatpush1.bf16.msra.mxu1 %v6122_v50  ;;  %v8013_v50 = vld [vmem:[#allocation38_spill] sm:$0xff] }
 0x64f   :  { %3282 = vmatprep.subr.bf16.mxu0 %v6125_v40  ;;  %3323 = vmatprep.subr.bf16.mxu1 %v6128_v19  ;;  %v8014_v40 = vld [vmem:[#allocation41_spill] sm:$0xff]  ;;  %v8015_v19 = vld [vmem:[#allocation39_spill] sm:$0xff] }
 0x652   :  { %3283 = vmatpush1.bf16.msra.mxu0 %v6131_v22  ;;  %3324 = vmatpush1.bf16.msra.mxu1 %v6134_v60  ;;  %v8016_v22 = vld [vmem:[#allocation44_spill] sm:$0xff]  ;;  %v8017_v60 = vld [vmem:[#allocation42_spill] sm:$0xff] }
 0x653   :  { %3284 = vmatprep.subr.bf16.mxu0 %v6137_v41  ;;  %3325 = vmatprep.subr.bf16.mxu1 %v6140_v42  ;;  %v8018_v41 = vld [vmem:[#allocation45_spill] sm:$0xff]  ;;  %v8019_v42 = vld [vmem:[#allocation43_spill] sm:$0xff] }
 0x656   :  { %3285 = vmatpush1.bf16.msra.mxu0 %v6143_v17  ;;  %3326 = vmatpush1.bf16.msra.mxu1 %v6146_v21  ;;  %v8020_v17 = vld [vmem:[#allocation48_spill] sm:$0xff]  ;;  %v8021_v21 = vld [vmem:[#allocation46_spill] sm:$0xff] }
 0x657   :  { %3286 = vmatprep.subr.bf16.mxu0 %v6149_v5  ;;  %3327 = vmatprep.subr.bf16.mxu1 %v8012_v47  ;;  %v8022_v5 = vld [vmem:[#allocation49_spill] sm:$0xff]  ;;  %v8023_v47 = vld [vmem:[#allocation47_spill] sm:$0xff] }
 0x65a   :  { %3287 = vmatpush1.bf16.msra.mxu0 %v8013_v50  ;;  %3328 = vmatpush1.bf16.msra.mxu1 %v8014_v40  ;;  %v8024_v50 = vld [vmem:[#allocation52_spill] sm:$0xff]  ;;  %v8025_v40 = vld [vmem:[#allocation50_spill] sm:$0xff] }
 0x65b   :  { %3288 = vmatprep.subr.bf16.mxu0 %v8015_v19  ;;  %3329 = vmatprep.subr.bf16.mxu1 %v8016_v22  ;;  %v8026_v19 = vld [vmem:[#allocation53_spill] sm:$0xff]  ;;  %v8027_v22 = vld [vmem:[#allocation51_spill] sm:$0xff] }
 0x65e   :  { %3289 = vmatpush1.bf16.msra.mxu0 %v8017_v60  ;;  %3330 = vmatpush1.bf16.msra.mxu1 %v8018_v41  ;;  %v8028_v60 = vld [vmem:[#allocation56_spill] sm:$0xff]  ;;  %v8029_v41 = vld [vmem:[#allocation54_spill] sm:$0xff] }
 0x65f   :  { %3290 = vmatprep.subr.bf16.mxu0 %v8019_v42  ;;  %3331 = vmatprep.subr.bf16.mxu1 %v8020_v17  ;;  %v8030_v42 = vld [vmem:[#allocation57_spill] sm:$0xff]  ;;  %v8031_v17 = vld [vmem:[#allocation55_spill] sm:$0xff] }
 0x662   :  { %3291 = vmatpush1.bf16.msra.mxu0 %v8021_v21  ;;  %3332 = vmatpush1.bf16.msra.mxu1 %v8022_v5  ;;  %v8032_v21 = vld [vmem:[#allocation60_spill] sm:$0xff]  ;;  %v8033_v5 = vld [vmem:[#allocation58_spill] sm:$0xff] }
 0x663   :  { %3292 = vmatprep.subr.bf16.mxu0 %v8023_v47  ;;  %3333 = vmatprep.subr.bf16.mxu1 %v8024_v50  ;;  %v8034_v47 = vld [vmem:[#allocation61_spill] sm:$0xff]  ;;  %v8035_v50 = vld [vmem:[#allocation59_spill] sm:$0xff] }
 0x666   :  { %3293 = vmatpush1.bf16.msra.mxu0 %v8025_v40  ;;  %3334 = vmatpush1.bf16.msra.mxu1 %v8026_v19  ;;  %v8036_v40 = vld [vmem:[#allocation64_spill] sm:$0xff]  ;;  %v8037_v19 = vld [vmem:[#allocation62_spill] sm:$0xff] }
 0x667   :  { %3294 = vmatprep.subr.bf16.mxu0 %v8027_v22  ;;  %3335 = vmatprep.subr.bf16.mxu1 %v8028_v60  ;;  %v8038_v22 = vld [vmem:[#allocation65_spill] sm:$0xff]  ;;  %v8039_v60 = vld [vmem:[#allocation63_spill] sm:$0xff] }
 0x66a   :  { %3295 = vmatpush1.bf16.msra.mxu0 %v8029_v41  ;;  %3336 = vmatpush1.bf16.msra.mxu1 %v8030_v42  ;;  %v8040_v41 = vld [vmem:[#allocation68_spill] sm:$0xff] }
 0x66b   :  { %3296 = vmatprep.subr.bf16.mxu0 %v8031_v17  ;;  %3337 = vmatprep.subr.bf16.mxu1 %v8032_v21  ;;  %v3000_v17 = vld [vmem:[#allocation2 + $0x10] sm:$0xc0] }
 0x66e   :  { %3297 = vmatpush1.bf16.msra.mxu0 %v8033_v5  ;;  %3338 = vmatpush1.bf16.msra.mxu1 %v8034_v47  ;;  %v3001_v5 = vld [vmem:[#allocation2 + $0x18] sm:$0xc0] }
 0x66f   :  { %3298 = vmatprep.subr.bf16.mxu0 %v8035_v50  ;;  %3339 = vmatprep.subr.bf16.mxu1 %v8036_v40 }
 0x672   :  { %3299 = vmatpush1.bf16.msra.mxu0 %v8037_v19  ;;  %3340 = vmatpush1.bf16.msra.mxu1 %v8038_v22 }
 0x673   :  { %3350 = vmatprep.subr.bf16.mxu0 %v8039_v60  ;;  %3391 = vmatprep.subr.bf16.mxu1 %v8040_v41 }
 0x6c8   :  { %v3048_v42 = vpop.f32.mrb[32].mxu0  ;;  %v3089_v34 = vpop.f32.mrb[32].mxu1 }
 0x6c9   :  { %v3188_v21 = vrot.slane %v3089_v34, 2  ;;  %v3050_v52 = vpop.f32.mrb[33].mxu0  ;;  %v3091_v30 = vpop.f32.mrb[33].mxu1  ;;  %v3238_v34 = vrot.slane %v6241_v56, 6  ;;  %v3005_v56 = vld [vmem:[#allocation2 + $0x38] sm:$0xc0] }
 0x6ca   :  { %v3189_v47 = vrot.slane %v3091_v30, 2  ;;  %v3052_v39 = vpop.f32.mrb[34].mxu0  ;;  %v3093_v50 = vpop.f32.mrb[34].mxu1 }
 0x6cb   :  { %v3204_v14 = vadd.f32 %v3188_v21, %v3000_v17  ;;  %v3053_v40 = vpop.f32.mrb[35].mxu0  ;;  %v3094_v38 = vpop.f32.mrb[35].mxu1  ;;  %v3239_v39 = vrot.slane %v6243_v46, 6  ;;  %v3186_v50 = vrot.slane %v3048_v42, 2  ;;  %v2999_v17 = vld [vmem:[#allocation2 + $0x8] sm:$0xc0] }
 0x6cc   :  { %v3205_v19 = vadd.f32 %v3189_v47, %v3001_v5  ;;  %v2998_v40 = vld [vmem:[#allocation2] sm:$0xc0]  ;;  %v3187_v38 = vrot.slane %v3050_v52, 2  ;;  %v3004_v21 = vld [vmem:[#allocation2 + $0x30] sm:$0xc0] }
 0x6cd   :  { %v3212_v37 = vmul.f32 0.5, %v3204_v14  ;;  %v3202_v14 = vadd.f32 %v3186_v50, %v2998_v40 }
 0x6ce   :  { %v3213_v22 = vmul.f32 0.5, %v3205_v19  ;;  %v3203_v19 = vadd.f32 %v3187_v38, %v2999_v17 }
 0x6cf   :  { %4769 = vtanh.f32 %v3212_v37  ;;  %v3210_v37 = vmul.f32 0.5, %v3202_v14 }
 0x6d0   :  { %4771 = vtanh.f32 %v3213_v22  ;;  %v3211_v22 = vmul.f32 0.5, %v3203_v19 }
 0x6d1   :  { %4773 = vtanh.f32 %v3210_v37 }
 0x6d2   :  { %4775 = vtanh.f32 %v3211_v22 }
 0x6d9   :  { %v4770_v60 = vpop.eup %4769 }
 0x6da   :  { %v3224_v41 = vmul.f32 0.5, %v4770_v60  ;;  %v4772_v15 = vpop.eup %4771  ;;  %v3002_v60 = vld [vmem:[#allocation2 + $0x20] sm:$0xc0] }
 0x6db   :  { %v3225_v20 = vmul.f32 0.5, %v4772_v15  ;;  %v4774_v19 = vpop.eup %4773 }
 0x6dc   :  { %v3230_v62 = vadd.f32 0.5, %v3224_v41  ;;  %v4776_v37 = vpop.eup %4775 }
 0x6dd   :  { %v3231_v2 = vadd.f32 0.5, %v3225_v20  ;;  %v3223_v27 = vmul.f32 0.5, %v4776_v37 }
 0x6de   :  { %v3242_v28 = vmul.f32 %v3238_v34, %v3230_v62 }
 0x6df   :  { %v3243_v30 = vmul.f32 %v3239_v39, %v3231_v2  ;;  %v3003_v2 = vld [vmem:[#allocation2 + $0x28] sm:$0xc0] }
 0x708   :  { %v3130_v41 = vpop.f32.mrb[36].mxu0  ;;  %v3171_v5 = vpop.f32.mrb[36].mxu1 }
 0x709   :  { %v3190_v15 = vrot.slane %v3130_v41, 2  ;;  %v3192_v62 = vrot.slane %v3171_v5, 2  ;;  %v3132_v20 = vpop.f32.mrb[37].mxu0  ;;  %v3173_v46 = vpop.f32.mrb[37].mxu1  ;;  %v3222_v5 = vmul.f32 0.5, %v4774_v19 }
 0x70a   :  { %v3191_v42 = vrot.slane %v3132_v20, 2  ;;  %v3193_v47 = vrot.slane %v3173_v46, 2  ;;  %v3134_v52 = vpop.f32.mrb[38].mxu0  ;;  %v3175_v34 = vpop.f32.mrb[38].mxu1 }
 0x70b   :  { %v3208_v39 = vadd.f32 %v3192_v62, %v3004_v21  ;;  %v3135_v50 = vpop.f32.mrb[39].mxu0  ;;  %v3176_v40 = vpop.f32.mrb[39].mxu1  ;;  %v3206_v38 = vadd.f32 %v3190_v15, %v3002_v60  ;;  %v3228_v20 = vadd.f32 0.5, %v3222_v5  ;;  %v3229_v52 = vadd.f32 0.5, %v3223_v27  ;;  %v8045_v5 = vld [vmem:[#allocation79_spill] sm:$0xff] }
 0x70c   :  { %v3209_v17 = vadd.f32 %v3193_v47, %v3005_v56  ;;  %v3207_v14 = vadd.f32 %v3191_v42, %v3003_v2 }
 0x70d   :  { %4777 = vtanh.f32 %v3208_v39  ;;  %v3214_v22 = vmul.f32 0.5, %v3206_v38 }
 0x70e   :  { %4779 = vtanh.f32 %v3209_v17  ;;  %v3215_v41 = vmul.f32 0.5, %v3207_v14 }
 0x70f   :  { %4781 = vtanh.f32 %v3214_v22  ;;  %v8043_v22 = vld [vmem:[#allocation67_spill] sm:$0xff] }
 0x710   :  { %4783 = vtanh.f32 %v3215_v41  ;;  %v8044_v41 = vld [vmem:[#allocation81_spill] sm:$0xff] }
 0x717   :  { %v4778_v46 = vpop.eup %4777 }
 0x718   :  { %v4780_v34 = vpop.eup %4779  ;;  %v3244_v21 = vmul.f32 %v4778_v46, %v3228_v20  ;;  %v8046_v20 = vld [vmem:[#allocation84_spill] sm:$0xff]  ;;  %v8047_v46 = vld [vmem:[#allocation82_spill] sm:$0xff] }
 0x719   :  { %v3245_v62 = vmul.f32 %v4780_v34, %v3229_v52  ;;  %v4782_v15 = vpop.eup %4781  ;;  %v8048_v52 = vld [vmem:[#allocation85_spill] sm:$0xff]  ;;  %v8049_v34 = vld [vmem:[#allocation83_spill] sm:$0xff] }
 0x71a   :  { %v6505_v50 = vadd.f32 %v3244_v21, %v3242_v28  ;;  %v4784_v56 = vpop.eup %4783  ;;  %v3226_v2 = vmul.f32 0.5, %v4782_v15  ;;  %v8050_v21 = vld [vmem:[#allocation88_spill] sm:$0xff]  ;;  %v8052_v15 = vld [vmem:[#allocation89_spill] sm:$0xff] }
 0x71b   :  { %v6507_v60 = vadd.f32 %v3245_v62, %v3243_v30  ;;  %v3227_v42 = vmul.f32 0.5, %v4784_v56  ;;  %v8042_v30 = vld [vmem:[#allocation69_spill] sm:$0xff]  ;;  %v8051_v62 = vld [vmem:[#allocation86_spill] sm:$0xff]  ;;  %v8053_v56 = vld [vmem:[#allocation87_spill] sm:$0xff] }
 0x71c   :  { %4785 = vtanh.f32 %v6505_v50  ;;  %v3232_v47 = vadd.f32 0.5, %v3226_v2  ;;  %v8054_v2 = vld [vmem:[#allocation92_spill] sm:$0xff] }
 0x71d   :  { %4787 = vtanh.f32 %v6507_v60  ;;  %v3233_v40 = vadd.f32 0.5, %v3227_v42  ;;  %v8055_v42 = vld [vmem:[#allocation90_spill] sm:$0xff] }
 0x726   :  { %v4786_v39 = vpop.eup %4785 }
 0x727   :  { %v4788_v38 = vpop.eup %4787  ;;  %v3250_v27 = vmul.f32 %v4786_v39, %v3232_v47  ;;  %v8056_v47 = vld [vmem:[#allocation93_spill] sm:$0xff]  ;;  %v8057_v39 = vld [vmem:[#allocation91_spill] sm:$0xff] }
 0x728   :  { %v3251_v17 = vmul.f32 %v4788_v38, %v3233_v40  ;;  %v8058_v40 = vld [vmem:[#allocation96_spill] sm:$0xff]  ;;  %v8059_v38 = vld [vmem:[#allocation94_spill] sm:$0xff] }
 0x729   :  { %v3260_v14 = vpack.c.bf16 %v3250_v27, %v3250_v27  ;;  %v8060_v27 = vld [vmem:[#allocation97_spill] sm:$0xff] }
 0x72a   :  { %v3261_v19 = vpack.c.bf16 %v3251_v17, %v3251_v17  ;;  %v8061_v17 = vld [vmem:[#allocation95_spill] sm:$0xff] }
 0x72b   :  { %v6511_v37 = vrot.slane %v3260_v14, 3  ;;  %v8062_v14 = vld [vmem:[#allocation100_spill] sm:$0xff] }
 0x72c   :  { %v3265_v28 = vrot.slane %v3261_v19, 3  ;;  %v8063_v19 = vld [vmem:[#allocation98_spill] sm:$0xff] }
 0x72e   :  { %3300 = vmatprep.mubr.bf16.mxu0 %v3265_v28  ;;  %3341 = vmatprep.mubr.bf16.mxu1 %v3265_v28 }
 0x72f   :  { %3301 = vmatmul.mubr.bf16.vlgmr.msra.gmra.mrb[40].mxu0 %v6511_v37  ;;  %3342 = vmatmul.mubr.bf16.vlgmr.msra.gmra.mrb[40].mxu1 %v6511_v37 }
 0x730   :  { %3351 = vmatpush1.bf16.msra.mxu0 %v6251_v53  ;;  %3392 = vmatpush1.bf16.msra.mxu1 %v6254_v29 }
 0x731   :  { %3382 = vmatprep.mubr.bf16.mxu0 %v3265_v28  ;;  %3423 = vmatprep.mubr.bf16.mxu1 %v3265_v28  ;;  %v8064_v28 = vld [vmem:[#allocation101_spill] sm:$0xff] }
 0x732   :  { %3352 = vmatprep.subr.bf16.mxu0 %v6257_v33  ;;  %3393 = vmatprep.subr.bf16.mxu1 %v5978_v54  ;;  %v8041_v54 = vld [vmem:[#allocation66_spill] sm:$0xff] }
 0x734   :  { %3353 = vmatpush1.bf16.msra.mxu0 %v6261_v31  ;;  %3394 = vmatpush1.bf16.msra.mxu1 %v6264_v43 }
 0x735   :  { %3354 = vmatprep.subr.bf16.mxu0 %v6267_v32  ;;  %3395 = vmatprep.subr.bf16.mxu1 %v6270_v58 }
 0x738   :  { %3355 = vmatpush1.bf16.msra.mxu0 %v6273_v61  ;;  %3396 = vmatpush1.bf16.msra.mxu1 %v6276_v35 }
 0x739   :  { %3356 = vmatprep.subr.bf16.mxu0 %v6279_v44  ;;  %3397 = vmatprep.subr.bf16.mxu1 %v6282_v45 }
 0x73c   :  { %3357 = vmatpush1.bf16.msra.mxu0 %v6285_v16  ;;  %3398 = vmatpush1.bf16.msra.mxu1 %v6288_v18 }
 0x73d   :  { %3358 = vmatprep.subr.bf16.mxu0 %v6291_v36  ;;  %3399 = vmatprep.subr.bf16.mxu1 %v6294_v25 }
 0x740   :  { %3359 = vmatpush1.bf16.msra.mxu0 %v6297_v55  ;;  %3400 = vmatpush1.bf16.msra.mxu1 %v6300_v7 }
 0x741   :  { %3360 = vmatprep.subr.bf16.mxu0 %v8041_v54  ;;  %3401 = vmatprep.subr.bf16.mxu1 %v8042_v30 }
 0x744   :  { %3361 = vmatpush1.bf16.msra.mxu0 %v8043_v22  ;;  %3402 = vmatpush1.bf16.msra.mxu1 %v8044_v41 }
 0x745   :  { %3362 = vmatprep.subr.bf16.mxu0 %v8045_v5  ;;  %3403 = vmatprep.subr.bf16.mxu1 %v8046_v20 }
 0x748   :  { %3363 = vmatpush1.bf16.msra.mxu0 %v8047_v46  ;;  %3404 = vmatpush1.bf16.msra.mxu1 %v8048_v52 }
 0x749   :  { %3364 = vmatprep.subr.bf16.mxu0 %v8049_v34  ;;  %3405 = vmatprep.subr.bf16.mxu1 %v8050_v21 }
 0x74c   :  { %3365 = vmatpush1.bf16.msra.mxu0 %v8051_v62  ;;  %3406 = vmatpush1.bf16.msra.mxu1 %v8052_v15 }
 0x74d   :  { %3366 = vmatprep.subr.bf16.mxu0 %v8053_v56  ;;  %3407 = vmatprep.subr.bf16.mxu1 %v8054_v2  ;;  %v8065_v2 = vld [vmem:[#allocation99_spill] sm:$0xff] }
 0x750   :  { %3367 = vmatpush1.bf16.msra.mxu0 %v8055_v42  ;;  %3408 = vmatpush1.bf16.msra.mxu1 %v8056_v47  ;;  %v8066_v42 = vld [vmem:[#allocation104_spill] sm:$0xff]  ;;  %v8067_v47 = vld [vmem:[#allocation102_spill] sm:$0xff] }
 0x751   :  { %3368 = vmatprep.subr.bf16.mxu0 %v8057_v39  ;;  %3409 = vmatprep.subr.bf16.mxu1 %v8058_v40  ;;  %v8068_v39 = vld [vmem:[#allocation105_spill] sm:$0xff]  ;;  %v8069_v40 = vld [vmem:[#allocation103_spill] sm:$0xff] }
 0x754   :  { %3369 = vmatpush1.bf16.msra.mxu0 %v8059_v38  ;;  %3410 = vmatpush1.bf16.msra.mxu1 %v8060_v27  ;;  %v8070_v38 = vld [vmem:[#allocation108_spill] sm:$0xff]  ;;  %v8071_v27 = vld [vmem:[#allocation106_spill] sm:$0xff] }
 0x755   :  { %3370 = vmatprep.subr.bf16.mxu0 %v8061_v17  ;;  %3411 = vmatprep.subr.bf16.mxu1 %v8062_v14  ;;  %v8072_v17 = vld [vmem:[#allocation109_spill] sm:$0xff]  ;;  %v8073_v14 = vld [vmem:[#allocation107_spill] sm:$0xff] }
 0x758   :  { %3371 = vmatpush1.bf16.msra.mxu0 %v8063_v19  ;;  %3412 = vmatpush1.bf16.msra.mxu1 %v8064_v28  ;;  %v8074_v19 = vld [vmem:[#allocation112_spill] sm:$0xff] }
 0x759   :  { %3372 = vmatprep.subr.bf16.mxu0 %v8065_v2  ;;  %3413 = vmatprep.subr.bf16.mxu1 %v8066_v42  ;;  %v8075_v28 = vld [vmem:[#allocation116_spill] sm:$0xff]  ;;  %v8076_v2 = vld [vmem:[#allocation123_spill] sm:$0xff] }
 0x75a   :  { %v8077_v42 = vld [vmem:[#allocation124_spill] sm:$0xff] }
 0x75c   :  { %3373 = vmatpush1.bf16.msra.mxu0 %v8067_v47  ;;  %3414 = vmatpush1.bf16.msra.mxu1 %v8068_v39  ;;  %v8078_v47 = vld [vmem:[#allocation125_spill] sm:$0xff] }
 0x75d   :  { %3374 = vmatprep.subr.bf16.mxu0 %v8069_v40  ;;  %3415 = vmatprep.subr.bf16.mxu1 %v8070_v38 }
 0x760   :  { %3375 = vmatpush1.bf16.msra.mxu0 %v8071_v27  ;;  %3416 = vmatpush1.bf16.msra.mxu1 %v8072_v17 }
 0x761   :  { %3376 = vmatprep.subr.bf16.mxu0 %v8073_v14  ;;  %3417 = vmatprep.subr.bf16.mxu1 %v8074_v19 }
 0x764   :  { %3377 = vmatpush1.bf16.msra.mxu0 %v8075_v28  ;;  %3418 = vmatpush1.bf16.msra.mxu1 %v8076_v2 }
 0x765   :  { %3378 = vmatprep.subr.bf16.mxu0 %v8077_v42  ;;  %3419 = vmatprep.subr.bf16.mxu1 %v8078_v47 }
 0x768   :  { %3379 = vmatpush1.bf16.msra.mxu0 %v6417_v57  ;;  %3420 = vmatpush1.bf16.msra.mxu1 %v6420_v51 }
 0x769   :  { %3380 = vmatprep.subr.bf16.mxu0 %v6423_v48  ;;  %3421 = vmatprep.subr.bf16.mxu1 %v6426_v6  ;;  %v3468_v48 = vrot.slane %v6505_v50, 6  ;;  %v3257_v50 = vld [vmem:[#allocation2 + $0x68] sm:$0x3] }
 0x76c   :  { %3381 = vmatpush1.bf16.msra.mxu0 %v6429_v49  ;;  %3422 = vmatpush1.bf16.msra.mxu1 %v6432_v24 }
 0x76d   :  { %3492 = vmatprep.subr.bf16.mxu0 %v6039_v13  ;;  %3533 = vmatprep.subr.bf16.mxu1 %v6042_v0  ;;  %v8079_v13 = vld [vmem:[#allocation72_spill] sm:$0xff]  ;;  %v8080_v0 = vld [vmem:[#allocation70_spill] sm:$0xff] }
 0x76f   :  { %3383 = vmatmul.mubr.bf16.vlgmr.msra.gmra.mrb[44].mxu0 %v6511_v37  ;;  %3424 = vmatmul.mubr.bf16.vlgmr.msra.gmra.mrb[44].mxu1 %v6511_v37  ;;  %v8093_v37 = vld [vmem:[#allocation117_spill] sm:$0xff] }
 0x770   :  { %3493 = vmatpush1.bf16.msra.mxu0 %v6047_v1  ;;  %3534 = vmatpush1.bf16.msra.mxu1 %v6050_v3  ;;  %v8081_v1 = vld [vmem:[#allocation73_spill] sm:$0xff]  ;;  %v8082_v3 = vld [vmem:[#allocation71_spill] sm:$0xff] }
 0x771   :  { %3494 = vmatprep.subr.bf16.mxu0 %v6053_v4  ;;  %3535 = vmatprep.subr.bf16.mxu1 %v6056_v8  ;;  %v8083_v4 = vld [vmem:[#allocation76_spill] sm:$0xff]  ;;  %v8084_v8 = vld [vmem:[#allocation74_spill] sm:$0xff] }
 0x774   :  { %3495 = vmatpush1.bf16.msra.mxu0 %v6059_v9  ;;  %3536 = vmatpush1.bf16.msra.mxu1 %v6062_v10  ;;  %v8085_v9 = vld [vmem:[#allocation77_spill] sm:$0xff]  ;;  %v8086_v10 = vld [vmem:[#allocation75_spill] sm:$0xff] }
 0x775   :  { %3496 = vmatprep.subr.bf16.mxu0 %v6065_v11  ;;  %3537 = vmatprep.subr.bf16.mxu1 %v6068_v12  ;;  %v8087_v11 = vld [vmem:[#allocation80_spill] sm:$0xff]  ;;  %v8088_v12 = vld [vmem:[#allocation78_spill] sm:$0xff] }
 0x778   :  { %3497 = vmatpush1.bf16.msra.mxu0 %v6071_v63  ;;  %3538 = vmatpush1.bf16.msra.mxu1 %v6074_v59  ;;  %v8089_v63 = vld [vmem:[#allocation110_spill] sm:$0xff]  ;;  %v8090_v59 = vld [vmem:[#allocation113_spill] sm:$0xff] }
 0x779   :  { %3498 = vmatprep.subr.bf16.mxu0 %v6077_v23  ;;  %3539 = vmatprep.subr.bf16.mxu1 %v6080_v26  ;;  %v8091_v23 = vld [vmem:[#allocation111_spill] sm:$0xff]  ;;  %v8092_v26 = vld [vmem:[#allocation114_spill] sm:$0xff] }
 0x77c   :  { %3499 = vmatpush1.bf16.msra.mxu0 %v8079_v13  ;;  %3540 = vmatpush1.bf16.msra.mxu1 %v8080_v0  ;;  %v8094_v13 = vld [vmem:[#allocation115_spill] sm:$0xff]  ;;  %v8095_v0 = vld [vmem:[#allocation120_spill] sm:$0xff] }
 0x77d   :  { %3500 = vmatprep.subr.bf16.mxu0 %v8081_v1  ;;  %3541 = vmatprep.subr.bf16.mxu1 %v8082_v3  ;;  %v8096_v1 = vld [vmem:[#allocation118_spill] sm:$0xff]  ;;  %v8097_v3 = vld [vmem:[#allocation121_spill] sm:$0xff] }
 0x780   :  { %3501 = vmatpush1.bf16.msra.mxu0 %v8083_v4  ;;  %3542 = vmatpush1.bf16.msra.mxu1 %v8084_v8  ;;  %v8098_v4 = vld [vmem:[#allocation119_spill] sm:$0xff]  ;;  %v8099_v8 = vld [vmem:[#allocation122_spill] sm:$0xff] }
 0x781   :  { %3502 = vmatprep.subr.bf16.mxu0 %v8085_v9  ;;  %3543 = vmatprep.subr.bf16.mxu1 %v8086_v10  ;;  %v8100_v9 = vld [vmem:[#allocation37_spill] sm:$0xff]  ;;  %v8101_v10 = vld [vmem:[#allocation36_spill] sm:$0xff] }
 0x784   :  { %3503 = vmatpush1.bf16.msra.mxu0 %v8087_v11  ;;  %3544 = vmatpush1.bf16.msra.mxu1 %v8088_v12  ;;  %v8102_v11 = vld [vmem:[#allocation40_spill] sm:$0xff]  ;;  %v8103_v12 = vld [vmem:[#allocation38_spill] sm:$0xff] }
 0x785   :  { %3504 = vmatprep.subr.bf16.mxu0 %v8089_v63  ;;  %3545 = vmatprep.subr.bf16.mxu1 %v8090_v59  ;;  %v8104_v63 = vld [vmem:[#allocation41_spill] sm:$0xff]  ;;  %v8105_v59 = vld [vmem:[#allocation39_spill] sm:$0xff] }
 0x788   :  { %3505 = vmatpush1.bf16.msra.mxu0 %v8091_v23  ;;  %3546 = vmatpush1.bf16.msra.mxu1 %v8092_v26  ;;  %v8106_v23 = vld [vmem:[#allocation44_spill] sm:$0xff]  ;;  %v8107_v26 = vld [vmem:[#allocation42_spill] sm:$0xff] }
 0x789   :  { %3506 = vmatprep.subr.bf16.mxu0 %v8093_v37  ;;  %3547 = vmatprep.subr.bf16.mxu1 %v8094_v13  ;;  %v8108_v37 = vld [vmem:[#allocation45_spill] sm:$0xff]  ;;  %v8109_v13 = vld [vmem:[#allocation43_spill] sm:$0xff] }
 0x78c   :  { %3507 = vmatpush1.bf16.msra.mxu0 %v8095_v0  ;;  %3548 = vmatpush1.bf16.msra.mxu1 %v8096_v1  ;;  %v8110_v0 = vld [vmem:[#allocation48_spill] sm:$0xff]  ;;  %v8111_v1 = vld [vmem:[#allocation46_spill] sm:$0xff] }
 0x78d   :  { %3508 = vmatprep.subr.bf16.mxu0 %v8097_v3  ;;  %3549 = vmatprep.subr.bf16.mxu1 %v8098_v4  ;;  %v8112_v3 = vld [vmem:[#allocation49_spill] sm:$0xff]  ;;  %v8113_v4 = vld [vmem:[#allocation47_spill] sm:$0xff] }
 0x790   :  { %3509 = vmatpush1.bf16.msra.mxu0 %v8099_v8  ;;  %3550 = vmatpush1.bf16.msra.mxu1 %v8100_v9  ;;  %v8114_v8 = vld [vmem:[#allocation52_spill] sm:$0xff]  ;;  %v8115_v9 = vld [vmem:[#allocation50_spill] sm:$0xff] }
 0x791   :  { %3510 = vmatprep.subr.bf16.mxu0 %v8101_v10  ;;  %3551 = vmatprep.subr.bf16.mxu1 %v8102_v11  ;;  %v8116_v10 = vld [vmem:[#allocation53_spill] sm:$0xff]  ;;  %v8117_v11 = vld [vmem:[#allocation51_spill] sm:$0xff] }
 0x794   :  { %3511 = vmatpush1.bf16.msra.mxu0 %v8103_v12  ;;  %3552 = vmatpush1.bf16.msra.mxu1 %v8104_v63  ;;  %v8118_v12 = vld [vmem:[#allocation56_spill] sm:$0xff]  ;;  %v8119_v63 = vld [vmem:[#allocation54_spill] sm:$0xff] }
 0x795   :  { %3512 = vmatprep.subr.bf16.mxu0 %v8105_v59  ;;  %3553 = vmatprep.subr.bf16.mxu1 %v8106_v23  ;;  %v8120_v59 = vld [vmem:[#allocation57_spill] sm:$0xff]  ;;  %v8121_v23 = vld [vmem:[#allocation55_spill] sm:$0xff] }
 0x798   :  { %3513 = vmatpush1.bf16.msra.mxu0 %v8107_v26  ;;  %3554 = vmatpush1.bf16.msra.mxu1 %v8108_v37  ;;  %v8122_v26 = vld [vmem:[#allocation60_spill] sm:$0xff]  ;;  %v8123_v37 = vld [vmem:[#allocation58_spill] sm:$0xff] }
 0x799   :  { %3514 = vmatprep.subr.bf16.mxu0 %v8109_v13  ;;  %3555 = vmatprep.subr.bf16.mxu1 %v8110_v0  ;;  %v8124_v13 = vld [vmem:[#allocation61_spill] sm:$0xff]  ;;  %v8125_v0 = vld [vmem:[#allocation59_spill] sm:$0xff] }
 0x79c   :  { %3515 = vmatpush1.bf16.msra.mxu0 %v8111_v1  ;;  %3556 = vmatpush1.bf16.msra.mxu1 %v8112_v3  ;;  %v8126_v1 = vld [vmem:[#allocation64_spill] sm:$0xff]  ;;  %v8127_v3 = vld [vmem:[#allocation62_spill] sm:$0xff] }
 0x79d   :  { %3516 = vmatprep.subr.bf16.mxu0 %v8113_v4  ;;  %3557 = vmatprep.subr.bf16.mxu1 %v8114_v8  ;;  %v8128_v4 = vld [vmem:[#allocation65_spill] sm:$0xff]  ;;  %v8129_v8 = vld [vmem:[#allocation63_spill] sm:$0xff] }
 0x7a0   :  { %3517 = vmatpush1.bf16.msra.mxu0 %v8115_v9  ;;  %3558 = vmatpush1.bf16.msra.mxu1 %v8116_v10  ;;  %v8130_v9 = vld [vmem:[#allocation68_spill] sm:$0xff]  ;;  %v3254_v10 = vld [vmem:[#allocation2 + $0x50] sm:$0x3] }
 0x7a1   :  { %3518 = vmatprep.subr.bf16.mxu0 %v8117_v11  ;;  %3559 = vmatprep.subr.bf16.mxu1 %v8118_v12  ;;  %v3255_v11 = vld [vmem:[#allocation2 + $0x58] sm:$0x3] }
 0x7a4   :  { %3519 = vmatpush1.bf16.msra.mxu0 %v8119_v63  ;;  %3560 = vmatpush1.bf16.msra.mxu1 %v8120_v59 }
 0x7a5   :  { %3520 = vmatprep.subr.bf16.mxu0 %v8121_v23  ;;  %3561 = vmatprep.subr.bf16.mxu1 %v8122_v26 }
 0x7a8   :  { %3521 = vmatpush1.bf16.msra.mxu0 %v8123_v37  ;;  %3562 = vmatpush1.bf16.msra.mxu1 %v8124_v13 }
 0x7a9   :  { %3522 = vmatprep.subr.bf16.mxu0 %v8125_v0  ;;  %3563 = vmatprep.subr.bf16.mxu1 %v8126_v1 }
 0x7ac   :  { %3523 = vmatpush1.bf16.msra.mxu0 %v8127_v3  ;;  %3564 = vmatpush1.bf16.msra.mxu1 %v8128_v4 }
 0x7ad   :  { %3574 = vmatprep.subr.bf16.mxu0 %v8129_v8  ;;  %3615 = vmatprep.subr.bf16.mxu1 %v8130_v9 }
 0x802   :  { %v3302_v12 = vpop.f32.mrb[40].mxu0  ;;  %v3343_v63 = vpop.f32.mrb[40].mxu1 }
 0x803   :  { %v3434_v59 = vadd.f32 %v3343_v63, %v3254_v10  ;;  %v3304_v23 = vpop.f32.mrb[41].mxu0  ;;  %v3345_v26 = vpop.f32.mrb[41].mxu1  ;;  %v3469_v63 = vrot.slane %v6507_v60, 6 }
 0x804   :  { %v3435_v37 = vadd.f32 %v3345_v26, %v3255_v11  ;;  %v3306_v13 = vpop.f32.mrb[42].mxu0  ;;  %v3347_v0 = vpop.f32.mrb[42].mxu1  ;;  %v3252_v26 = vld [vmem:[#allocation2 + $0x40] sm:$0x3] }
 0x805   :  { %v3442_v24 = vmul.f32 0.5, %v3434_v59  ;;  %v3307_v1 = vpop.f32.mrb[43].mxu0  ;;  %v3348_v49 = vpop.f32.mrb[43].mxu1  ;;  %v3253_v13 = vld [vmem:[#allocation2 + $0x48] sm:$0x3]  ;;  %v3432_v59 = vadd.f32 %v3302_v12, %v3252_v26 }
 0x806   :  { %v3443_v3 = vmul.f32 0.5, %v3435_v37  ;;  %v3433_v0 = vadd.f32 %v3304_v23, %v3253_v13  ;;  %v3256_v1 = vld [vmem:[#allocation2 + $0x60] sm:$0x3] }
 0x807   :  { %4789 = vtanh.f32 %v3442_v24  ;;  %v3440_v49 = vmul.f32 0.5, %v3432_v59  ;;  %v3258_v24 = vld [vmem:[#allocation2 + $0x70] sm:$0x3] }
 0x808   :  { %4791 = vtanh.f32 %v3443_v3  ;;  %v3441_v37 = vmul.f32 0.5, %v3433_v0  ;;  %v3259_v3 = vld [vmem:[#allocation2 + $0x78] sm:$0x3] }
 0x809   :  { %4793 = vtanh.f32 %v3440_v49 }
 0x80a   :  { %4795 = vtanh.f32 %v3441_v37 }
 0x811   :  { %v4790_v4 = vpop.eup %4789 }
 0x812   :  { %v3454_v8 = vmul.f32 0.5, %v4790_v4  ;;  %v4792_v6 = vpop.eup %4791 }
 0x813   :  { %v3455_v51 = vmul.f32 0.5, %v4792_v6  ;;  %v4794_v13 = vpop.eup %4793 }
 0x814   :  { %v3460_v9 = vadd.f32 0.5, %v3454_v8  ;;  %v4796_v59 = vpop.eup %4795  ;;  %v3452_v37 = vmul.f32 0.5, %v4794_v13 }
 0x815   :  { %v3461_v10 = vadd.f32 0.5, %v3455_v51  ;;  %v3453_v47 = vmul.f32 0.5, %v4796_v59  ;;  %v6777_v59 = vld [vmem:[#allocation3 + $0x100] sm:$0xff] }
 0x816   :  { %v3472_v57 = vmul.f32 %v3468_v48, %v3460_v9 }
 0x817   :  { %v3473_v11 = vmul.f32 %v3469_v63, %v3461_v10  ;;  %v3459_v42 = vadd.f32 0.5, %v3453_v47 }
 0x842   :  { %v3384_v4 = vpop.f32.mrb[44].mxu0  ;;  %v3425_v8 = vpop.f32.mrb[44].mxu1 }
 0x843   :  { %v3438_v6 = vadd.f32 %v3425_v8, %v3258_v24  ;;  %v3386_v48 = vpop.f32.mrb[45].mxu0  ;;  %v3427_v51 = vpop.f32.mrb[45].mxu1  ;;  %v3436_v9 = vadd.f32 %v3384_v4, %v3256_v1  ;;  %v3458_v24 = vadd.f32 0.5, %v3452_v37  ;;  %v6786_v37 = vld [vmem:[#allocation3 + $0x158] sm:$0xff] }
 0x844   :  { %v3439_v60 = vadd.f32 %v3427_v51, %v3259_v3  ;;  %v3388_v10 = vpop.f32.mrb[46].mxu0  ;;  %v3429_v63 = vpop.f32.mrb[46].mxu1  ;;  %v3437_v12 = vadd.f32 %v3386_v48, %v3257_v50 }
 0x845   :  { %4797 = vtanh.f32 %v3438_v6  ;;  %v3389_v23 = vpop.f32.mrb[47].mxu0  ;;  %v3430_v26 = vpop.f32.mrb[47].mxu1  ;;  %v3444_v0 = vmul.f32 0.5, %v3436_v9 }
 0x846   :  { %4799 = vtanh.f32 %v3439_v60  ;;  %v3445_v49 = vmul.f32 0.5, %v3437_v12 }
 0x847   :  { %4801 = vtanh.f32 %v3444_v0  ;;  %v6780_v0 = vld [vmem:[#allocation3 + $0x110] sm:$0xff] }
 0x848   :  { %4803 = vtanh.f32 %v3445_v49  ;;  %v6783_v49 = vld [vmem:[#allocation3 + $0x148] sm:$0xff] }
 0x84f   :  { %v4798_v8 = vpop.eup %4797 }
 0x850   :  { %v4800_v1 = vpop.eup %4799  ;;  %v3474_v3 = vmul.f32 %v4798_v8, %v3458_v24  ;;  %v6789_v24 = vld [vmem:[#allocation3 + $0x140] sm:$0xff]  ;;  %v6792_v8 = vld [vmem:[#allocation3 + $0x150] sm:$0xff] }
 0x851   :  { %v3475_v4 = vmul.f32 %v4800_v1, %v3459_v42  ;;  %v4802_v6 = vpop.eup %4801  ;;  %v6795_v1 = vld [vmem:[#allocation3 + $0x188] sm:$0xff] }
 0x852   :  { %v6647_v51 = vadd.f32 %v3474_v3, %v3472_v57  ;;  %v4804_v48 = vpop.eup %4803  ;;  %v3456_v9 = vmul.f32 0.5, %v4802_v6  ;;  %v6660_v57 = vld [vmem:[#allocation3 + $0x78] sm:$0xff]  ;;  %v6804_v6 = vld [vmem:[#allocation3 + $0x190] sm:$0xff] }
 0x853   :  { %v6649_v50 = vadd.f32 %v3475_v4, %v3473_v11  ;;  %v3457_v60 = vmul.f32 0.5, %v4804_v48  ;;  %v6774_v11 = vld [vmem:[#allocation3 + $0x118] sm:$0xff]  ;;  %v6801_v4 = vld [vmem:[#allocation3 + $0x180] sm:$0xff]  ;;  %v6807_v48 = vld [vmem:[#allocation3 + $0x1c8] sm:$0xff] }
 0x854   :  { %4805 = vtanh.f32 %v6647_v51  ;;  %v3462_v10 = vadd.f32 0.5, %v3456_v9  ;;  %v6798_v3 = vld [vmem:[#allocation3 + $0x198] sm:$0xff] }
 0x855   :  { %4807 = vtanh.f32 %v6649_v50  ;;  %v3463_v12 = vadd.f32 0.5, %v3457_v60  ;;  %v6810_v9 = vld [vmem:[#allocation3 + $0x1d8] sm:$0xff]  ;;  %v6813_v60 = vld [vmem:[#allocation3 + $0x1c0] sm:$0xff] }
 0x85e   :  { %v4806_v63 = vpop.eup %4805 }
 0x85f   :  { %v4808_v23 = vpop.eup %4807  ;;  %v3480_v47 = vmul.f32 %v4806_v63, %v3462_v10  ;;  %v6816_v10 = vld [vmem:[#allocation3 + $0x1d0] sm:$0xff]  ;;  %v6819_v63 = vld [vmem:[#allocation3 + $0x208] sm:$0xff] }
 0x860   :  { %v3481_v26 = vmul.f32 %v4808_v23, %v3463_v12  ;;  %v6822_v12 = vld [vmem:[#allocation3 + $0x218] sm:$0xff]  ;;  %v6825_v23 = vld [vmem:[#allocation3 + $0x200] sm:$0xff] }
 0x861   :  { %v6653_v42 = vpack.c.bf16 %v3480_v47, %v3480_v47  ;;  %v6828_v47 = vld [vmem:[#allocation3 + $0x210] sm:$0xff] }
 0x862   :  { %v3491_v13 = vpack.c.bf16 %v3481_v26, %v3481_v26  ;;  %v6831_v26 = vld [vmem:[#allocation3 + $0x248] sm:$0xff] }
 0x864   :  { %3524 = vmatprep.mubr.bf16.mxu0 %v3491_v13  ;;  %3565 = vmatprep.mubr.bf16.mxu1 %v3491_v13 }
 0x865   :  { %3525 = vmatmul.mubr.bf16.vlgmr.msra.gmra.mrb[48].mxu0 %v6653_v42  ;;  %3566 = vmatmul.mubr.bf16.vlgmr.msra.gmra.mrb[48].mxu1 %v6653_v42 }
 0x866   :  { %3575 = vmatpush1.bf16.msra.mxu0 %v6251_v53  ;;  %3616 = vmatpush1.bf16.msra.mxu1 %v6254_v29  ;;  %v8131_v53 = vld [vmem:[#allocation92_spill] sm:$0xff]  ;;  %v8132_v29 = vld [vmem:[#allocation90_spill] sm:$0xff] }
 0x867   :  { %3606 = vmatprep.mubr.bf16.mxu0 %v3491_v13  ;;  %3647 = vmatprep.mubr.bf16.mxu1 %v3491_v13  ;;  %v6834_v13 = vld [vmem:[#allocation3 + $0x258] sm:$0xff] }
 0x868   :  { %3576 = vmatprep.subr.bf16.mxu0 %v6257_v33  ;;  %3617 = vmatprep.subr.bf16.mxu1 %v6660_v57  ;;  %v8133_v33 = vld [vmem:[#allocation93_spill] sm:$0xff]  ;;  %8153 = vst [vmem:[#allocation66_spill] sm:$0xff] %v6834_v13 }
 0x86a   :  { %3577 = vmatpush1.bf16.msra.mxu0 %v6261_v31  ;;  %3618 = vmatpush1.bf16.msra.mxu1 %v6264_v43  ;;  %v8134_v31 = vld [vmem:[#allocation91_spill] sm:$0xff]  ;;  %v8135_v43 = vld [vmem:[#allocation96_spill] sm:$0xff] }
 0x86b   :  { %3578 = vmatprep.subr.bf16.mxu0 %v6267_v32  ;;  %3619 = vmatprep.subr.bf16.mxu1 %v6270_v58  ;;  %v8136_v32 = vld [vmem:[#allocation94_spill] sm:$0xff]  ;;  %v8137_v58 = vld [vmem:[#allocation97_spill] sm:$0xff] }
 0x86e   :  { %3579 = vmatpush1.bf16.msra.mxu0 %v6273_v61  ;;  %3620 = vmatpush1.bf16.msra.mxu1 %v6276_v35  ;;  %v8138_v61 = vld [vmem:[#allocation95_spill] sm:$0xff]  ;;  %v8139_v35 = vld [vmem:[#allocation100_spill] sm:$0xff] }
 0x86f   :  { %3580 = vmatprep.subr.bf16.mxu0 %v6279_v44  ;;  %3621 = vmatprep.subr.bf16.mxu1 %v6282_v45  ;;  %v8140_v44 = vld [vmem:[#allocation98_spill] sm:$0xff]  ;;  %v8141_v45 = vld [vmem:[#allocation101_spill] sm:$0xff] }
 0x872   :  { %3581 = vmatpush1.bf16.msra.mxu0 %v6285_v16  ;;  %3622 = vmatpush1.bf16.msra.mxu1 %v6288_v18  ;;  %v8142_v16 = vld [vmem:[#allocation99_spill] sm:$0xff]  ;;  %v8143_v18 = vld [vmem:[#allocation104_spill] sm:$0xff] }
 0x873   :  { %3582 = vmatprep.subr.bf16.mxu0 %v6291_v36  ;;  %3623 = vmatprep.subr.bf16.mxu1 %v6294_v25  ;;  %v8144_v36 = vld [vmem:[#allocation102_spill] sm:$0xff]  ;;  %v8145_v25 = vld [vmem:[#allocation124_spill] sm:$0xff] }
 0x876   :  { %3583 = vmatpush1.bf16.msra.mxu0 %v6297_v55  ;;  %3624 = vmatpush1.bf16.msra.mxu1 %v6300_v7  ;;  %v8146_v55 = vld [vmem:[#allocation125_spill] sm:$0xff]  ;;  %v8147_v7 = vld [vmem:[#allocation126_spill] sm:$0xff] }
 0x877   :  { %3584 = vmatprep.subr.bf16.mxu0 %v8041_v54  ;;  %3625 = vmatprep.subr.bf16.mxu1 %v8042_v30  ;;  %v8148_v54 = vld [vmem:[#allocation127_spill] sm:$0xff]  ;;  %v8149_v30 = vld [vmem:[#allocation128_spill] sm:$0xff] }
 0x87a   :  { %3585 = vmatpush1.bf16.msra.mxu0 %v8043_v22  ;;  %3626 = vmatpush1.bf16.msra.mxu1 %v8044_v41  ;;  %v8150_v22 = vld [vmem:[#allocation129_spill] sm:$0xff]  ;;  %v8151_v41 = vld [vmem:[#allocation130_spill] sm:$0xff] }
 0x87b   :  { %3586 = vmatprep.subr.bf16.mxu0 %v8045_v5  ;;  %3627 = vmatprep.subr.bf16.mxu1 %v8046_v20  ;;  %v8152_v5 = vld [vmem:[#allocation131_spill] sm:$0xff]  ;;  %v6721_v20 = vld [vmem:[#allocation3 + $0x8] sm:$0xff] }
 0x87e   :  { %3587 = vmatpush1.bf16.msra.mxu0 %v8047_v46  ;;  %3628 = vmatpush1.bf16.msra.mxu1 %v8048_v52  ;;  %v6724_v46 = vld [vmem:[#allocation3 + $0x18] sm:$0xff]  ;;  %v6729_v52 = vld [vmem:[#allocation3] sm:$0xff] }
 0x87f   :  { %3588 = vmatprep.subr.bf16.mxu0 %v8049_v34  ;;  %3629 = vmatprep.subr.bf16.mxu1 %v8050_v21  ;;  %v6732_v34 = vld [vmem:[#allocation3 + $0x10] sm:$0xff]  ;;  %v6735_v21 = vld [vmem:[#allocation3 + $0x48] sm:$0xff] }
 0x882   :  { %3589 = vmatpush1.bf16.msra.mxu0 %v8051_v62  ;;  %3630 = vmatpush1.bf16.msra.mxu1 %v8052_v15  ;;  %v6738_v62 = vld [vmem:[#allocation3 + $0x58] sm:$0xff]  ;;  %v6741_v15 = vld [vmem:[#allocation3 + $0x40] sm:$0xff] }
 0x883   :  { %3590 = vmatprep.subr.bf16.mxu0 %v8053_v56  ;;  %3631 = vmatprep.subr.bf16.mxu1 %v8131_v53  ;;  %v6744_v56 = vld [vmem:[#allocation3 + $0x50] sm:$0xff] }
 0x884   :  { %v6840_v53 = vld [vmem:[#allocation3 + $0x250] sm:$0xff] }
 0x885   :  { %8155 = vst [vmem:[#allocation67_spill] sm:$0xff] %v6840_v53 }
 0x886   :  { %3591 = vmatpush1.bf16.msra.mxu0 %v8132_v29  ;;  %3632 = vmatpush1.bf16.msra.mxu1 %v8133_v33  ;;  %v6843_v29 = vld [vmem:[#allocation3 + $0x288] sm:$0xff]  ;;  %v6846_v33 = vld [vmem:[#allocation3 + $0x298] sm:$0xff] }
 0x887   :  { %3592 = vmatprep.subr.bf16.mxu0 %v8134_v31  ;;  %3633 = vmatprep.subr.bf16.mxu1 %v8135_v43  ;;  %8156 = vst [vmem:[#allocation81_spill] sm:$0xff] %v6843_v29  ;;  %8157 = vst [vmem:[#allocation79_spill] sm:$0xff] %v6846_v33  ;;  %v6849_v31 = vld [vmem:[#allocation3 + $0x280] sm:$0xff]  ;;  %v6852_v43 = vld [vmem:[#allocation3 + $0x290] sm:$0xff] }
 0x888   :  { %8158 = vst [vmem:[#allocation84_spill] sm:$0xff] %v6849_v31  ;;  %8159 = vst [vmem:[#allocation82_spill] sm:$0xff] %v6852_v43 }
 0x88a   :  { %3593 = vmatpush1.bf16.msra.mxu0 %v8136_v32  ;;  %3634 = vmatpush1.bf16.msra.mxu1 %v8137_v58  ;;  %v6855_v32 = vld [vmem:[#allocation3 + $0x2c8] sm:$0xff]  ;;  %v6858_v58 = vld [vmem:[#allocation3 + $0x2d8] sm:$0xff] }
 0x88b   :  { %3594 = vmatprep.subr.bf16.mxu0 %v8138_v61  ;;  %3635 = vmatprep.subr.bf16.mxu1 %v8139_v35  ;;  %8160 = vst [vmem:[#allocation85_spill] sm:$0xff] %v6855_v32  ;;  %8161 = vst [vmem:[#allocation83_spill] sm:$0xff] %v6858_v58  ;;  %v6861_v61 = vld [vmem:[#allocation3 + $0x2c0] sm:$0xff]  ;;  %v6864_v35 = vld [vmem:[#allocation3 + $0x2d0] sm:$0xff] }
 0x88c   :  { %8162 = vst [vmem:[#allocation88_spill] sm:$0xff] %v6861_v61  ;;  %8163 = vst [vmem:[#allocation86_spill] sm:$0xff] %v6864_v35 }
 0x88e   :  { %3595 = vmatpush1.bf16.msra.mxu0 %v8140_v44  ;;  %3636 = vmatpush1.bf16.msra.mxu1 %v8141_v45  ;;  %v6867_v44 = vld [vmem:[#allocation3 + $0x308] sm:$0xff]  ;;  %v6870_v45 = vld [vmem:[#allocation3 + $0x318] sm:$0xff] }
 0x88f   :  { %3596 = vmatprep.subr.bf16.mxu0 %v8142_v16  ;;  %3637 = vmatprep.subr.bf16.mxu1 %v8143_v18  ;;  %8164 = vst [vmem:[#allocation89_spill] sm:$0xff] %v6867_v44  ;;  %8165 = vst [vmem:[#allocation87_spill] sm:$0xff] %v6870_v45  ;;  %v6873_v16 = vld [vmem:[#allocation3 + $0x300] sm:$0xff]  ;;  %v6876_v18 = vld [vmem:[#allocation3 + $0x310] sm:$0xff] }
 0x890   :  { %8166 = vst [vmem:[#allocation105_spill] sm:$0xff] %v6873_v16  ;;  %8167 = vst [vmem:[#allocation103_spill] sm:$0xff] %v6876_v18 }
 0x892   :  { %3597 = vmatpush1.bf16.msra.mxu0 %v8144_v36  ;;  %3638 = vmatpush1.bf16.msra.mxu1 %v8068_v39  ;;  %v6750_v39 = vld [vmem:[#allocation3 + $0x98] sm:$0xff]  ;;  %v6879_v36 = vld [vmem:[#allocation3 + $0x348] sm:$0xff] }
 0x893   :  { %3598 = vmatprep.subr.bf16.mxu0 %v8069_v40  ;;  %3639 = vmatprep.subr.bf16.mxu1 %v8070_v38  ;;  %v6753_v40 = vld [vmem:[#allocation3 + $0x80] sm:$0xff]  ;;  %v6756_v38 = vld [vmem:[#allocation3 + $0x90] sm:$0xff]  ;;  %8168 = vst [vmem:[#allocation108_spill] sm:$0xff] %v6879_v36 }
 0x896   :  { %3599 = vmatpush1.bf16.msra.mxu0 %v8071_v27  ;;  %3640 = vmatpush1.bf16.msra.mxu1 %v8072_v17  ;;  %v6759_v27 = vld [vmem:[#allocation3 + $0xc8] sm:$0xff]  ;;  %v6762_v17 = vld [vmem:[#allocation3 + $0xd8] sm:$0xff] }
 0x897   :  { %3600 = vmatprep.subr.bf16.mxu0 %v8073_v14  ;;  %3641 = vmatprep.subr.bf16.mxu1 %v8074_v19  ;;  %v6765_v14 = vld [vmem:[#allocation3 + $0xc0] sm:$0xff]  ;;  %v6768_v19 = vld [vmem:[#allocation3 + $0xd0] sm:$0xff] }
 0x89a   :  { %3601 = vmatpush1.bf16.msra.mxu0 %v8075_v28  ;;  %3642 = vmatpush1.bf16.msra.mxu1 %v8076_v2  ;;  %v6747_v2 = vld [vmem:[#allocation3 + $0x88] sm:$0xff] }
 0x89b   :  { %3602 = vmatprep.subr.bf16.mxu0 %v8145_v25  ;;  %3643 = vmatprep.subr.bf16.mxu1 %v8146_v55  ;;  %v6771_v28 = vld [vmem:[#allocation3 + $0x108] sm:$0xff]  ;;  %v6882_v25 = vld [vmem:[#allocation3 + $0x358] sm:$0xff]  ;;  %v6885_v55 = vld [vmem:[#allocation3 + $0x340] sm:$0xff] }
 0x89c   :  { %8169 = vst [vmem:[#allocation106_spill] sm:$0xff] %v6882_v25  ;;  %8170 = vst [vmem:[#allocation109_spill] sm:$0xff] %v6885_v55 }
 0x89e   :  { %3603 = vmatpush1.bf16.msra.mxu0 %v8147_v7  ;;  %3644 = vmatpush1.bf16.msra.mxu1 %v8148_v54  ;;  %v6888_v7 = vld [vmem:[#allocation3 + $0x350] sm:$0xff]  ;;  %v6891_v54 = vld [vmem:[#allocation3 + $0x388] sm:$0xff] }
 0x89f   :  { %3604 = vmatprep.subr.bf16.mxu0 %v8149_v30  ;;  %3645 = vmatprep.subr.bf16.mxu1 %v8150_v22  ;;  %8171 = vst [vmem:[#allocation107_spill] sm:$0xff] %v6888_v7  ;;  %8172 = vst [vmem:[#allocation112_spill] sm:$0xff] %v6891_v54  ;;  %v6894_v30 = vld [vmem:[#allocation3 + $0x398] sm:$0xff]  ;;  %v6897_v22 = vld [vmem:[#allocation3 + $0x380] sm:$0xff] }
 0x8a0   :  { %8173 = vst [vmem:[#allocation116_spill] sm:$0xff] %v6894_v30  ;;  %8174 = vst [vmem:[#allocation123_spill] sm:$0xff] %v6897_v22 }
 0x8a2   :  { %3605 = vmatpush1.bf16.msra.mxu0 %v8151_v41  ;;  %3646 = vmatpush1.bf16.msra.mxu1 %v8152_v5  ;;  %v6900_v41 = vld [vmem:[#allocation3 + $0x390] sm:$0xff]  ;;  %v6903_v5 = vld [vmem:[#allocation3 + $0x3c8] sm:$0xff] }
 0x8a3   :  { %3746 = vmatprep.subr.bf16.mxu0 %v6721_v20  ;;  %3787 = vmatprep.subr.bf16.mxu1 %v6724_v46  ;;  %8175 = vst [vmem:[#allocation72_spill] sm:$0xff] %v6900_v41  ;;  %8176 = vst [vmem:[#allocation70_spill] sm:$0xff] %v6903_v5 }
 0x8a5   :  { %3607 = vmatmul.mubr.bf16.vlgmr.msra.gmra.mrb[52].mxu0 %v6653_v42  ;;  %3648 = vmatmul.mubr.bf16.vlgmr.msra.gmra.mrb[52].mxu1 %v6653_v42  ;;  %v6837_v42 = vld [vmem:[#allocation3 + $0x240] sm:$0xff] }
 0x8a6   :  { %3747 = vmatpush1.bf16.msra.mxu0 %v6729_v52  ;;  %3788 = vmatpush1.bf16.msra.mxu1 %v6732_v34  ;;  %8154 = vst [vmem:[#allocation69_spill] sm:$0xff] %v6837_v42 }
 0x8a7   :  { %3748 = vmatprep.subr.bf16.mxu0 %v6735_v21  ;;  %3789 = vmatprep.subr.bf16.mxu1 %v6738_v62 }
 0x8aa   :  { %3749 = vmatpush1.bf16.msra.mxu0 %v6741_v15  ;;  %3790 = vmatpush1.bf16.msra.mxu1 %v6744_v56 }
 0x8ab   :  { %3750 = vmatprep.subr.bf16.mxu0 %v6747_v2  ;;  %3791 = vmatprep.subr.bf16.mxu1 %v6750_v39 }
 0x8ae   :  { %3751 = vmatpush1.bf16.msra.mxu0 %v6753_v40  ;;  %3792 = vmatpush1.bf16.msra.mxu1 %v6756_v38 }
 0x8af   :  { %3752 = vmatprep.subr.bf16.mxu0 %v6759_v27  ;;  %3793 = vmatprep.subr.bf16.mxu1 %v6762_v17 }
 0x8b2   :  { %3753 = vmatpush1.bf16.msra.mxu0 %v6765_v14  ;;  %3794 = vmatpush1.bf16.msra.mxu1 %v6768_v19 }
 0x8b3   :  { %3754 = vmatprep.subr.bf16.mxu0 %v6771_v28  ;;  %3795 = vmatprep.subr.bf16.mxu1 %v6774_v11 }
 0x8b6   :  { %3755 = vmatpush1.bf16.msra.mxu0 %v6777_v59  ;;  %3796 = vmatpush1.bf16.msra.mxu1 %v6780_v0 }
 0x8b7   :  { %3756 = vmatprep.subr.bf16.mxu0 %v6783_v49  ;;  %3797 = vmatprep.subr.bf16.mxu1 %v6786_v37 }
 0x8ba   :  { %3757 = vmatpush1.bf16.msra.mxu0 %v6789_v24  ;;  %3798 = vmatpush1.bf16.msra.mxu1 %v6792_v8 }
 0x8bb   :  { %3758 = vmatprep.subr.bf16.mxu0 %v6795_v1  ;;  %3799 = vmatprep.subr.bf16.mxu1 %v6798_v3 }
 0x8be   :  { %3759 = vmatpush1.bf16.msra.mxu0 %v6801_v4  ;;  %3800 = vmatpush1.bf16.msra.mxu1 %v6804_v6 }
 0x8bf   :  { %3760 = vmatprep.subr.bf16.mxu0 %v6807_v48  ;;  %3801 = vmatprep.subr.bf16.mxu1 %v6810_v9 }
 0x8c2   :  { %3761 = vmatpush1.bf16.msra.mxu0 %v6813_v60  ;;  %3802 = vmatpush1.bf16.msra.mxu1 %v6816_v10 }
 0x8c3   :  { %3762 = vmatprep.subr.bf16.mxu0 %v6819_v63  ;;  %3803 = vmatprep.subr.bf16.mxu1 %v6822_v12 }
 0x8c6   :  { %3763 = vmatpush1.bf16.msra.mxu0 %v6825_v23  ;;  %3804 = vmatpush1.bf16.msra.mxu1 %v6828_v47 }
 0x8c7   :  { %3764 = vmatprep.subr.bf16.mxu0 %v6831_v26  ;;  %3805 = vmatprep.subr.bf16.mxu1 %v6834_v13 }
 0x8ca   :  { %3765 = vmatpush1.bf16.msra.mxu0 %v6837_v42  ;;  %3806 = vmatpush1.bf16.msra.mxu1 %v6840_v53 }
 0x8cb   :  { %3766 = vmatprep.subr.bf16.mxu0 %v6843_v29  ;;  %3807 = vmatprep.subr.bf16.mxu1 %v6846_v33 }
 0x8ce   :  { %3767 = vmatpush1.bf16.msra.mxu0 %v6849_v31  ;;  %3808 = vmatpush1.bf16.msra.mxu1 %v6852_v43 }
 0x8cf   :  { %3768 = vmatprep.subr.bf16.mxu0 %v6855_v32  ;;  %3809 = vmatprep.subr.bf16.mxu1 %v6858_v58 }
 0x8d2   :  { %3769 = vmatpush1.bf16.msra.mxu0 %v6861_v61  ;;  %3810 = vmatpush1.bf16.msra.mxu1 %v6864_v35 }
 0x8d3   :  { %3770 = vmatprep.subr.bf16.mxu0 %v6867_v44  ;;  %3811 = vmatprep.subr.bf16.mxu1 %v6870_v45 }
 0x8d6   :  { %3771 = vmatpush1.bf16.msra.mxu0 %v6873_v16  ;;  %3812 = vmatpush1.bf16.msra.mxu1 %v6876_v18  ;;  %v3485_v18 = vld [vmem:[#allocation2 + $0x58] sm:$0xc] }
 0x8d7   :  { %3772 = vmatprep.subr.bf16.mxu0 %v6879_v36  ;;  %3813 = vmatprep.subr.bf16.mxu1 %v6882_v25 }
 0x8da   :  { %3773 = vmatpush1.bf16.msra.mxu0 %v6885_v55  ;;  %3814 = vmatpush1.bf16.msra.mxu1 %v6888_v7  ;;  %v6906_v7 = vld [vmem:[#allocation3 + $0x3d8] sm:$0xff]  ;;  %v3484_v55 = vld [vmem:[#allocation2 + $0x50] sm:$0xc] }
 0x8db   :  { %3774 = vmatprep.subr.bf16.mxu0 %v6891_v54  ;;  %3815 = vmatprep.subr.bf16.mxu1 %v6894_v30  ;;  %8177 = vst [vmem:[#allocation73_spill] sm:$0xff] %v6906_v7  ;;  %v6909_v54 = vld [vmem:[#allocation3 + $0x3c0] sm:$0xff]  ;;  %v6912_v30 = vld [vmem:[#allocation3 + $0x3d0] sm:$0xff] }
 0x8dc   :  { %8178 = vst [vmem:[#allocation71_spill] sm:$0xff] %v6909_v54  ;;  %8179 = vst [vmem:[#allocation76_spill] sm:$0xff] %v6912_v30 }
 0x8de   :  { %3775 = vmatpush1.bf16.msra.mxu0 %v6897_v22  ;;  %3816 = vmatpush1.bf16.msra.mxu1 %v6900_v41  ;;  %v6915_v22 = vld [vmem:[#allocation3 + $0x28] sm:$0xff]  ;;  %v6918_v41 = vld [vmem:[#allocation3 + $0x38] sm:$0xff] }
 0x8df   :  { %3776 = vmatprep.subr.bf16.mxu0 %v6903_v5  ;;  %3817 = vmatprep.subr.bf16.mxu1 %v6906_v7  ;;  %8180 = vst [vmem:[#allocation74_spill] sm:$0xff] %v6915_v22  ;;  %8181 = vst [vmem:[#allocation77_spill] sm:$0xff] %v6918_v41 }
 0x8e2   :  { %3777 = vmatpush1.bf16.msra.mxu0 %v6909_v54  ;;  %3818 = vmatpush1.bf16.msra.mxu1 %v6912_v30 }
 0x8e3   :  { %3828 = vmatprep.subr.bf16.mxu0 %v6915_v22  ;;  %3869 = vmatprep.subr.bf16.mxu1 %v6918_v41 }
 0x938   :  { %v3526_v5 = vpop.f32.mrb[48].mxu0  ;;  %v3567_v25 = vpop.f32.mrb[48].mxu1 }
 0x939   :  { %v3666_v7 = vrot.slane %v3567_v25, 6  ;;  %v3528_v36 = vpop.f32.mrb[49].mxu0  ;;  %v3569_v16 = vpop.f32.mrb[49].mxu1  ;;  %v3716_v25 = vrot.slane %v6647_v51, 6 }
 0x93a   :  { %v3667_v54 = vrot.slane %v3569_v16, 6  ;;  %v3530_v45 = vpop.f32.mrb[50].mxu0  ;;  %v3571_v44 = vpop.f32.mrb[50].mxu1  ;;  %v3664_v16 = vrot.slane %v3526_v5, 6 }
 0x93b   :  { %v3682_v35 = vadd.f32 %v3666_v7, %v3484_v55  ;;  %v3531_v30 = vpop.f32.mrb[51].mxu0  ;;  %v3572_v61 = vpop.f32.mrb[51].mxu1  ;;  %v3717_v45 = vrot.slane %v6649_v50, 6  ;;  %v3482_v55 = vld [vmem:[#allocation2 + $0x40] sm:$0xc] }
 0x93c   :  { %v3683_v58 = vadd.f32 %v3667_v54, %v3485_v18  ;;  %v3665_v61 = vrot.slane %v3528_v36, 6  ;;  %v3483_v18 = vld [vmem:[#allocation2 + $0x48] sm:$0xc]  ;;  %v3488_v30 = vld [vmem:[#allocation2 + $0x70] sm:$0xc] }
 0x93d   :  { %v3690_v32 = vmul.f32 0.5, %v3682_v35  ;;  %v3680_v35 = vadd.f32 %v3664_v16, %v3482_v55 }
 0x93e   :  { %v3691_v22 = vmul.f32 0.5, %v3683_v58  ;;  %v3681_v58 = vadd.f32 %v3665_v61, %v3483_v18 }
 0x93f   :  { %4809 = vtanh.f32 %v3690_v32  ;;  %v3688_v32 = vmul.f32 0.5, %v3680_v35 }
 0x940   :  { %4811 = vtanh.f32 %v3691_v22  ;;  %v3689_v7 = vmul.f32 0.5, %v3681_v58  ;;  %v3489_v22 = vld [vmem:[#allocation2 + $0x78] sm:$0xc] }
 0x941   :  { %4813 = vtanh.f32 %v3688_v32 }
 0x942   :  { %4815 = vtanh.f32 %v3689_v7 }
 0x949   :  { %v4810_v43 = vpop.eup %4809 }
 0x94a   :  { %v3702_v41 = vmul.f32 0.5, %v4810_v43  ;;  %v4812_v31 = vpop.eup %4811  ;;  %v3486_v43 = vld [vmem:[#allocation2 + $0x60] sm:$0xc] }
 0x94b   :  { %v3703_v29 = vmul.f32 0.5, %v4812_v31  ;;  %v4814_v58 = vpop.eup %4813 }
 0x94c   :  { %v3708_v33 = vadd.f32 0.5, %v3702_v41  ;;  %v4816_v32 = vpop.eup %4815 }
 0x94d   :  { %v3709_v42 = vadd.f32 0.5, %v3703_v29  ;;  %v3701_v13 = vmul.f32 0.5, %v4816_v32 }
 0x94e   :  { %v3720_v53 = vmul.f32 %v3716_v25, %v3708_v33 }
 0x94f   :  { %v3721_v44 = vmul.f32 %v3717_v45, %v3709_v42  ;;  %v3487_v42 = vld [vmem:[#allocation2 + $0x68] sm:$0xc] }
 0x978   :  { %v3608_v54 = vpop.f32.mrb[52].mxu0  ;;  %v3649_v51 = vpop.f32.mrb[52].mxu1 }
 0x979   :  { %v3668_v31 = vrot.slane %v3608_v54, 6  ;;  %v3670_v33 = vrot.slane %v3649_v51, 6  ;;  %v3610_v29 = vpop.f32.mrb[53].mxu0  ;;  %v3651_v50 = vpop.f32.mrb[53].mxu1  ;;  %v3700_v51 = vmul.f32 0.5, %v4814_v58 }
 0x97a   :  { %v3669_v41 = vrot.slane %v3610_v29, 6  ;;  %v3671_v5 = vrot.slane %v3651_v50, 6  ;;  %v3612_v36 = vpop.f32.mrb[54].mxu0  ;;  %v3653_v25 = vpop.f32.mrb[54].mxu1 }
 0x97b   :  { %v3686_v45 = vadd.f32 %v3670_v33, %v3488_v30  ;;  %v3613_v16 = vpop.f32.mrb[55].mxu0  ;;  %v3654_v55 = vpop.f32.mrb[55].mxu1  ;;  %v3684_v61 = vadd.f32 %v3668_v31, %v3486_v43  ;;  %v3706_v29 = vadd.f32 0.5, %v3700_v51  ;;  %v3707_v36 = vadd.f32 0.5, %v3701_v13  ;;  %v6943_v51 = vld [vmem:[#allocation3 + $0x60] sm:$0xff] }
 0x97c   :  { %v3687_v18 = vadd.f32 %v3671_v5, %v3489_v22  ;;  %v3685_v35 = vadd.f32 %v3669_v41, %v3487_v42 }
 0x97d   :  { %4817 = vtanh.f32 %v3686_v45  ;;  %v3692_v7 = vmul.f32 0.5, %v3684_v61 }
 0x97e   :  { %4819 = vtanh.f32 %v3687_v18  ;;  %v3693_v54 = vmul.f32 0.5, %v3685_v35 }
 0x97f   :  { %4821 = vtanh.f32 %v3692_v7  ;;  %v6936_v7 = vld [vmem:[#allocation3 + $0x30] sm:$0xff] }
 0x980   :  { %4823 = vtanh.f32 %v3693_v54  ;;  %v6939_v54 = vld [vmem:[#allocation3 + $0x68] sm:$0xff] }
 0x987   :  { %v4818_v50 = vpop.eup %4817 }
 0x988   :  { %v4820_v25 = vpop.eup %4819  ;;  %v3722_v30 = vmul.f32 %v4818_v50, %v3706_v29  ;;  %v6946_v29 = vld [vmem:[#allocation3 + $0x70] sm:$0xff]  ;;  %v6949_v50 = vld [vmem:[#allocation3 + $0xa8] sm:$0xff] }
 0x989   :  { %v3723_v33 = vmul.f32 %v4820_v25, %v3707_v36  ;;  %v4822_v31 = vpop.eup %4821  ;;  %v6952_v36 = vld [vmem:[#allocation3 + $0xb8] sm:$0xff]  ;;  %v6955_v25 = vld [vmem:[#allocation3 + $0xa0] sm:$0xff] }
 0x98a   :  { %v6923_v16 = vadd.f32 %v3722_v30, %v3720_v53  ;;  %v4824_v22 = vpop.eup %4823  ;;  %v3704_v42 = vmul.f32 0.5, %v4822_v31  ;;  %v6958_v30 = vld [vmem:[#allocation3 + $0xb0] sm:$0xff]  ;;  %v6964_v31 = vld [vmem:[#allocation3 + $0xf8] sm:$0xff] }
 0x98b   :  { %v6925_v43 = vadd.f32 %v3723_v33, %v3721_v44  ;;  %v3705_v41 = vmul.f32 0.5, %v4824_v22  ;;  %v6933_v44 = vld [vmem:[#allocation3 + $0x20] sm:$0xff]  ;;  %v6961_v33 = vld [vmem:[#allocation3 + $0xe8] sm:$0xff] }
 0x98c   :  { %4825 = vtanh.f32 %v6923_v16  ;;  %v3710_v5 = vadd.f32 0.5, %v3704_v42  ;;  %v6967_v22 = vld [vmem:[#allocation3 + $0xe0] sm:$0xff]  ;;  %v6970_v42 = vld [vmem:[#allocation3 + $0xf0] sm:$0xff] }
 0x98d   :  { %4827 = vtanh.f32 %v6925_v43  ;;  %v3711_v55 = vadd.f32 0.5, %v3705_v41  ;;  %v6973_v41 = vld [vmem:[#allocation3 + $0x128] sm:$0xff] }
 0x996   :  { %v4826_v45 = vpop.eup %4825 }
 0x997   :  { %v4828_v61 = vpop.eup %4827  ;;  %v3728_v13 = vmul.f32 %v4826_v45, %v3710_v5  ;;  %v6976_v5 = vld [vmem:[#allocation3 + $0x138] sm:$0xff]  ;;  %v6979_v45 = vld [vmem:[#allocation3 + $0x120] sm:$0xff] }
 0x998   :  { %v3729_v18 = vmul.f32 %v4828_v61, %v3711_v55  ;;  %v6982_v55 = vld [vmem:[#allocation3 + $0x130] sm:$0xff]  ;;  %v6985_v61 = vld [vmem:[#allocation3 + $0x168] sm:$0xff] }
 0x999   :  { %v3738_v35 = vpack.c.bf16 %v3728_v13, %v3728_v13  ;;  %8182 = vst [vmem:[#allocation75_spill] sm:$0xff] %v6985_v61  ;;  %v6988_v13 = vld [vmem:[#allocation3 + $0x178] sm:$0xff] }
 0x99a   :  { %v3739_v58 = vpack.c.bf16 %v3729_v18, %v3729_v18  ;;  %8183 = vst [vmem:[#allocation80_spill] sm:$0xff] %v6988_v13  ;;  %v6991_v18 = vld [vmem:[#allocation3 + $0x160] sm:$0xff] }
 0x99b   :  { %v6929_v32 = vrot.slane %v3738_v35, 1  ;;  %8184 = vst [vmem:[#allocation78_spill] sm:$0xff] %v6991_v18  ;;  %v6994_v35 = vld [vmem:[#allocation3 + $0x170] sm:$0xff] }
 0x99c   :  { %v3743_v53 = vrot.slane %v3739_v58, 1  ;;  %8185 = vst [vmem:[#allocation110_spill] sm:$0xff] %v6994_v35  ;;  %v6997_v58 = vld [vmem:[#allocation3 + $0x1a8] sm:$0xff] }
 0x99d   :  { %8186 = vst [vmem:[#allocation113_spill] sm:$0xff] %v6997_v58 }
 0x99e   :  { %3778 = vmatprep.mubr.bf16.mxu0 %v3743_v53  ;;  %3819 = vmatprep.mubr.bf16.mxu1 %v3743_v53 }
 0x99f   :  { %3779 = vmatmul.mubr.bf16.vlgmr.msra.gmra.mrb[56].mxu0 %v6929_v32  ;;  %3820 = vmatmul.mubr.bf16.vlgmr.msra.gmra.mrb[56].mxu1 %v6929_v32 }
 0x9a0   :  { %3829 = vmatpush1.bf16.msra.mxu0 %v6933_v44  ;;  %3870 = vmatpush1.bf16.msra.mxu1 %v6936_v7 }
 0x9a1   :  { %3860 = vmatprep.mubr.bf16.mxu0 %v3743_v53  ;;  %3901 = vmatprep.mubr.bf16.mxu1 %v3743_v53  ;;  %v7000_v53 = vld [vmem:[#allocation3 + $0x1b8] sm:$0xff] }
 0x9a2   :  { %3830 = vmatprep.subr.bf16.mxu0 %v6939_v54  ;;  %3871 = vmatprep.subr.bf16.mxu1 %v6660_v57  ;;  %8187 = vst [vmem:[#allocation111_spill] sm:$0xff] %v7000_v53 }
 0x9a4   :  { %3831 = vmatpush1.bf16.msra.mxu0 %v6943_v51  ;;  %3872 = vmatpush1.bf16.msra.mxu1 %v6946_v29 }
 0x9a5   :  { %3832 = vmatprep.subr.bf16.mxu0 %v6949_v50  ;;  %3873 = vmatprep.subr.bf16.mxu1 %v6952_v36 }
 0x9a8   :  { %3833 = vmatpush1.bf16.msra.mxu0 %v6955_v25  ;;  %3874 = vmatpush1.bf16.msra.mxu1 %v6958_v30 }
 0x9a9   :  { %3834 = vmatprep.subr.bf16.mxu0 %v6961_v33  ;;  %3875 = vmatprep.subr.bf16.mxu1 %v6964_v31 }
 0x9ac   :  { %3835 = vmatpush1.bf16.msra.mxu0 %v6967_v22  ;;  %3876 = vmatpush1.bf16.msra.mxu1 %v6970_v42 }
 0x9ad   :  { %3836 = vmatprep.subr.bf16.mxu0 %v6973_v41  ;;  %3877 = vmatprep.subr.bf16.mxu1 %v6976_v5 }
 0x9b0   :  { %3837 = vmatpush1.bf16.msra.mxu0 %v6979_v45  ;;  %3878 = vmatpush1.bf16.msra.mxu1 %v6982_v55 }
 0x9b1   :  { %3838 = vmatprep.subr.bf16.mxu0 %v6985_v61  ;;  %3879 = vmatprep.subr.bf16.mxu1 %v6988_v13  ;;  %v7003_v61 = vld [vmem:[#allocation3 + $0x1a0] sm:$0xff]  ;;  %v7006_v13 = vld [vmem:[#allocation3 + $0x1b0] sm:$0xff] }
 0x9b2   :  { %8188 = vst [vmem:[#allocation114_spill] sm:$0xff] %v7003_v61  ;;  %8189 = vst [vmem:[#allocation117_spill] sm:$0xff] %v7006_v13 }
 0x9b4   :  { %3839 = vmatpush1.bf16.msra.mxu0 %v6991_v18  ;;  %3880 = vmatpush1.bf16.msra.mxu1 %v6994_v35  ;;  %v7009_v18 = vld [vmem:[#allocation3 + $0x1e8] sm:$0xff]  ;;  %v7012_v35 = vld [vmem:[#allocation3 + $0x1f8] sm:$0xff] }
 0x9b5   :  { %3840 = vmatprep.subr.bf16.mxu0 %v6997_v58  ;;  %3881 = vmatprep.subr.bf16.mxu1 %v7000_v53  ;;  %8190 = vst [vmem:[#allocation115_spill] sm:$0xff] %v7009_v18  ;;  %8191 = vst [vmem:[#allocation120_spill] sm:$0xff] %v7012_v35  ;;  %v7015_v58 = vld [vmem:[#allocation3 + $0x1e0] sm:$0xff]  ;;  %v7018_v53 = vld [vmem:[#allocation3 + $0x1f0] sm:$0xff] }
 0x9b6   :  { %8192 = vst [vmem:[#allocation118_spill] sm:$0xff] %v7015_v58  ;;  %8193 = vst [vmem:[#allocation121_spill] sm:$0xff] %v7018_v53 }
 0x9b8   :  { %3841 = vmatpush1.bf16.msra.mxu0 %v7003_v61  ;;  %3882 = vmatpush1.bf16.msra.mxu1 %v7006_v13  ;;  %v7021_v61 = vld [vmem:[#allocation3 + $0x228] sm:$0xff]  ;;  %v7024_v13 = vld [vmem:[#allocation3 + $0x238] sm:$0xff] }
 0x9b9   :  { %3842 = vmatprep.subr.bf16.mxu0 %v7009_v18  ;;  %3883 = vmatprep.subr.bf16.mxu1 %v7012_v35  ;;  %8194 = vst [vmem:[#allocation119_spill] sm:$0xff] %v7021_v61  ;;  %8195 = vst [vmem:[#allocation122_spill] sm:$0xff] %v7024_v13  ;;  %v7027_v18 = vld [vmem:[#allocation3 + $0x220] sm:$0xff]  ;;  %v7030_v35 = vld [vmem:[#allocation3 + $0x230] sm:$0xff] }
 0x9ba   :  { %8196 = vst [vmem:[#allocation37_spill] sm:$0xff] %v7027_v18  ;;  %8197 = vst [vmem:[#allocation36_spill] sm:$0xff] %v7030_v35 }
 0x9bc   :  { %3843 = vmatpush1.bf16.msra.mxu0 %v7015_v58  ;;  %3884 = vmatpush1.bf16.msra.mxu1 %v7018_v53  ;;  %v7033_v58 = vld [vmem:[#allocation3 + $0x268] sm:$0xff]  ;;  %v7036_v53 = vld [vmem:[#allocation3 + $0x278] sm:$0xff] }
 0x9bd   :  { %3844 = vmatprep.subr.bf16.mxu0 %v7021_v61  ;;  %3885 = vmatprep.subr.bf16.mxu1 %v7024_v13  ;;  %8198 = vst [vmem:[#allocation40_spill] sm:$0xff] %v7033_v58  ;;  %8199 = vst [vmem:[#allocation38_spill] sm:$0xff] %v7036_v53  ;;  %v7039_v61 = vld [vmem:[#allocation3 + $0x260] sm:$0xff]  ;;  %v7042_v13 = vld [vmem:[#allocation3 + $0x270] sm:$0xff] }
 0x9be   :  { %8200 = vst [vmem:[#allocation41_spill] sm:$0xff] %v7039_v61  ;;  %8201 = vst [vmem:[#allocation39_spill] sm:$0xff] %v7042_v13 }
 0x9c0   :  { %3845 = vmatpush1.bf16.msra.mxu0 %v7027_v18  ;;  %3886 = vmatpush1.bf16.msra.mxu1 %v7030_v35  ;;  %v7045_v18 = vld [vmem:[#allocation3 + $0x2a8] sm:$0xff]  ;;  %v7048_v35 = vld [vmem:[#allocation3 + $0x2b8] sm:$0xff] }
 0x9c1   :  { %3846 = vmatprep.subr.bf16.mxu0 %v7033_v58  ;;  %3887 = vmatprep.subr.bf16.mxu1 %v7036_v53  ;;  %8202 = vst [vmem:[#allocation44_spill] sm:$0xff] %v7045_v18  ;;  %8203 = vst [vmem:[#allocation42_spill] sm:$0xff] %v7048_v35  ;;  %v7051_v58 = vld [vmem:[#allocation3 + $0x2a0] sm:$0xff]  ;;  %v7054_v53 = vld [vmem:[#allocation3 + $0x2b0] sm:$0xff] }
 0x9c2   :  { %8204 = vst [vmem:[#allocation45_spill] sm:$0xff] %v7051_v58  ;;  %8205 = vst [vmem:[#allocation43_spill] sm:$0xff] %v7054_v53 }
 0x9c4   :  { %3847 = vmatpush1.bf16.msra.mxu0 %v7039_v61  ;;  %3888 = vmatpush1.bf16.msra.mxu1 %v7042_v13  ;;  %v7057_v61 = vld [vmem:[#allocation3 + $0x2e8] sm:$0xff]  ;;  %v7060_v13 = vld [vmem:[#allocation3 + $0x2f8] sm:$0xff] }
 0x9c5   :  { %3848 = vmatprep.subr.bf16.mxu0 %v7045_v18  ;;  %3889 = vmatprep.subr.bf16.mxu1 %v7048_v35  ;;  %8206 = vst [vmem:[#allocation48_spill] sm:$0xff] %v7057_v61  ;;  %8207 = vst [vmem:[#allocation46_spill] sm:$0xff] %v7060_v13  ;;  %v7063_v18 = vld [vmem:[#allocation3 + $0x2e0] sm:$0xff]  ;;  %v7066_v35 = vld [vmem:[#allocation3 + $0x2f0] sm:$0xff] }
 0x9c6   :  { %8208 = vst [vmem:[#allocation49_spill] sm:$0xff] %v7063_v18  ;;  %8209 = vst [vmem:[#allocation47_spill] sm:$0xff] %v7066_v35 }
 0x9c8   :  { %3849 = vmatpush1.bf16.msra.mxu0 %v7051_v58  ;;  %3890 = vmatpush1.bf16.msra.mxu1 %v7054_v53  ;;  %v7069_v58 = vld [vmem:[#allocation3 + $0x328] sm:$0xff]  ;;  %v7072_v53 = vld [vmem:[#allocation3 + $0x338] sm:$0xff] }
 0x9c9   :  { %3850 = vmatprep.subr.bf16.mxu0 %v7057_v61  ;;  %3891 = vmatprep.subr.bf16.mxu1 %v7060_v13  ;;  %8210 = vst [vmem:[#allocation52_spill] sm:$0xff] %v7069_v58  ;;  %8211 = vst [vmem:[#allocation50_spill] sm:$0xff] %v7072_v53  ;;  %v7075_v61 = vld [vmem:[#allocation3 + $0x320] sm:$0xff]  ;;  %v7078_v13 = vld [vmem:[#allocation3 + $0x330] sm:$0xff] }
 0x9ca   :  { %8212 = vst [vmem:[#allocation53_spill] sm:$0xff] %v7075_v61  ;;  %8213 = vst [vmem:[#allocation51_spill] sm:$0xff] %v7078_v13 }
 0x9cc   :  { %3851 = vmatpush1.bf16.msra.mxu0 %v7063_v18  ;;  %3892 = vmatpush1.bf16.msra.mxu1 %v7066_v35  ;;  %v7081_v18 = vld [vmem:[#allocation3 + $0x368] sm:$0xff]  ;;  %v7084_v35 = vld [vmem:[#allocation3 + $0x378] sm:$0xff] }
 0x9cd   :  { %3852 = vmatprep.subr.bf16.mxu0 %v7069_v58  ;;  %3893 = vmatprep.subr.bf16.mxu1 %v7072_v53  ;;  %8214 = vst [vmem:[#allocation56_spill] sm:$0xff] %v7081_v18  ;;  %8215 = vst [vmem:[#allocation54_spill] sm:$0xff] %v7084_v35  ;;  %v7087_v58 = vld [vmem:[#allocation3 + $0x360] sm:$0xff]  ;;  %v7090_v53 = vld [vmem:[#allocation3 + $0x370] sm:$0xff] }
 0x9ce   :  { %8216 = vst [vmem:[#allocation57_spill] sm:$0xff] %v7087_v58  ;;  %8217 = vst [vmem:[#allocation55_spill] sm:$0xff] %v7090_v53 }
 0x9d0   :  { %3853 = vmatpush1.bf16.msra.mxu0 %v7075_v61  ;;  %3894 = vmatpush1.bf16.msra.mxu1 %v7078_v13  ;;  %v7093_v61 = vld [vmem:[#allocation3 + $0x3a8] sm:$0xff]  ;;  %v7096_v13 = vld [vmem:[#allocation3 + $0x3b8] sm:$0xff] }
 0x9d1   :  { %3854 = vmatprep.subr.bf16.mxu0 %v7081_v18  ;;  %3895 = vmatprep.subr.bf16.mxu1 %v7084_v35  ;;  %8218 = vst [vmem:[#allocation60_spill] sm:$0xff] %v7093_v61  ;;  %8219 = vst [vmem:[#allocation58_spill] sm:$0xff] %v7096_v13  ;;  %v7099_v18 = vld [vmem:[#allocation3 + $0x3a0] sm:$0xff]  ;;  %v7102_v35 = vld [vmem:[#allocation3 + $0x3b0] sm:$0xff] }
 0x9d4   :  { %3855 = vmatpush1.bf16.msra.mxu0 %v7087_v58  ;;  %3896 = vmatpush1.bf16.msra.mxu1 %v7090_v53  ;;  %v7105_v58 = vld [vmem:[#allocation3 + $0x3e8] sm:$0xff]  ;;  %v7108_v53 = vld [vmem:[#allocation3 + $0x3f8] sm:$0xff] }
 0x9d5   :  { %3856 = vmatprep.subr.bf16.mxu0 %v7093_v61  ;;  %3897 = vmatprep.subr.bf16.mxu1 %v7096_v13  ;;  %v7111_v61 = vld [vmem:[#allocation3 + $0x3e0] sm:$0xff]  ;;  %v7114_v13 = vld [vmem:[#allocation3 + $0x3f0] sm:$0xff] }
 0x9d8   :  { %3857 = vmatpush1.bf16.msra.mxu0 %v7099_v18  ;;  %3898 = vmatpush1.bf16.msra.mxu1 %v7102_v35 }
 0x9d9   :  { %3858 = vmatprep.subr.bf16.mxu0 %v7105_v58  ;;  %3899 = vmatprep.subr.bf16.mxu1 %v7108_v53 }
 0x9dc   :  { %3859 = vmatpush1.bf16.msra.mxu0 %v7111_v61  ;;  %3900 = vmatpush1.bf16.msra.mxu1 %v7114_v13 }
 0x9dd   :  { %4000 = vmatprep.subr.bf16.mxu0 %v6721_v20  ;;  %4041 = vmatprep.subr.bf16.mxu1 %v6724_v46  ;;  %v8220_v20 = vld [vmem:[#allocation66_spill] sm:$0xff]  ;;  %v8221_v46 = vld [vmem:[#allocation69_spill] sm:$0xff] }
 0x9df   :  { %3861 = vmatmul.mubr.bf16.vlgmr.msra.gmra.mrb[60].mxu0 %v6929_v32  ;;  %3902 = vmatmul.mubr.bf16.vlgmr.msra.gmra.mrb[60].mxu1 %v6929_v32 }
 0x9e0   :  { %4001 = vmatpush1.bf16.msra.mxu0 %v6729_v52  ;;  %4042 = vmatpush1.bf16.msra.mxu1 %v6732_v34  ;;  %v8222_v52 = vld [vmem:[#allocation67_spill] sm:$0xff]  ;;  %v8223_v34 = vld [vmem:[#allocation81_spill] sm:$0xff] }
 0x9e1   :  { %4002 = vmatprep.subr.bf16.mxu0 %v6735_v21  ;;  %4043 = vmatprep.subr.bf16.mxu1 %v6738_v62  ;;  %v8224_v21 = vld [vmem:[#allocation79_spill] sm:$0xff]  ;;  %v8225_v62 = vld [vmem:[#allocation84_spill] sm:$0xff] }
 0x9e4   :  { %4003 = vmatpush1.bf16.msra.mxu0 %v6741_v15  ;;  %4044 = vmatpush1.bf16.msra.mxu1 %v6744_v56  ;;  %v8226_v15 = vld [vmem:[#allocation82_spill] sm:$0xff]  ;;  %v8227_v56 = vld [vmem:[#allocation85_spill] sm:$0xff] }
 0x9e5   :  { %4004 = vmatprep.subr.bf16.mxu0 %v6747_v2  ;;  %4045 = vmatprep.subr.bf16.mxu1 %v6750_v39  ;;  %v8228_v2 = vld [vmem:[#allocation83_spill] sm:$0xff]  ;;  %v8229_v39 = vld [vmem:[#allocation88_spill] sm:$0xff] }
 0x9e8   :  { %4005 = vmatpush1.bf16.msra.mxu0 %v6753_v40  ;;  %4046 = vmatpush1.bf16.msra.mxu1 %v6756_v38  ;;  %v8230_v40 = vld [vmem:[#allocation86_spill] sm:$0xff]  ;;  %v8231_v38 = vld [vmem:[#allocation89_spill] sm:$0xff] }
 0x9e9   :  { %4006 = vmatprep.subr.bf16.mxu0 %v6759_v27  ;;  %4047 = vmatprep.subr.bf16.mxu1 %v6762_v17  ;;  %v8232_v27 = vld [vmem:[#allocation87_spill] sm:$0xff]  ;;  %v8233_v17 = vld [vmem:[#allocation105_spill] sm:$0xff] }
 0x9ec   :  { %4007 = vmatpush1.bf16.msra.mxu0 %v6765_v14  ;;  %4048 = vmatpush1.bf16.msra.mxu1 %v6768_v19  ;;  %v8234_v14 = vld [vmem:[#allocation103_spill] sm:$0xff]  ;;  %v8235_v19 = vld [vmem:[#allocation108_spill] sm:$0xff] }
 0x9ed   :  { %4008 = vmatprep.subr.bf16.mxu0 %v6771_v28  ;;  %4049 = vmatprep.subr.bf16.mxu1 %v6774_v11  ;;  %v8236_v28 = vld [vmem:[#allocation106_spill] sm:$0xff]  ;;  %v8237_v11 = vld [vmem:[#allocation109_spill] sm:$0xff] }
 0x9f0   :  { %4009 = vmatpush1.bf16.msra.mxu0 %v6777_v59  ;;  %4050 = vmatpush1.bf16.msra.mxu1 %v6780_v0  ;;  %v8238_v59 = vld [vmem:[#allocation107_spill] sm:$0xff]  ;;  %v8239_v0 = vld [vmem:[#allocation112_spill] sm:$0xff] }
 0x9f1   :  { %4010 = vmatprep.subr.bf16.mxu0 %v6783_v49  ;;  %4051 = vmatprep.subr.bf16.mxu1 %v6786_v37  ;;  %v8240_v49 = vld [vmem:[#allocation116_spill] sm:$0xff]  ;;  %v8241_v37 = vld [vmem:[#allocation123_spill] sm:$0xff] }
 0x9f4   :  { %4011 = vmatpush1.bf16.msra.mxu0 %v6789_v24  ;;  %4052 = vmatpush1.bf16.msra.mxu1 %v6792_v8  ;;  %v8242_v24 = vld [vmem:[#allocation72_spill] sm:$0xff]  ;;  %v8243_v8 = vld [vmem:[#allocation70_spill] sm:$0xff] }
 0x9f5   :  { %4012 = vmatprep.subr.bf16.mxu0 %v6795_v1  ;;  %4053 = vmatprep.subr.bf16.mxu1 %v6798_v3  ;;  %v8244_v1 = vld [vmem:[#allocation73_spill] sm:$0xff]  ;;  %v8245_v3 = vld [vmem:[#allocation71_spill] sm:$0xff] }
 0x9f8   :  { %4013 = vmatpush1.bf16.msra.mxu0 %v6801_v4  ;;  %4054 = vmatpush1.bf16.msra.mxu1 %v6804_v6  ;;  %v8246_v4 = vld [vmem:[#allocation76_spill] sm:$0xff]  ;;  %v8247_v6 = vld [vmem:[#allocation74_spill] sm:$0xff] }
 0x9f9   :  { %4014 = vmatprep.subr.bf16.mxu0 %v6807_v48  ;;  %4055 = vmatprep.subr.bf16.mxu1 %v6810_v9  ;;  %v8248_v48 = vld [vmem:[#allocation77_spill] sm:$0xff] }
 0x9fc   :  { %4015 = vmatpush1.bf16.msra.mxu0 %v6813_v60  ;;  %4056 = vmatpush1.bf16.msra.mxu1 %v6816_v10  ;;  %v3732_v60 = vld [vmem:[#allocation2 + $0x50] sm:$0x30] }
 0x9fd   :  { %4016 = vmatprep.subr.bf16.mxu0 %v6819_v63  ;;  %4057 = vmatprep.subr.bf16.mxu1 %v6822_v12 }
 0xa00   :  { %4017 = vmatpush1.bf16.msra.mxu0 %v6825_v23  ;;  %4058 = vmatpush1.bf16.msra.mxu1 %v6828_v47  ;;  %v3733_v23 = vld [vmem:[#allocation2 + $0x58] sm:$0x30] }
 0xa01   :  { %4018 = vmatprep.subr.bf16.mxu0 %v6831_v26  ;;  %4059 = vmatprep.subr.bf16.mxu1 %v8220_v20 }
 0xa04   :  { %4019 = vmatpush1.bf16.msra.mxu0 %v8221_v46  ;;  %4060 = vmatpush1.bf16.msra.mxu1 %v8222_v52 }
 0xa05   :  { %4020 = vmatprep.subr.bf16.mxu0 %v8223_v34  ;;  %4061 = vmatprep.subr.bf16.mxu1 %v8224_v21 }
 0xa08   :  { %4021 = vmatpush1.bf16.msra.mxu0 %v8225_v62  ;;  %4062 = vmatpush1.bf16.msra.mxu1 %v8226_v15 }
 0xa09   :  { %4022 = vmatprep.subr.bf16.mxu0 %v8227_v56  ;;  %4063 = vmatprep.subr.bf16.mxu1 %v8228_v2 }
 0xa0c   :  { %4023 = vmatpush1.bf16.msra.mxu0 %v8229_v39  ;;  %4064 = vmatpush1.bf16.msra.mxu1 %v8230_v40 }
 0xa0d   :  { %4024 = vmatprep.subr.bf16.mxu0 %v8231_v38  ;;  %4065 = vmatprep.subr.bf16.mxu1 %v8232_v27  ;;  %v3970_v38 = vrot.slane %v6923_v16, 6 }
 0xa10   :  { %4025 = vmatpush1.bf16.msra.mxu0 %v8233_v17  ;;  %4066 = vmatpush1.bf16.msra.mxu1 %v8234_v14 }
 0xa11   :  { %4026 = vmatprep.subr.bf16.mxu0 %v8235_v19  ;;  %4067 = vmatprep.subr.bf16.mxu1 %v8236_v28  ;;  %v3971_v19 = vrot.slane %v6925_v43, 6 }
 0xa14   :  { %4027 = vmatpush1.bf16.msra.mxu0 %v8237_v11  ;;  %4068 = vmatpush1.bf16.msra.mxu1 %v8238_v59  ;;  %v3730_v59 = vld [vmem:[#allocation2 + $0x40] sm:$0x30] }
 0xa15   :  { %4028 = vmatprep.subr.bf16.mxu0 %v8239_v0  ;;  %4069 = vmatprep.subr.bf16.mxu1 %v8240_v49  ;;  %v3731_v49 = vld [vmem:[#allocation2 + $0x48] sm:$0x30] }
 0xa18   :  { %4029 = vmatpush1.bf16.msra.mxu0 %v8241_v37  ;;  %4070 = vmatpush1.bf16.msra.mxu1 %v8242_v24 }
 0xa19   :  { %4030 = vmatprep.subr.bf16.mxu0 %v8243_v8  ;;  %4071 = vmatprep.subr.bf16.mxu1 %v8244_v1 }
 0xa1c   :  { %4031 = vmatpush1.bf16.msra.mxu0 %v8245_v3  ;;  %4072 = vmatpush1.bf16.msra.mxu1 %v8246_v4  ;;  %v3734_v3 = vld [vmem:[#allocation2 + $0x60] sm:$0x30] }
 0xa1d   :  { %4082 = vmatprep.subr.bf16.mxu0 %v8247_v6  ;;  %4123 = vmatprep.subr.bf16.mxu1 %v8248_v48  ;;  %v3736_v6 = vld [vmem:[#allocation2 + $0x70] sm:$0x30] }
 0xa72   :  { %v3780_v9 = vpop.f32.mrb[56].mxu0  ;;  %v3821_v10 = vpop.f32.mrb[56].mxu1 }
 0xa73   :  { %v3920_v63 = vrot.slane %v3821_v10, 4  ;;  %v3782_v12 = vpop.f32.mrb[57].mxu0  ;;  %v3823_v47 = vpop.f32.mrb[57].mxu1  ;;  %v3918_v11 = vrot.slane %v3780_v9, 4 }
 0xa74   :  { %v3921_v26 = vrot.slane %v3823_v47, 4  ;;  %v3784_v32 = vpop.f32.mrb[58].mxu0  ;;  %v3825_v20 = vpop.f32.mrb[58].mxu1  ;;  %v3919_v0 = vrot.slane %v3782_v12, 4 }
 0xa75   :  { %v3936_v46 = vadd.f32 %v3920_v63, %v3732_v60  ;;  %v3785_v52 = vpop.f32.mrb[59].mxu0  ;;  %v3826_v34 = vpop.f32.mrb[59].mxu1  ;;  %v3934_v37 = vadd.f32 %v3918_v11, %v3730_v59  ;;  %v3737_v63 = vld [vmem:[#allocation2 + $0x78] sm:$0x30] }
 0xa76   :  { %v3937_v21 = vadd.f32 %v3921_v26, %v3733_v23  ;;  %v3935_v24 = vadd.f32 %v3919_v0, %v3731_v49  ;;  %v3735_v23 = vld [vmem:[#allocation2 + $0x68] sm:$0x30] }
 0xa77   :  { %v3944_v62 = vmul.f32 0.5, %v3936_v46  ;;  %v3942_v8 = vmul.f32 0.5, %v3934_v37 }
 0xa78   :  { %v3945_v15 = vmul.f32 0.5, %v3937_v21  ;;  %v3943_v1 = vmul.f32 0.5, %v3935_v24 }
 0xa79   :  { %4829 = vtanh.f32 %v3944_v62 }
 0xa7a   :  { %4831 = vtanh.f32 %v3945_v15 }
 0xa7b   :  { %4833 = vtanh.f32 %v3942_v8 }
 0xa7c   :  { %4835 = vtanh.f32 %v3943_v1 }
 0xa83   :  { %v4830_v56 = vpop.eup %4829 }
 0xa84   :  { %v3956_v2 = vmul.f32 0.5, %v4830_v56  ;;  %v4832_v39 = vpop.eup %4831 }
 0xa85   :  { %v3957_v27 = vmul.f32 0.5, %v4832_v39  ;;  %v4834_v62 = vpop.eup %4833 }
 0xa86   :  { %v3962_v40 = vadd.f32 0.5, %v3956_v2  ;;  %v4836_v15 = vpop.eup %4835  ;;  %v3954_v39 = vmul.f32 0.5, %v4834_v62  ;;  %v8279_v62 = vld [vmem:[#allocation53_spill] sm:$0xff] }
 0xa87   :  { %v3963_v14 = vadd.f32 0.5, %v3957_v27 }
 0xa88   :  { %v3974_v17 = vmul.f32 %v3970_v38, %v3962_v40  ;;  %v3955_v40 = vmul.f32 0.5, %v4836_v15  ;;  %v3960_v38 = vadd.f32 0.5, %v3954_v39  ;;  %v8280_v15 = vld [vmem:[#allocation51_spill] sm:$0xff]  ;;  %v8283_v39 = vld [vmem:[#allocation57_spill] sm:$0xff] }
 0xa89   :  { %v3975_v28 = vmul.f32 %v3971_v19, %v3963_v14 }
 0xa8a   :  { %v3961_v14 = vadd.f32 0.5, %v3955_v40  ;;  %v8284_v40 = vld [vmem:[#allocation55_spill] sm:$0xff] }
 0xab2   :  { %v3862_v4 = vpop.f32.mrb[60].mxu0  ;;  %v3903_v16 = vpop.f32.mrb[60].mxu1 }
 0xab3   :  { %v3922_v48 = vrot.slane %v3862_v4, 4  ;;  %v3924_v60 = vrot.slane %v3903_v16, 4  ;;  %v3864_v10 = vpop.f32.mrb[61].mxu0  ;;  %v3905_v43 = vpop.f32.mrb[61].mxu1 }
 0xab4   :  { %v3923_v9 = vrot.slane %v3864_v10, 4  ;;  %v3925_v47 = vrot.slane %v3905_v43, 4  ;;  %v3866_v12 = vpop.f32.mrb[62].mxu0  ;;  %v3907_v26 = vpop.f32.mrb[62].mxu1 }
 0xab5   :  { %v3940_v32 = vadd.f32 %v3924_v60, %v3736_v6  ;;  %v3867_v20 = vpop.f32.mrb[63].mxu0  ;;  %v3908_v46 = vpop.f32.mrb[63].mxu1  ;;  %v3938_v52 = vadd.f32 %v3922_v48, %v3734_v3  ;;  %v8271_v12 = vld [vmem:[#allocation45_spill] sm:$0xff]  ;;  %v8272_v26 = vld [vmem:[#allocation43_spill] sm:$0xff] }
 0xab6   :  { %v3941_v34 = vadd.f32 %v3925_v47, %v3737_v63  ;;  %v3939_v21 = vadd.f32 %v3923_v9, %v3735_v23  ;;  %v8268_v23 = vld [vmem:[#allocation39_spill] sm:$0xff]  ;;  %v8269_v9 = vld [vmem:[#allocation44_spill] sm:$0xff]  ;;  %v8270_v47 = vld [vmem:[#allocation42_spill] sm:$0xff] }
 0xab7   :  { %4837 = vtanh.f32 %v3940_v32  ;;  %v3946_v56 = vmul.f32 0.5, %v3938_v52  ;;  %v8273_v32 = vld [vmem:[#allocation48_spill] sm:$0xff]  ;;  %v8274_v20 = vld [vmem:[#allocation46_spill] sm:$0xff]  ;;  %v8275_v46 = vld [vmem:[#allocation49_spill] sm:$0xff] }
 0xab8   :  { %4839 = vtanh.f32 %v3941_v34  ;;  %v3947_v2 = vmul.f32 0.5, %v3939_v21  ;;  %v8276_v52 = vld [vmem:[#allocation47_spill] sm:$0xff]  ;;  %v8277_v34 = vld [vmem:[#allocation52_spill] sm:$0xff]  ;;  %v8278_v21 = vld [vmem:[#allocation50_spill] sm:$0xff] }
 0xab9   :  { %4841 = vtanh.f32 %v3946_v56  ;;  %v8281_v56 = vld [vmem:[#allocation56_spill] sm:$0xff] }
 0xaba   :  { %4843 = vtanh.f32 %v3947_v2  ;;  %v8282_v2 = vld [vmem:[#allocation54_spill] sm:$0xff] }
 0xac1   :  { %v4838_v27 = vpop.eup %4837 }
 0xac2   :  { %v4840_v19 = vpop.eup %4839  ;;  %v3976_v11 = vmul.f32 %v4838_v27, %v3960_v38  ;;  %v8285_v38 = vld [vmem:[#allocation60_spill] sm:$0xff]  ;;  %v8286_v27 = vld [vmem:[#allocation58_spill] sm:$0xff] }
 0xac3   :  { %v3977_v59 = vmul.f32 %v4840_v19, %v3961_v14  ;;  %v4842_v37 = vpop.eup %4841  ;;  %v3986_v19 = vld [vmem:[#allocation2 + $0x50] sm:$0xc0] }
 0xac4   :  { %v7187_v0 = vadd.f32 %v3976_v11, %v3974_v17  ;;  %v4844_v24 = vpop.eup %4843  ;;  %v3958_v8 = vmul.f32 0.5, %v4842_v37 }
 0xac5   :  { %v7189_v49 = vadd.f32 %v3977_v59, %v3975_v28  ;;  %v3959_v1 = vmul.f32 0.5, %v4844_v24  ;;  %v8267_v28 = vld [vmem:[#allocation41_spill] sm:$0xff] }
 0xac6   :  { %4845 = vtanh.f32 %v7187_v0  ;;  %v3964_v3 = vadd.f32 0.5, %v3958_v8 }
 0xac7   :  { %4847 = vtanh.f32 %v7189_v49  ;;  %v3965_v6 = vadd.f32 0.5, %v3959_v1 }
 0xad0   :  { %v4846_v4 = vpop.eup %4845 }
 0xad1   :  { %v4848_v16 = vpop.eup %4847  ;;  %v3982_v48 = vmul.f32 %v4846_v4, %v3964_v3 }
 0xad2   :  { %v3983_v60 = vmul.f32 %v4848_v16, %v3965_v6 }
 0xad3   :  { %v3992_v10 = vpack.c.bf16 %v3982_v48, %v3982_v48 }
 0xad4   :  { %v3993_v63 = vpack.c.bf16 %v3983_v60, %v3983_v60 }
 0xad5   :  { %v7193_v43 = vrot.slane %v3992_v10, 2  ;;  %v4224_v10 = vrot.slane %v7187_v0, 6 }
 0xad6   :  { %v3997_v17 = vrot.slane %v3993_v63, 2 }
 0xad8   :  { %4032 = vmatprep.mubr.bf16.mxu0 %v3997_v17  ;;  %4073 = vmatprep.mubr.bf16.mxu1 %v3997_v17 }
 0xad9   :  { %4033 = vmatmul.mubr.bf16.vlgmr.msra.gmra.mrb[64].mxu0 %v7193_v43  ;;  %4074 = vmatmul.mubr.bf16.vlgmr.msra.gmra.mrb[64].mxu1 %v7193_v43 }
 0xada   :  { %4083 = vmatpush1.bf16.msra.mxu0 %v6933_v44  ;;  %4124 = vmatpush1.bf16.msra.mxu1 %v6936_v7  ;;  %v8250_v44 = vld [vmem:[#allocation80_spill] sm:$0xff]  ;;  %v8251_v7 = vld [vmem:[#allocation78_spill] sm:$0xff] }
 0xadb   :  { %4114 = vmatprep.mubr.bf16.mxu0 %v3997_v17  ;;  %4155 = vmatprep.mubr.bf16.mxu1 %v3997_v17 }
 0xadc   :  { %4084 = vmatprep.subr.bf16.mxu0 %v6939_v54  ;;  %4125 = vmatprep.subr.bf16.mxu1 %v6660_v57  ;;  %v8249_v57 = vld [vmem:[#allocation75_spill] sm:$0xff]  ;;  %v8252_v54 = vld [vmem:[#allocation110_spill] sm:$0xff] }
 0xade   :  { %4085 = vmatpush1.bf16.msra.mxu0 %v6943_v51  ;;  %4126 = vmatpush1.bf16.msra.mxu1 %v6946_v29  ;;  %v8253_v51 = vld [vmem:[#allocation113_spill] sm:$0xff]  ;;  %v8254_v29 = vld [vmem:[#allocation111_spill] sm:$0xff] }
 0xadf   :  { %4086 = vmatprep.subr.bf16.mxu0 %v6949_v50  ;;  %4127 = vmatprep.subr.bf16.mxu1 %v6952_v36  ;;  %v8255_v50 = vld [vmem:[#allocation114_spill] sm:$0xff]  ;;  %v8256_v36 = vld [vmem:[#allocation117_spill] sm:$0xff] }
 0xae2   :  { %4087 = vmatpush1.bf16.msra.mxu0 %v6955_v25  ;;  %4128 = vmatpush1.bf16.msra.mxu1 %v6958_v30  ;;  %v8257_v25 = vld [vmem:[#allocation115_spill] sm:$0xff]  ;;  %v8258_v30 = vld [vmem:[#allocation120_spill] sm:$0xff] }
 0xae3   :  { %4088 = vmatprep.subr.bf16.mxu0 %v6961_v33  ;;  %4129 = vmatprep.subr.bf16.mxu1 %v6964_v31  ;;  %v8259_v33 = vld [vmem:[#allocation118_spill] sm:$0xff]  ;;  %v8260_v31 = vld [vmem:[#allocation121_spill] sm:$0xff] }
 0xae6   :  { %4089 = vmatpush1.bf16.msra.mxu0 %v6967_v22  ;;  %4130 = vmatpush1.bf16.msra.mxu1 %v6970_v42  ;;  %v8261_v22 = vld [vmem:[#allocation119_spill] sm:$0xff]  ;;  %v8262_v42 = vld [vmem:[#allocation122_spill] sm:$0xff] }
 0xae7   :  { %4090 = vmatprep.subr.bf16.mxu0 %v6973_v41  ;;  %4131 = vmatprep.subr.bf16.mxu1 %v6976_v5  ;;  %v8263_v41 = vld [vmem:[#allocation37_spill] sm:$0xff]  ;;  %v8264_v5 = vld [vmem:[#allocation36_spill] sm:$0xff] }
 0xaea   :  { %4091 = vmatpush1.bf16.msra.mxu0 %v6979_v45  ;;  %4132 = vmatpush1.bf16.msra.mxu1 %v6982_v55  ;;  %v8265_v45 = vld [vmem:[#allocation40_spill] sm:$0xff]  ;;  %v8266_v55 = vld [vmem:[#allocation38_spill] sm:$0xff] }
 0xaeb   :  { %4092 = vmatprep.subr.bf16.mxu0 %v8249_v57  ;;  %4133 = vmatprep.subr.bf16.mxu1 %v8250_v44  ;;  %v4225_v57 = vrot.slane %v7189_v49, 6 }
 0xaee   :  { %4093 = vmatpush1.bf16.msra.mxu0 %v8251_v7  ;;  %4134 = vmatpush1.bf16.msra.mxu1 %v8252_v54  ;;  %v3984_v54 = vld [vmem:[#allocation2 + $0x40] sm:$0xc0] }
 0xaef   :  { %4094 = vmatprep.subr.bf16.mxu0 %v8253_v51  ;;  %4135 = vmatprep.subr.bf16.mxu1 %v8254_v29  ;;  %v3985_v29 = vld [vmem:[#allocation2 + $0x48] sm:$0xc0] }
 0xaf2   :  { %4095 = vmatpush1.bf16.msra.mxu0 %v8255_v50  ;;  %4136 = vmatpush1.bf16.msra.mxu1 %v8256_v36 }
 0xaf3   :  { %4096 = vmatprep.subr.bf16.mxu0 %v8257_v25  ;;  %4137 = vmatprep.subr.bf16.mxu1 %v8258_v30 }
 0xaf6   :  { %4097 = vmatpush1.bf16.msra.mxu0 %v8259_v33  ;;  %4138 = vmatpush1.bf16.msra.mxu1 %v8260_v31  ;;  %v3988_v33 = vld [vmem:[#allocation2 + $0x60] sm:$0xc0] }
 0xaf7   :  { %4098 = vmatprep.subr.bf16.mxu0 %v8261_v22  ;;  %4139 = vmatprep.subr.bf16.mxu1 %v8262_v42  ;;  %v3990_v22 = vld [vmem:[#allocation2 + $0x70] sm:$0xc0] }
 0xafa   :  { %4099 = vmatpush1.bf16.msra.mxu0 %v8263_v41  ;;  %4140 = vmatpush1.bf16.msra.mxu1 %v8264_v5 }
 0xafb   :  { %4100 = vmatprep.subr.bf16.mxu0 %v8265_v45  ;;  %4141 = vmatprep.subr.bf16.mxu1 %v8266_v55  ;;  %v3991_v45 = vld [vmem:[#allocation2 + $0x78] sm:$0xc0]  ;;  %v3989_v55 = vld [vmem:[#allocation2 + $0x68] sm:$0xc0] }
 0xafe   :  { %4101 = vmatpush1.bf16.msra.mxu0 %v8267_v28  ;;  %4142 = vmatpush1.bf16.msra.mxu1 %v8268_v23 }
 0xaff   :  { %4102 = vmatprep.subr.bf16.mxu0 %v8269_v9  ;;  %4143 = vmatprep.subr.bf16.mxu1 %v8270_v47 }
 0xb02   :  { %4103 = vmatpush1.bf16.msra.mxu0 %v8271_v12  ;;  %4144 = vmatpush1.bf16.msra.mxu1 %v8272_v26 }
 0xb03   :  { %4104 = vmatprep.subr.bf16.mxu0 %v8273_v32  ;;  %4145 = vmatprep.subr.bf16.mxu1 %v8274_v20 }
 0xb06   :  { %4105 = vmatpush1.bf16.msra.mxu0 %v8275_v46  ;;  %4146 = vmatpush1.bf16.msra.mxu1 %v8276_v52 }
 0xb07   :  { %4106 = vmatprep.subr.bf16.mxu0 %v8277_v34  ;;  %4147 = vmatprep.subr.bf16.mxu1 %v8278_v21 }
 0xb0a   :  { %4107 = vmatpush1.bf16.msra.mxu0 %v8279_v62  ;;  %4148 = vmatpush1.bf16.msra.mxu1 %v8280_v15 }
 0xb0b   :  { %4108 = vmatprep.subr.bf16.mxu0 %v8281_v56  ;;  %4149 = vmatprep.subr.bf16.mxu1 %v8282_v2 }
 0xb0e   :  { %4109 = vmatpush1.bf16.msra.mxu0 %v8283_v39  ;;  %4150 = vmatpush1.bf16.msra.mxu1 %v8284_v40 }
 0xb0f   :  { %4110 = vmatprep.subr.bf16.mxu0 %v8285_v38  ;;  %4151 = vmatprep.subr.bf16.mxu1 %v8286_v27 }
 0xb12   :  { %4111 = vmatpush1.bf16.msra.mxu0 %v7099_v18  ;;  %4152 = vmatpush1.bf16.msra.mxu1 %v7102_v35  ;;  %v3987_v18 = vld [vmem:[#allocation2 + $0x58] sm:$0xc0] }
 0xb13   :  { %4112 = vmatprep.subr.bf16.mxu0 %v7105_v58  ;;  %4153 = vmatprep.subr.bf16.mxu1 %v7108_v53 }
 0xb16   :  { %4113 = vmatpush1.bf16.msra.mxu0 %v7111_v61  ;;  %4154 = vmatpush1.bf16.msra.mxu1 %v7114_v13 }
 0xb19   :  { %4115 = vmatmul.mubr.bf16.vlgmr.msra.gmra.mrb[68].mxu0 %v7193_v43  ;;  %4156 = vmatmul.mubr.bf16.vlgmr.msra.gmra.mrb[68].mxu1 %v7193_v43 }
 0xbac   :  { %v4034_v14 = vpop.f32.mrb[64].mxu0  ;;  %v4075_v11 = vpop.f32.mrb[64].mxu1 }
 0xbad   :  { %v4174_v59 = vrot.slane %v4075_v11, 2  ;;  %v4036_v37 = vpop.f32.mrb[65].mxu0  ;;  %v4077_v24 = vpop.f32.mrb[65].mxu1  ;;  %v4172_v7 = vrot.slane %v4034_v14, 2 }
 0xbae   :  { %v4175_v35 = vrot.slane %v4077_v24, 2  ;;  %v4038_v8 = vpop.f32.mrb[66].mxu0  ;;  %v4079_v58 = vpop.f32.mrb[66].mxu1  ;;  %v4173_v51 = vrot.slane %v4036_v37, 2 }
 0xbaf   :  { %v4190_v1 = vadd.f32 %v4174_v59, %v3986_v19  ;;  %v4039_v53 = vpop.f32.mrb[67].mxu0  ;;  %v4080_v3 = vpop.f32.mrb[67].mxu1  ;;  %v4188_v50 = vadd.f32 %v4172_v7, %v3984_v54 }
 0xbb0   :  { %v4191_v61 = vadd.f32 %v4175_v35, %v3987_v18  ;;  %v4189_v36 = vadd.f32 %v4173_v51, %v3985_v29 }
 0xbb1   :  { %v4198_v4 = vmul.f32 0.5, %v4190_v1  ;;  %v4196_v25 = vmul.f32 0.5, %v4188_v50 }
 0xbb2   :  { %v4199_v13 = vmul.f32 0.5, %v4191_v61  ;;  %v4197_v30 = vmul.f32 0.5, %v4189_v36 }
 0xbb3   :  { %4849 = vtanh.f32 %v4198_v4 }
 0xbb4   :  { %4851 = vtanh.f32 %v4199_v13 }
 0xbb5   :  { %4853 = vtanh.f32 %v4196_v25 }
 0xbb6   :  { %4855 = vtanh.f32 %v4197_v30 }
 0xbbd   :  { %v4850_v6 = vpop.eup %4849 }
 0xbbe   :  { %v4210_v16 = vmul.f32 0.5, %v4850_v6  ;;  %v4852_v48 = vpop.eup %4851 }
 0xbbf   :  { %v4211_v63 = vmul.f32 0.5, %v4852_v48  ;;  %v4854_v34 = vpop.eup %4853 }
 0xbc0   :  { %v4216_v60 = vadd.f32 0.5, %v4210_v16  ;;  %v4856_v21 = vpop.eup %4855  ;;  %v4208_v56 = vmul.f32 0.5, %v4854_v34 }
 0xbc1   :  { %v4217_v43 = vadd.f32 0.5, %v4211_v63  ;;  %v4209_v2 = vmul.f32 0.5, %v4856_v21 }
 0xbc2   :  { %v4228_v17 = vmul.f32 %v4224_v10, %v4216_v60  ;;  %v4214_v39 = vadd.f32 0.5, %v4208_v56 }
 0xbc3   :  { %v4229_v44 = vmul.f32 %v4225_v57, %v4217_v43  ;;  %v4215_v38 = vadd.f32 0.5, %v4209_v2 }
 0xbec   :  { %v4116_v31 = vpop.f32.mrb[68].mxu0  ;;  %v4157_v0 = vpop.f32.mrb[68].mxu1 }
 0xbed   :  { %v4176_v42 = vrot.slane %v4116_v31, 2  ;;  %v4178_v41 = vrot.slane %v4157_v0, 2  ;;  %v4118_v5 = vpop.f32.mrb[69].mxu0  ;;  %v4159_v49 = vpop.f32.mrb[69].mxu1 }
 0xbee   :  { %v4177_v28 = vrot.slane %v4118_v5, 2  ;;  %v4179_v23 = vrot.slane %v4159_v49, 2  ;;  %v4120_v9 = vpop.f32.mrb[70].mxu0  ;;  %v4161_v47 = vpop.f32.mrb[70].mxu1 }
 0xbef   :  { %v4194_v12 = vadd.f32 %v4178_v41, %v3990_v22  ;;  %v4121_v26 = vpop.f32.mrb[71].mxu0  ;;  %v4162_v32 = vpop.f32.mrb[71].mxu1  ;;  %v4192_v20 = vadd.f32 %v4176_v42, %v3988_v33 }
 0xbf0   :  { %v4195_v46 = vadd.f32 %v4179_v23, %v3991_v45  ;;  %v4193_v52 = vadd.f32 %v4177_v28, %v3989_v55 }
 0xbf1   :  { %4857 = vtanh.f32 %v4194_v12  ;;  %v4200_v62 = vmul.f32 0.5, %v4192_v20 }
 0xbf2   :  { %4859 = vtanh.f32 %v4195_v46  ;;  %v4201_v15 = vmul.f32 0.5, %v4193_v52 }
 0xbf3   :  { %4861 = vtanh.f32 %v4200_v62 }
 0xbf4   :  { %4863 = vtanh.f32 %v4201_v15 }
 0xbfb   :  { %v4858_v40 = vpop.eup %4857 }
 0xbfc   :  { %v4860_v27 = vpop.eup %4859  ;;  %v4230_v14 = vmul.f32 %v4858_v40, %v4214_v39 }
 0xbfd   :  { %v4231_v19 = vmul.f32 %v4860_v27, %v4215_v38  ;;  %v4862_v37 = vpop.eup %4861 }
 0xbfe   :  { %v4232_v11 = vadd.f32 %v4230_v14, %v4228_v17  ;;  %v4864_v18 = vpop.eup %4863  ;;  %v4212_v24 = vmul.f32 0.5, %v4862_v37 }
 0xbff   :  { %v4233_v59 = vadd.f32 %v4231_v19, %v4229_v44  ;;  %v4213_v35 = vmul.f32 0.5, %v4864_v18 }
 0xc00   :  { %4865 = vtanh.f32 %v4232_v11  ;;  %v4218_v8 = vadd.f32 0.5, %v4212_v24 }
 0xc01   :  { %4867 = vtanh.f32 %v4233_v59  ;;  %v4219_v1 = vadd.f32 0.5, %v4213_v35 }
 0xc0a   :  { %v4866_v58 = vpop.eup %4865 }
 0xc0b   :  { %v4868_v53 = vpop.eup %4867  ;;  %v4236_v3 = vmul.f32 %v4866_v58, %v4218_v8 }
 0xc0c   :  { %v4237_v61 = vmul.f32 %v4868_v53, %v4219_v1 }
 0xc0d   :  { %5173 = dma.done.wait [#allocation6 + $0x1], 2048 }
 0xc0e   :  { %5174 = vsyncadd [#allocation6 + $0x1], 4294965248  ;;  %v8287_v4 = vld [vmem:[#allocation28_spill] sm:$0xff]  ;;  %v4245_v13 = vpack.c.bf16 %v4237_v61, %v4237_v61 }
 0xc0f   :  { %4635 = vmatprep.subr.bf16.mxu0 %v8287_v4 }
 0xc10   :  { %5175 = dma.done.wait [#allocation6 + $0x2], 16 }
 0xc11   :  { %5176 = vsyncadd [#allocation6 + $0x2], 4294967280  ;;  %v8288_v6 = vld [vmem:[#allocation20_spill] sm:$0xff]  ;;  %v8289_v16 = vld [vmem:[#allocation29_spill] sm:$0xff]  ;;  %v4272_v48 = vrot.slane %v4245_v13, 3  ;;  %v4244_v29 = vpack.c.bf16 %v4236_v3, %v4236_v3  ;;  %s5192_s2 = smov [#allocation10]  }
 0xc12   :  { %4636 = vmatpush3.bf16.msra.mxu0 %v8288_v6  ;;  %v8290_v60 = vld [vmem:[#allocation21_spill] sm:$0xff]  ;;  %v8291_v10 = vld [vmem:[#allocation30_spill] sm:$0xff]  ;;  %v8293_v17 = vld [vmem:[#allocation31_spill] sm:$0xff]  ;;  %s4322_s15 = sshll.u32 %s5192_s2, 4  ;;  %s4323_s15 = int_to_ptr.vmem [resolvable:$true] %s4322_s15 }
 0xc13   :  { %4637 = vmatprep.subr.bf16.mxu0 %v8289_v16  ;;  %4307 = vmatprep.mubr.bf16.mxu0 %v4272_v48  ;;  %v8292_v63 = vld [vmem:[#allocation22_spill] sm:$0xff]  ;;  %v8294_v43 = vld [vmem:[#allocation23_spill] sm:$0xff]  ;;  %v8295_v57 = vld [vmem:[#allocation32_spill] sm:$0xff]  ;;  %v4271_v25 = vrot.slane %v4244_v29, 3  ;;  %s5147_s16 = scalar_lea.vmem %s4323_s15, 32  ;;  %p5152_p9 = scmp.lt.s32.totalorder %s4323_s15, %s4323_s15 }
 0xc14   :  { %v8296_v44 = vld [vmem:[#allocation24_spill] sm:$0xff]  ;;  %v8297_v7 = vld [vmem:[#allocation33_spill] sm:$0xff]  ;;  %v8299_v51 = vld [vmem:[#allocation34_spill] sm:$0xff]  ;;  %p5148_p8 = scmp.ne.s32.totalorder %s4323_s15, %s5147_s16  ;;  %p5153_p10 = scmp.lt.s32.totalorder %s5147_s16, %s5147_s16 }
 0xc15   :  { %v8298_v54 = vld [vmem:[#allocation25_spill] sm:$0xff]  ;;  %v8300_v50 = vld [vmem:[#allocation26_spill] sm:$0xff]  ;;  %v8301_v36 = vld [vmem:[#allocation35_spill] sm:$0xff] }
 0xc16   :  { %4638 = vmatpush3.bf16.msra.mxu0 %v8290_v60  ;;  %v8302_v30 = vld [vmem:[#allocation27_spill] sm:$0xff]  ;;  %p5154_p11 = por %p5153_p10, %p5152_p9 }
 0xc17   :  { %4639 = vmatprep.subr.bf16.mxu0 %v8291_v10  ;;  %v4631_v31 = vld [vmem:[#allocation5] ss:$0 sm:$0xff] }
 0xc18   :  { %p5155_p12 = pnand %p5154_p11, %p5148_p8 }
 0xc1a   :  { %4640 = vmatpush3.bf16.msra.mxu0 %v8292_v63 }
 0xc1b   :  { %4641 = vmatprep.subr.bf16.mxu0 %v8293_v17 }
 0xc1e   :  { %4642 = vmatpush3.bf16.msra.mxu0 %v8294_v43 }
 0xc1f   :  { %4643 = vmatprep.subr.bf16.mxu0 %v8295_v57 }
 0xc22   :  { %4644 = vmatpush3.bf16.msra.mxu0 %v8296_v44 }
 0xc23   :  { %4645 = vmatprep.subr.bf16.mxu0 %v8297_v7 }
 0xc26   :  { %4646 = vmatpush3.bf16.msra.mxu0 %v8298_v54 }
 0xc27   :  { %4647 = vmatprep.subr.bf16.mxu0 %v8299_v51 }
 0xc2a   :  { %4648 = vmatpush3.bf16.msra.mxu0 %v8300_v50 }
 0xc2b   :  { %4649 = vmatprep.subr.bf16.mxu0 %v8301_v36 }
 0xc2e   :  { %4650 = vmatpush3.bf16.msra.mxu0 %v8302_v30 }
 0xc31   :  { %4308 = vmatmul.mubr.bf16.vlgmr.msra.gmra.mrb[72].mxu0 %v4271_v25 }
 0xd04   :  { %v4651_v33 = vpop.f32.mrb[72].mxu0 }
 0xd05   :  { %v4652_v22 = vpop.f32.mrb[73].mxu0 }
 0xd06   :  { %v4653_v0 = vadd.f32 %v4652_v22, %v4651_v33  ;;  %v4654_v42 = vpop.f32.mrb[74].mxu0 }
 0xd07   :  { %v4655_v41 = vpop.f32.mrb[75].mxu0 }
 0xd08   :  { %v4310_v5 = vadd.f32 %v4653_v0, %v4631_v31 }
 0xd0a   :  { %4315 = vst [vmem:[#allocation10] sm:$0x3] %v4310_v5 }
 0xd0b   :  { %5158 = shalt.err (!%p5155_p12)
}
 0xd0c   :  { %s5159_s19 = scalar_lea.hbm %s7297_s6, 32 }
 0xd0d   :  { %p5160_p13 = scmp.ne.s32.totalorder %s7297_s6, %s5159_s19  ;;  %p5163_p0 = scmp.lt.u32.totalorder %s5159_s19, %s7297_s6 }
 0xd0f   :  { %p5165_p1 = pnand %p5163_p0, %p5160_p13 }
 0xd11   :  { %5168 = shalt.err (!%p5165_p1)
}
 0xd12   :  { %4325 = dma.vmem_to_hbm [thread:$0]  %s4323_s15, 32, %s7297_s6, [#allocation9]  }
 0xd13   :  { %5177 = dma.done.wait [#allocation9], 32  }
 0xd14   :  { %5178 = vsyncadd [#allocation9], 4294967264 }
 0xd15   :  { %4329 = vsyncpa [#allocation8], 1 }
 0xd16   :  { %4330 = vsyncpa [#allocation9], 1 }
 0xd17   :  { %4331 = vsyncmov [#allocation6] }
 0xd1a   :  { %s4332_s25 = vpop.sfrf %4331 }
 0xd1b   :  { %p4632_p2 = scmp.ne.s32.totalorder %s4332_s25, 0 }
 0xd1d   :  { %4336 = shalt.err (%p4632_p2)  }
 0xd1e   :  { %4338 = vsyncmov [#allocation6 + $0x1] }
 0xd21   :  { %s4339_s26 = vpop.sfrf %4338 }
 0xd22   :  { %p4633_p3 = scmp.ne.s32.totalorder %s4339_s26, 0 }
 0xd24   :  { %4343 = shalt.err (%p4633_p3)  }
 0xd25   :  { %4345 = vsyncmov [#allocation6 + $0x2] }
 0xd28   :  { %s4346_s27 = vpop.sfrf %4345 }
 0xd29   :  { %p4634_p4 = scmp.ne.s32.totalorder %s4346_s27, 0 }
 0xd2b   :  { %4350 = shalt.err (%p4634_p4)  }

</bundles_post_ra>
